<compile_context>
chip_gen: v7x
topology: tpu7x:2x2x1
jax: 0.10.0
libtpu: 0.0.40
codegen_flags: <defaults>
</compile_context>

<pallas_src>
import functools

import jax
import jax.numpy as jnp
from jax.experimental import pallas as pl
from jax.experimental.pallas import tpu as pltpu

_LN_EPS = 1e-5        # nn.LayerNorm default
_BN_EPS = 1e-5        # nn.BatchNorm2d default
_L2_EPS = 1e-12       # F.normalize default eps
_MATMUL_DTYPE = jnp.bfloat16   # MXU operand dtype (f32 accumulation everywhere)
_SQRT1_2 = 0.7071067811865476


def _query_vmem_bytes():
    try:
        return int(pltpu.get_tpu_info().vmem_capacity_bytes)
    except Exception:
        return 64 * 2 ** 20          # conservative (v7x per-core physical VMEM)


_VMEM_BYTES = _query_vmem_bytes()
# Generation-aware row tile: bigger tiles on 128 MiB parts (v5e/v6e), 512 on v7x (64 MiB).
_MAX_ROW_TILE = 1024 if _VMEM_BYTES >= 100 * 2 ** 20 else 512


def _pick_row_tile(m, max_tile=None):
    """Largest multiple-of-8 divisor of m up to max_tile; falls back to the full m."""
    max_tile = max_tile or _MAX_ROW_TILE
    cand = min(max_tile, (m // 8) * 8)
    while cand >= 8:
        if m % cand == 0:
            return cand
        cand -= 8
    return m


def _compiler_params(semantics, est_bytes=None):
    kw = dict(dimension_semantics=semantics)
    if est_bytes is not None:
        # Never below the 32 MiB scoped default (so this can only help, e.g. on v5e's
        # 16 MiB default), never above ~90% of physical VMEM.
        kw["vmem_limit_bytes"] = int(max(32 * 2 ** 20,
                                         min(0.9 * _VMEM_BYTES, 2 * est_bytes)))
    return pltpu.CompilerParams(**kw)


# ---------------------------------------------------------------------------
# Exact-erf GELU helper (A&S 7.1.26 polynomial, |err| < 1.5e-7) usable inside kernels.
# ---------------------------------------------------------------------------
def _erf_f32(x):
    p = 0.3275911
    a1, a2, a3, a4, a5 = 0.254829592, -0.284496736, 1.421413741, -1.453152027, 1.061405429
    ax = jnp.abs(x)
    t = 1.0 / (1.0 + p * ax)
    poly = t * (a1 + t * (a2 + t * (a3 + t * (a4 + t * a5))))
    y = 1.0 - poly * jnp.exp(-ax * ax)
    return jnp.where(x < 0.0, -y, y)


def _gelu_erf(x):
    return 0.5 * x * (1.0 + _erf_f32(x * _SQRT1_2))


# ---------------------------------------------------------------------------
# Fused [LayerNorm] -> matmul(+bias) -> [residual add] -> [BN sum/sumsq stats] kernel
# ---------------------------------------------------------------------------
def _linear_kernel(*refs, has_ln, has_bias, has_residual, bn_stats):
    f32 = jnp.float32
    it = iter(refs)
    x_ref = next(it)
    if has_ln:
        g_ref = next(it)
        be_ref = next(it)
    w_ref = next(it)
    bias_ref = next(it) if has_bias else None
    res_ref = next(it) if has_residual else None
    o_ref = next(it)
    if bn_stats:
        sum_ref = next(it)
        sumsq_ref = next(it)

    x = x_ref[...].astype(f32)
    if has_ln:
        mu = jnp.mean(x, axis=-1, keepdims=True)
        xc = x - mu
        var = jnp.mean(xc * xc, axis=-1, keepdims=True)
        x = xc * jax.lax.rsqrt(var + _LN_EPS) * g_ref[...].astype(f32) + be_ref[...].astype(f32)

    acc = jnp.dot(x.astype(_MATMUL_DTYPE), w_ref[...].astype(_MATMUL_DTYPE),
                  preferred_element_type=f32)
    if has_bias:
        acc = acc + bias_ref[...].astype(f32)

    if bn_stats:
        @pl.when(pl.program_id(0) == 0)
        def _init():
            sum_ref[...] = jnp.zeros_like(sum_ref)
            sumsq_ref[...] = jnp.zeros_like(sumsq_ref)

        sum_ref[...] += jnp.sum(acc, axis=0, keepdims=True)
        sumsq_ref[...] += jnp.sum(acc * acc, axis=0, keepdims=True)

    y = acc
    if has_residual:
        y = y + res_ref[...].astype(f32)
    o_ref[...] = y.astype(o_ref.dtype)


def fused_linear_pallas(x2d, w, bias=None, ln_gamma=None, ln_beta=None,
                        residual=None, bn_stats=False):
    m, kdim = x2d.shape
    k2, n = w.shape
    assert kdim == k2
    tile = _pick_row_tile(m)
    has_ln = ln_gamma is not None
    has_bias = bias is not None
    has_residual = residual is not None

    args = [x2d]
    in_specs = [pl.BlockSpec((tile, kdim), lambda i: (i, 0))]
    if has_ln:
        args += [ln_gamma.reshape(1, kdim).astype(jnp.float32),
                 ln_beta.reshape(1, kdim).astype(jnp.float32)]
        in_specs += [pl.BlockSpec((1, kdim), lambda i: (0, 0)),
                     pl.BlockSpec((1, kdim), lambda i: (0, 0))]
    args.append(w.astype(_MATMUL_DTYPE))                     # bf16 weight DMA
    in_specs.append(pl.BlockSpec((kdim, n), lambda i: (0, 0)))
    if has_bias:
        args.append(bias.reshape(1, n).astype(jnp.float32))
        in_specs.append(pl.BlockSpec((1, n), lambda i: (0, 0)))
    if has_residual:
        args.append(residual)
        in_specs.append(pl.BlockSpec((tile, n), lambda i: (i, 0)))

    out_shapes = [jax.ShapeDtypeStruct((m, n), x2d.dtype)]
    out_specs = [pl.BlockSpec((tile, n), lambda i: (i, 0))]
    if bn_stats:
        out_shapes += [jax.ShapeDtypeStruct((1, n), jnp.float32),
                       jax.ShapeDtypeStruct((1, n), jnp.float32)]
        out_specs += [pl.BlockSpec((1, n), lambda i: (0, 0)),
                      pl.BlockSpec((1, n), lambda i: (0, 0))]

    est = 2 * (tile * kdim * 4 + tile * n * 4 * (2 if has_residual else 1)
               + kdim * n * 2 + n * 8) + (1 << 20)
    sem = ("arbitrary",) if bn_stats else ("parallel",)
    kern = functools.partial(_linear_kernel, has_ln=has_ln, has_bias=has_bias,
                             has_residual=has_residual, bn_stats=bn_stats)
    res = pl.pallas_call(
        kern,
        out_shape=tuple(out_shapes) if bn_stats else out_shapes[0],
        grid=(m // tile,),
        in_specs=in_specs,
        out_specs=tuple(out_specs) if bn_stats else out_specs[0],
        compiler_params=_compiler_params(sem, est),
    )(*args)
    return res


# ---------------------------------------------------------------------------
# BatchNorm finalize (tiny O(C) math) + streaming apply kernel with fused GELU/residual
# ---------------------------------------------------------------------------
def _bn_finalize(sums, sumsqs, count, gamma, beta):
    mean = sums.reshape(-1).astype(jnp.float32) / count
    var = sumsqs.reshape(-1).astype(jnp.float32) / count - mean * mean   # biased (training)
    inv = jax.lax.rsqrt(var + _BN_EPS)
    scale = gamma.astype(jnp.float32) * inv
    shift = beta.astype(jnp.float32) - mean * scale
    return scale, shift


def _bn_apply_kernel(*refs, apply_gelu, has_residual):
    f32 = jnp.float32
    it = iter(refs)
    x_ref = next(it)
    scale_ref = next(it)
    shift_ref = next(it)
    res_ref = next(it) if has_residual else None
    o_ref = next(it)

    y = x_ref[...].astype(f32) * scale_ref[...] + shift_ref[...]
    if apply_gelu:
        y = _gelu_erf(y)
    if has_residual:
        y = y + res_ref[...].astype(f32)
    o_ref[...] = y.astype(o_ref.dtype)


def bn_apply_pallas(x2d, scale, shift, *, apply_gelu=False, residual=None):
    m, c = x2d.shape
    # Lane-density folding: pack k = 128 // C rows into the lane axis when C < 128 so
    # every load/store is a full-width vector op.
    k = 1
    if c < 128 and 128 % c == 0 and m % (128 // c) == 0:
        k = 128 // c
    mf, cf = m // k, c * k
    xf = x2d.reshape(mf, cf)
    scale_f = jnp.tile(scale.astype(jnp.float32), (k,)).reshape(1, cf)
    shift_f = jnp.tile(shift.astype(jnp.float32), (k,)).reshape(1, cf)
    tile = _pick_row_tile(mf)

    args = [xf, scale_f, shift_f]
    in_specs = [pl.BlockSpec((tile, cf), lambda i: (i, 0)),
                pl.BlockSpec((1, cf), lambda i: (0, 0)),
                pl.BlockSpec((1, cf), lambda i: (0, 0))]
    if residual is not None:
        args.append(residual.reshape(mf, cf))
        in_specs.append(pl.BlockSpec((tile, cf), lambda i: (i, 0)))

    out = pl.pallas_call(
        functools.partial(_bn_apply_kernel, apply_gelu=apply_gelu,
                          has_residual=residual is not None),
        out_shape=jax.ShapeDtypeStruct((mf, cf), x2d.dtype),
        grid=(mf // tile,),
        in_specs=in_specs,
        out_specs=pl.BlockSpec((tile, cf), lambda i: (i, 0)),
        compiler_params=_compiler_params(("parallel",)),
    )(*args)
    return out.reshape(m, c)


# ---------------------------------------------------------------------------
# Depthwise 3x3 conv (stride 1, zero pad 1): in-kernel halo slicing + fused BN stats
# ---------------------------------------------------------------------------
def _dwconv_kernel(xp_ref, w_ref, b_ref, o_ref, sum_ref, sumsq_ref, *, s):
    f32 = jnp.float32
    xp = xp_ref[...].astype(f32)                       # (s+2, s+2, C)
    wv = w_ref[...].astype(f32)                        # (3, 3, C)
    acc = jnp.zeros(o_ref.shape, f32) + b_ref[...].astype(f32)
    for di in range(3):                                # unrolled at trace time
        for dj in range(3):
            acc = acc + xp[di:di + s, dj:dj + s, :] * wv[di:di + 1, dj:dj + 1, :]
    o_ref[...] = acc.astype(o_ref.dtype)

    @pl.when(pl.program_id(0) == 0)
    def _init():
        sum_ref[...] = jnp.zeros_like(sum_ref)
        sumsq_ref[...] = jnp.zeros_like(sumsq_ref)

    sum_ref[...] += jnp.sum(acc, axis=(0, 1)).reshape(1, -1)
    sumsq_ref[...] += jnp.sum(acc * acc, axis=(0, 1)).reshape(1, -1)


def dwconv3x3_bn_stats_pallas(x_hw, w_dw, b_dw):
    """x_hw: (B, S, S, C) NHWC.  Returns ((B*S*S, C) output, (1,C) sum, (1,C) sumsq)."""
    bsz, s, _, c = x_hw.shape
    xp = jnp.pad(x_hw, ((0, 0), (1, 1), (1, 1), (0, 0)))   # halo handled once in HBM
    est = 2 * ((s + 2) * (s + 2) * c * 4 + s * s * c * 4) + 9 * c * 4 + (1 << 20)
    out, sums, sumsqs = pl.pallas_call(
        functools.partial(_dwconv_kernel, s=s),
        out_shape=(jax.ShapeDtypeStruct((bsz, s, s, c), x_hw.dtype),
                   jax.ShapeDtypeStruct((1, c), jnp.float32),
                   jax.ShapeDtypeStruct((1, c), jnp.float32)),
        grid=(bsz,),
        in_specs=[
            pl.BlockSpec((None, s + 2, s + 2, c), lambda b: (b, 0, 0, 0)),
            pl.BlockSpec((3, 3, c), lambda b: (0, 0, 0)),
            pl.BlockSpec((1, 1, c), lambda b: (0, 0, 0)),
        ],
        out_specs=(pl.BlockSpec((None, s, s, c), lambda b: (b, 0, 0, 0)),
                   pl.BlockSpec((1, c), lambda b: (0, 0)),
                   pl.BlockSpec((1, c), lambda b: (0, 0))),
        compiler_params=_compiler_params(("arbitrary",), est),
    )(xp, w_dw, b_dw.reshape(1, 1, c))
    return out.reshape(bsz * s * s, c), sums, sumsqs


# ---------------------------------------------------------------------------
# Performer attention core: linear-attention form, one instance per batch element.
# Reads the (N, 3C) qkv slab directly and writes the (N, C) output in final layout.
# ---------------------------------------------------------------------------
def _performer_attn_kernel(qkv_ref, rm_ref, o_ref, *, num_heads, head_dim, dim,
                           inv_sqrt_m):
    f32 = jnp.float32
    mm = _MATMUL_DTYPE
    qkv = qkv_ref[...].astype(f32)                     # (N, 3C)
    outs = []
    for h in range(num_heads):                         # unrolled at trace time
        lo = h * head_dim
        q = qkv[:, lo:lo + head_dim]
        k = qkv[:, dim + lo:dim + lo + head_dim]
        v = qkv[:, 2 * dim + lo:2 * dim + lo + head_dim]
        proj = rm_ref[h].astype(mm)                    # (hd, m_feat)

        def fmap(x):
            # The sqrt(scale) pre-multiply of the reference cancels under L2-normalize,
            # and |x_n|^2 == 1 by construction, so: exp(x_n @ proj - 1/2) / sqrt(m).
            nrm = jnp.sqrt(jnp.sum(x * x, axis=-1, keepdims=True))
            xn = x / jnp.maximum(nrm, _L2_EPS)
            z = jnp.dot(xn.astype(mm), proj, preferred_element_type=f32) - 0.5
            return jnp.exp(z) * inv_sqrt_m

        qf = fmap(q)                                   # (N, m_feat), strictly >= 0
        kf = fmap(k)                                   # (N, m_feat), strictly >= 0
        # Linear attention (exact because qf, kf >= 0 -> |attn| == attn):
        kv = jax.lax.dot_general(kf.astype(mm), v.astype(mm),
                                 (((0,), (0,)), ((), ())),
                                 preferred_element_type=f32)          # (m_feat, hd)
        ksum = jnp.sum(kf, axis=0, keepdims=True)                     # (1, m_feat)
        num = jnp.dot(qf.astype(mm), kv.astype(mm),
                      preferred_element_type=f32)                     # (N, hd)
        den = jnp.sum(qf * ksum, axis=-1, keepdims=True)              # (N, 1)
        outs.append(num / jnp.maximum(den, _L2_EPS))
    o_ref[...] = jnp.concatenate(outs, axis=-1).astype(o_ref.dtype)


def performer_attention_pallas(qkv3, rand_matrix, num_heads):
    """qkv3: (B, N, 3C); rand_matrix: (H, hd, m_feat). Returns (B, N, C)."""
    bsz, n, c3 = qkv3.shape
    c = c3 // 3
    hd = c // num_heads
    m_feat = rand_matrix.shape[-1]
    # TODO(synk): for N large enough that a full (N, 3C) block no longer fits VMEM,
    # split into a kv/ksum pass followed by a query-tiled streaming pass.
    kern = functools.partial(_performer_attn_kernel, num_heads=num_heads, head_dim=hd,
                             dim=c, inv_sqrt_m=1.0 / float(m_feat) ** 0.5)
    est = 2 * (n * c3 * 4 + n * c * 4) + num_heads * hd * m_feat * 4 + (1 << 20)
    return pl.pallas_call(
        kern,
        out_shape=jax.ShapeDtypeStruct((bsz, n, c), qkv3.dtype),
        grid=(bsz,),
        in_specs=[pl.BlockSpec((None, n, c3), lambda b: (b, 0, 0)),
                  pl.BlockSpec((num_heads, hd, m_feat), lambda b: (0, 0, 0))],
        out_specs=pl.BlockSpec((None, n, c), lambda b: (b, 0, 0)),
        compiler_params=_compiler_params(("parallel",), est),
    )(qkv3, rand_matrix)


# ---------------------------------------------------------------------------
# Full Performer_Block forward (Pallas path)
# ---------------------------------------------------------------------------
def performer_block_forward(x, p, num_heads):
    bsz, n_tok, c = x.shape
    m = bsz * n_tok
    ch = p["w_fc1"].shape[1]
    s = int(round(n_tok ** 0.5))
    assert s * s == n_tok, "token count must be a perfect square for the conv MLP path"

    x2d = x.reshape(m, c)

    # --- attention branch: x = x + proj(attn(norm1(x))) ---
    qkv = fused_linear_pallas(x2d, p["w_qkv"], bias=None,                 # qkv_bias=False
                              ln_gamma=p["ln1_g"], ln_beta=p["ln1_b"])    # LN1 fused
    ao = performer_attention_pallas(qkv.reshape(bsz, n_tok, 3 * c),
                                    p["rand_matrix"], num_heads)          # (B, N, C)
    x2d = fused_linear_pallas(ao.reshape(m, c), p["w_proj"], bias=p["b_proj"],
                              residual=x2d)                               # proj + residual

    # --- MLP branch (conv path since dim != 768): x = x + bn3(fc2(act(bn2(dw(act(bn1(fc1(ln2(x)))))))))
    t, s1, ss1 = fused_linear_pallas(x2d, p["w_fc1"], bias=p["b_fc1"],
                                     ln_gamma=p["ln2_g"], ln_beta=p["ln2_b"],
                                     bn_stats=True)                       # LN2+fc1+stats
    sc1, sh1 = _bn_finalize(s1, ss1, m, p["bn1_g"], p["bn1_b"])
    t = bn_apply_pallas(t, sc1, sh1, apply_gelu=True)                     # bn1 + GELU

    t, s2, ss2 = dwconv3x3_bn_stats_pallas(t.reshape(bsz, s, s, ch),
                                           p["w_dw"], p["b_dw"])          # dwconv+stats
    sc2, sh2 = _bn_finalize(s2, ss2, m, p["bn2_g"], p["bn2_b"])
    t = bn_apply_pallas(t, sc2, sh2, apply_gelu=True)                     # bn2 + GELU

    t, s3, ss3 = fused_linear_pallas(t, p["w_fc2"], bias=p["b_fc2"],
                                     bn_stats=True)                       # fc2 + stats
    sc3, sh3 = _bn_finalize(s3, ss3, m, p["bn3_g"], p["bn3_b"])
    out2d = bn_apply_pallas(t, sc3, sh3, apply_gelu=False, residual=x2d)  # bn3 + residual
    return out2d.reshape(bsz, n_tok, c)


# ---------------------------------------------------------------------------
# Pure-JAX reference (mirrors the PyTorch module, training-mode BN, exact GELU)
# ---------------------------------------------------------------------------
def performer_block_reference(x, p, num_heads):
    hi = jax.lax.Precision.HIGHEST
    bsz, n_tok, c = x.shape
    hd = c // num_heads
    m_feat = 2 * hd
    scale = hd ** -0.5
    ch = p["w_fc1"].shape[1]
    s = int(round(n_tok ** 0.5))

    def layernorm(t, g, b):
        mu = jnp.mean(t, -1, keepdims=True)
        var = jnp.mean((t - mu) ** 2, -1, keepdims=True)
        return (t - mu) / jnp.sqrt(var + _LN_EPS) * g + b

    def batchnorm(t2d, g, b):
        mu = jnp.mean(t2d, 0)
        var = jnp.mean((t2d - mu) ** 2, 0)
        return (t2d - mu) / jnp.sqrt(var + _BN_EPS) * g + b

    def to_random_feature(t, mm, proj):
        nrm = jnp.sqrt(jnp.sum(t * t, -1, keepdims=True))
        t = t / jnp.maximum(nrm, _L2_EPS)
        n2 = jnp.sum(t * t, -1, keepdims=True)
        z = jnp.einsum("bhnd,hdm->bhnm", t, proj, precision=hi) - n2 / 2
        return jnp.exp(z) / mm ** 0.5

    # attention
    h = layernorm(x, p["ln1_g"], p["ln1_b"])
    qkv = jnp.einsum("bnc,cd->bnd", h, p["w_qkv"], precision=hi)
    qkv = qkv.reshape(bsz, n_tok, 3, num_heads, hd).transpose(2, 0, 3, 1, 4)
    q, k, v = qkv[0], qkv[1], qkv[2]
    qf = to_random_feature(q * scale ** 0.5, m_feat, p["rand_matrix"])
    kf = to_random_feature(k * scale ** 0.5, m_feat, p["rand_matrix"])
    attn = jnp.einsum("bhnm,bhkm->bhnk", qf, kf, precision=hi)
    attn = attn / jnp.maximum(jnp.sum(jnp.abs(attn), -1, keepdims=True), _L2_EPS)
    ao = jnp.einsum("bhnk,bhkd->bhnd", attn, v, precision=hi)
    ao = ao.transpose(0, 2, 1, 3).reshape(bsz, n_tok, c)
    ao = jnp.einsum("bnc,cd->bnd", ao, p["w_proj"], precision=hi) + p["b_proj"]
    x = x + ao

    # MLP (conv path)
    h2 = layernorm(x, p["ln2_g"], p["ln2_b"])
    t = jnp.einsum("bnc,ch->bnh", h2, p["w_fc1"], precision=hi) + p["b_fc1"]
    t2 = batchnorm(t.reshape(bsz * n_tok, ch), p["bn1_g"], p["bn1_b"])
    t2 = jax.nn.gelu(t2, approximate=False)
    thw = t2.reshape(bsz, s, s, ch)
    tp = jnp.pad(thw, ((0, 0), (1, 1), (1, 1), (0, 0)))
    acc = jnp.zeros_like(thw) + p["b_dw"]
    for di in range(3):
        for dj in range(3):
            acc = acc + tp[:, di:di + s, dj:dj + s, :] * p["w_dw"][di, dj]
    t2 = batchnorm(acc.reshape(bsz * n_tok, ch), p["bn2_g"], p["bn2_b"])
    t2 = jax.nn.gelu(t2, approximate=False)
    t2 = jnp.einsum("mh,hc->mc", t2, p["w_fc2"], precision=hi) + p["b_fc2"]
    t2 = batchnorm(t2, p["bn3_g"], p["bn3_b"])
    return x + t2.reshape(bsz, n_tok, c)


if __name__ == "__main__":
    # Small shapes: batch=2, tokens=16 (4x4 grid), dim=32, heads=4, mlp hidden=128
    B, N, C = 2, 16, 32
    num_heads = 4
    mlp_ratio = 4.0
    H = num_heads
    hd = C // H
    m_feat = 2 * hd
    Ch = int(C * mlp_ratio)

    key = jax.random.PRNGKey(0)
    ks = jax.random.split(key, 24)
    f32 = jnp.float32

    def nrm(k_, shape, std=0.1):
        return (std * jax.random.normal(k_, shape)).astype(f32)

    params = dict(
        ln1_g=1.0 + nrm(ks[0], (C,)), ln1_b=nrm(ks[1], (C,)),
        w_qkv=nrm(ks[2], (C, 3 * C)),
        w_proj=nrm(ks[3], (C, C)), b_proj=nrm(ks[4], (C,)),
        rand_matrix=jax.random.normal(ks[5], (H, hd, m_feat), dtype=f32),
        ln2_g=1.0 + nrm(ks[6], (C,)), ln2_b=nrm(ks[7], (C,)),
        w_fc1=nrm(ks[8], (C, Ch)), b_fc1=nrm(ks[9], (Ch,)),
        bn1_g=1.0 + nrm(ks[10], (Ch,)), bn1_b=nrm(ks[11], (Ch,)),
        w_dw=nrm(ks[12], (3, 3, Ch)), b_dw=nrm(ks[13], (Ch,)),
        bn2_g=1.0 + nrm(ks[14], (Ch,)), bn2_b=nrm(ks[15], (Ch,)),
        w_fc2=nrm(ks[16], (Ch, C)), b_fc2=nrm(ks[17], (C,)),
        bn3_g=1.0 + nrm(ks[18], (C,)), bn3_b=nrm(ks[19], (C,)),
    )
    x = jax.random.normal(ks[20], (B, N, C), dtype=f32)

    forward = jax.jit(performer_block_forward, static_argnums=(2,))
    out = forward(x, params, num_heads)
    out = jax.block_until_ready(out)

    ref = performer_block_reference(x, params, num_heads)
    ref = jax.block_until_ready(ref)

    assert out.shape == (B, N, C)
    # bf16 MXU operands (f32 accumulation) -> compare against the f32 reference at a
    # tolerance consistent with that precision choice.
    max_err = float(jnp.max(jnp.abs(out - ref)))
    assert jnp.allclose(out, ref, atol=3e-2, rtol=3e-2), (
        f"mismatch vs reference, max abs err = {max_err}")

    print("KERNEL_OK")
</pallas_src>

<mosaic_0001>
module attributes {stable_mosaic.version = 11 : i64} {
  func.func @_linear_kernel(%arg0: i32, %arg1: memref<32x32xf32, #tpu.memory_space<vmem>>, %arg2: memref<1x32xf32, #tpu.memory_space<vmem>>, %arg3: memref<1x32xf32, #tpu.memory_space<vmem>>, %arg4: memref<32x96xbf16, #tpu.memory_space<vmem>>, %arg5: memref<32x96xf32, #tpu.memory_space<vmem>>) attributes {dimension_semantics = [#tpu.dimension_semantics<parallel>], iteration_bounds = array<i64: 1>, scalar_prefetch = 0 : i64, scratch_operands = 0 : i64, tpu.core_type = #tpu.core_type<tc>, window_params = [{transform_indices = @transform_0, window_bounds = array<i64: 32, 32>}, {pipeline_mode = #tpu.pipeline_mode<synchronous>, transform_indices = @transform_1, window_bounds = array<i64: 1, 32>}, {pipeline_mode = #tpu.pipeline_mode<synchronous>, transform_indices = @transform_2, window_bounds = array<i64: 1, 32>}, {pipeline_mode = #tpu.pipeline_mode<synchronous>, transform_indices = @transform_3, window_bounds = array<i64: 32, 96>}, {transform_indices = @transform_4, window_bounds = array<i64: 32, 96>}]} {
    %c0 = arith.constant 0 : index
    %c0_0 = arith.constant 0 : index
    %0 = vector.load %arg1[%c0, %c0_0] : memref<32x32xf32, #tpu.memory_space<vmem>>, vector<32x32xf32>
    %cst = arith.constant dense<0.000000e+00> : vector<32xf32>
    %1 = vector.multi_reduction <add>, %0, %cst [1] : vector<32x32xf32> to vector<32xf32>
    %2 = vector.shape_cast %1 : vector<32xf32> to vector<32x1xf32>
    %cst_1 = arith.constant 3.200000e+01 : f32
    %3 = vector.broadcast %cst_1 : f32 to vector<32x1xf32>
    %4 = arith.divf %2, %3 : vector<32x1xf32>
    %5 = vector.broadcast %4 : vector<32x1xf32> to vector<32x32xf32>
    %6 = arith.subf %0, %5 : vector<32x32xf32>
    %7 = arith.mulf %6, %6 : vector<32x32xf32>
    %cst_2 = arith.constant dense<0.000000e+00> : vector<32xf32>
    %8 = vector.multi_reduction <add>, %7, %cst_2 [1] : vector<32x32xf32> to vector<32xf32>
    %9 = vector.shape_cast %8 : vector<32xf32> to vector<32x1xf32>
    %cst_3 = arith.constant 3.200000e+01 : f32
    %10 = vector.broadcast %cst_3 : f32 to vector<32x1xf32>
    %11 = arith.divf %9, %10 : vector<32x1xf32>
    %cst_4 = arith.constant 9.99999974E-6 : f32
    %12 = vector.broadcast %cst_4 : f32 to vector<32x1xf32>
    %13 = arith.addf %11, %12 : vector<32x1xf32>
    %14 = math.rsqrt %13 : vector<32x1xf32>
    %15 = vector.broadcast %14 : vector<32x1xf32> to vector<32x32xf32>
    %16 = arith.mulf %6, %15 : vector<32x32xf32>
    %c0_5 = arith.constant 0 : index
    %c0_6 = arith.constant 0 : index
    %17 = vector.load %arg2[%c0_5, %c0_6] : memref<1x32xf32, #tpu.memory_space<vmem>>, vector<1x32xf32>
    %18 = vector.broadcast %17 : vector<1x32xf32> to vector<32x32xf32>
    %19 = arith.mulf %16, %18 : vector<32x32xf32>
    %c0_7 = arith.constant 0 : index
    %c0_8 = arith.constant 0 : index
    %20 = vector.load %arg3[%c0_7, %c0_8] : memref<1x32xf32, #tpu.memory_space<vmem>>, vector<1x32xf32>
    %21 = vector.broadcast %20 : vector<1x32xf32> to vector<32x32xf32>
    %22 = arith.addf %19, %21 : vector<32x32xf32>
    %23 = arith.truncf %22 : vector<32x32xf32> to vector<32x32xbf16>
    %c0_9 = arith.constant 0 : index
    %c0_10 = arith.constant 0 : index
    %24 = vector.load %arg4[%c0_9, %c0_10] : memref<32x96xbf16, #tpu.memory_space<vmem>>, vector<32x96xbf16>
    %cst_11 = arith.constant dense<0.000000e+00> : vector<32x96xf32>
    %25 = tpu.matmul %23, %24, %cst_11 {dimension_numbers = #tpu.dot_dimension_numbers<[1], [0], [0], [1], [0, 0, 1, 1], [], []>} : vector<32x32xbf16>, vector<32x96xbf16>, vector<32x96xf32> -> vector<32x96xf32>
    %c0_12 = arith.constant 0 : index
    %c0_13 = arith.constant 0 : index
    %26 = vector.load %arg5[%c0_12, %c0_13] : memref<32x96xf32, #tpu.memory_space<vmem>>, vector<32x96xf32>
    tpu.vector_store %arg5[%c0_12, %c0_13], %25 {strides = array<i32>} : memref<32x96xf32, #tpu.memory_space<vmem>>, vector<32x96xf32>,
    return
  }
  func.func @transform_0(%arg0: i32) -> (i32, i32) {
    %c0_i32 = arith.constant 0 : i32
    %c0_i32_0 = arith.constant 0 : i32
    return %arg0, %c0_i32 : i32, i32
  }
  func.func @transform_1(%arg0: i32) -> (i32, i32) {
    %c0_i32 = arith.constant 0 : i32
    %c0_i32_0 = arith.constant 0 : i32
    %c0_i32_1 = arith.constant 0 : i32
    return %c0_i32, %c0_i32_0 : i32, i32
  }
  func.func @transform_2(%arg0: i32) -> (i32, i32) {
    %c0_i32 = arith.constant 0 : i32
    %c0_i32_0 = arith.constant 0 : i32
    %c0_i32_1 = arith.constant 0 : i32
    return %c0_i32, %c0_i32_0 : i32, i32
  }
  func.func @transform_3(%arg0: i32) -> (i32, i32) {
    %c0_i32 = arith.constant 0 : i32
    %c0_i32_0 = arith.constant 0 : i32
    %c0_i32_1 = arith.constant 0 : i32
    return %c0_i32, %c0_i32_0 : i32, i32
  }
  func.func @transform_4(%arg0: i32) -> (i32, i32) {
    %c0_i32 = arith.constant 0 : i32
    %c0_i32_0 = arith.constant 0 : i32
    return %arg0, %c0_i32 : i32, i32
  }
}

module attributes {stable_mosaic.version = 11 : i64} {
  func.func @_performer_attn_kernel(%arg0: i32, %arg1: memref<1x16x96xf32, #tpu.memory_space<vmem>>, %arg2: memref<4x8x16xf32, #tpu.memory_space<vmem>>, %arg3: memref<1x16x32xf32, #tpu.memory_space<vmem>>) attributes {dimension_semantics = [#tpu.dimension_semantics<parallel>], iteration_bounds = array<i64: 2>, scalar_prefetch = 0 : i64, scratch_operands = 0 : i64, tpu.core_type = #tpu.core_type<tc>, window_params = [{transform_indices = @transform_0, window_bounds = array<i64: 1, 16, 96>}, {pipeline_mode = #tpu.pipeline_mode<synchronous>, transform_indices = @transform_1, window_bounds = array<i64: 4, 8, 16>}, {transform_indices = @transform_2, window_bounds = array<i64: 1, 16, 32>}]} {
    %c0 = arith.constant 0 : index
    %c0_0 = arith.constant 0 : index
    %c0_1 = arith.constant 0 : index
    %0 = vector.load %arg1[%c0, %c0_0, %c0_1] : memref<1x16x96xf32, #tpu.memory_space<vmem>>, vector<1x16x96xf32>
    %1 = vector.shape_cast %0 : vector<1x16x96xf32> to vector<16x96xf32>
    %2 = vector.extract_strided_slice %1 {offsets = [0, 0], sizes = [16, 8], strides = [1, 1]} : vector<16x96xf32> to vector<16x8xf32>
    %3 = vector.extract_strided_slice %1 {offsets = [0, 32], sizes = [16, 8], strides = [1, 1]} : vector<16x96xf32> to vector<16x8xf32>
    %4 = vector.extract_strided_slice %1 {offsets = [0, 64], sizes = [16, 8], strides = [1, 1]} : vector<16x96xf32> to vector<16x8xf32>
    %c0_2 = arith.constant 0 : index
    %c0_3 = arith.constant 0 : index
    %c0_4 = arith.constant 0 : index
    %5 = vector.load %arg2[%c0_2, %c0_3, %c0_4] : memref<4x8x16xf32, #tpu.memory_space<vmem>>, vector<1x8x16xf32>
    %6 = vector.shape_cast %5 : vector<1x8x16xf32> to vector<8x16xf32>
    %7 = arith.truncf %6 : vector<8x16xf32> to vector<8x16xbf16>
    %8 = arith.mulf %2, %2 : vector<16x8xf32>
    %cst = arith.constant dense<0.000000e+00> : vector<16xf32>
    %9 = vector.multi_reduction <add>, %8, %cst [1] : vector<16x8xf32> to vector<16xf32>
    %10 = vector.shape_cast %9 : vector<16xf32> to vector<16x1xf32>
    %11 = math.sqrt %10 : vector<16x1xf32>
    %cst_5 = arith.constant 9.99999996E-13 : f32
    %12 = vector.broadcast %cst_5 : f32 to vector<16x1xf32>
    %13 = arith.maximumf %11, %12 : vector<16x1xf32>
    %14 = vector.broadcast %13 : vector<16x1xf32> to vector<16x8xf32>
    %15 = arith.divf %2, %14 : vector<16x8xf32>
    %16 = arith.truncf %15 : vector<16x8xf32> to vector<16x8xbf16>
    %cst_6 = arith.constant dense<0.000000e+00> : vector<16x16xf32>
    %17 = tpu.matmul %16, %7, %cst_6 {dimension_numbers = #tpu.dot_dimension_numbers<[1], [0], [0], [1], [0, 0, 1, 1], [], []>} : vector<16x8xbf16>, vector<8x16xbf16>, vector<16x16xf32> -> vector<16x16xf32>
    %cst_7 = arith.constant 5.000000e-01 : f32
    %18 = vector.broadcast %cst_7 : f32 to vector<16x16xf32>
    %19 = arith.subf %17, %18 : vector<16x16xf32>
    %20 = math.exp %19 : vector<16x16xf32>
    %cst_8 = arith.constant 2.500000e-01 : f32
    %21 = vector.broadcast %cst_8 : f32 to vector<16x16xf32>
    %22 = arith.mulf %20, %21 : vector<16x16xf32>
    %23 = arith.mulf %3, %3 : vector<16x8xf32>
    %cst_9 = arith.constant dense<0.000000e+00> : vector<16xf32>
    %24 = vector.multi_reduction <add>, %23, %cst_9 [1] : vector<16x8xf32> to vector<16xf32>
    %25 = vector.shape_cast %24 : vector<16xf32> to vector<16x1xf32>
    %26 = math.sqrt %25 : vector<16x1xf32>
    %cst_10 = arith.constant 9.99999996E-13 : f32
    %27 = vector.broadcast %cst_10 : f32 to vector<16x1xf32>
    %28 = arith.maximumf %26, %27 : vector<16x1xf32>
    %29 = vector.broadcast %28 : vector<16x1xf32> to vector<16x8xf32>
    %30 = arith.divf %3, %29 : vector<16x8xf32>
    %31 = arith.truncf %30 : vector<16x8xf32> to vector<16x8xbf16>
    %cst_11 = arith.constant dense<0.000000e+00> : vector<16x16xf32>
    %32 = tpu.matmul %31, %7, %cst_11 {dimension_numbers = #tpu.dot_dimension_numbers<[1], [0], [0], [1], [0, 0, 1, 1], [], []>} : vector<16x8xbf16>, vector<8x16xbf16>, vector<16x16xf32> -> vector<16x16xf32>
    %cst_12 = arith.constant 5.000000e-01 : f32
    %33 = vector.broadcast %cst_12 : f32 to vector<16x16xf32>
    %34 = arith.subf %32, %33 : vector<16x16xf32>
    %35 = math.exp %34 : vector<16x16xf32>
    %cst_13 = arith.constant 2.500000e-01 : f32
    %36 = vector.broadcast %cst_13 : f32 to vector<16x16xf32>
    %37 = arith.mulf %35, %36 : vector<16x16xf32>
    %38 = arith.truncf %37 : vector<16x16xf32> to vector<16x16xbf16>
    %39 = arith.truncf %4 : vector<16x8xf32> to vector<16x8xbf16>
    %cst_14 = arith.constant dense<0.000000e+00> : vector<16x8xf32>
    %40 = tpu.matmul %38, %39, %cst_14 {dimension_numbers = #tpu.dot_dimension_numbers<[0], [0], [1], [1], [0, 1, 1, 1], [], []>} : vector<16x16xbf16>, vector<16x8xbf16>, vector<16x8xf32> -> vector<16x8xf32>
    %cst_15 = arith.constant dense<0.000000e+00> : vector<16xf32>
    %41 = vector.multi_reduction <add>, %37, %cst_15 [0] : vector<16x16xf32> to vector<16xf32>
    %42 = vector.shape_cast %41 : vector<16xf32> to vector<1x16xf32>
    %43 = arith.truncf %22 : vector<16x16xf32> to vector<16x16xbf16>
    %44 = arith.truncf %40 : vector<16x8xf32> to vector<16x8xbf16>
    %cst_16 = arith.constant dense<0.000000e+00> : vector<16x8xf32>
    %45 = tpu.matmul %43, %44, %cst_16 {dimension_numbers = #tpu.dot_dimension_numbers<[1], [0], [0], [1], [0, 0, 1, 1], [], []>} : vector<16x16xbf16>, vector<16x8xbf16>, vector<16x8xf32> -> vector<16x8xf32>
    %46 = vector.broadcast %42 : vector<1x16xf32> to vector<16x16xf32>
    %47 = arith.mulf %22, %46 : vector<16x16xf32>
    %cst_17 = arith.constant dense<0.000000e+00> : vector<16xf32>
    %48 = vector.multi_reduction <add>, %47, %cst_17 [1] : vector<16x16xf32> to vector<16xf32>
    %49 = vector.shape_cast %48 : vector<16xf32> to vector<16x1xf32>
    %cst_18 = arith.constant 9.99999996E-13 : f32
    %50 = vector.broadcast %cst_18 : f32 to vector<16x1xf32>
    %51 = arith.maximumf %49, %50 : vector<16x1xf32>
    %52 = vector.broadcast %51 : vector<16x1xf32> to vector<16x8xf32>
    %53 = arith.divf %45, %52 : vector<16x8xf32>
    %54 = vector.extract_strided_slice %1 {offsets = [0, 8], sizes = [16, 8], strides = [1, 1]} : vector<16x96xf32> to vector<16x8xf32>
    %55 = vector.extract_strided_slice %1 {offsets = [0, 40], sizes = [16, 8], strides = [1, 1]} : vector<16x96xf32> to vector<16x8xf32>
    %56 = vector.extract_strided_slice %1 {offsets = [0, 72], sizes = [16, 8], strides = [1, 1]} : vector<16x96xf32> to vector<16x8xf32>
    %c1 = arith.constant 1 : index
    %c0_19 = arith.constant 0 : index
    %c0_20 = arith.constant 0 : index
    %57 = vector.load %arg2[%c1, %c0_19, %c0_20] : memref<4x8x16xf32, #tpu.memory_space<vmem>>, vector<1x8x16xf32>
    %58 = vector.shape_cast %57 : vector<1x8x16xf32> to vector<8x16xf32>
    %59 = arith.truncf %58 : vector<8x16xf32> to vector<8x16xbf16>
    %60 = arith.mulf %54, %54 : vector<16x8xf32>
    %cst_21 = arith.constant dense<0.000000e+00> : vector<16xf32>
    %61 = vector.multi_reduction <add>, %60, %cst_21 [1] : vector<16x8xf32> to vector<16xf32>
    %62 = vector.shape_cast %61 : vector<16xf32> to vector<16x1xf32>
    %63 = math.sqrt %62 : vector<16x1xf32>
    %cst_22 = arith.constant 9.99999996E-13 : f32
    %64 = vector.broadcast %cst_22 : f32 to vector<16x1xf32>
    %65 = arith.maximumf %63, %64 : vector<16x1xf32>
    %66 = vector.broadcast %65 : vector<16x1xf32> to vector<16x8xf32>
    %67 = arith.divf %54, %66 : vector<16x8xf32>
    %68 = arith.truncf %67 : vector<16x8xf32> to vector<16x8xbf16>
    %cst_23 = arith.constant dense<0.000000e+00> : vector<16x16xf32>
    %69 = tpu.matmul %68, %59, %cst_23 {dimension_numbers = #tpu.dot_dimension_numbers<[1], [0], [0], [1], [0, 0, 1, 1], [], []>} : vector<16x8xbf16>, vector<8x16xbf16>, vector<16x16xf32> -> vector<16x16xf32>
    %cst_24 = arith.constant 5.000000e-01 : f32
    %70 = vector.broadcast %cst_24 : f32 to vector<16x16xf32>
    %71 = arith.subf %69, %70 : vector<16x16xf32>
    %72 = math.exp %71 : vector<16x16xf32>
    %cst_25 = arith.constant 2.500000e-01 : f32
    %73 = vector.broadcast %cst_25 : f32 to vector<16x16xf32>
    %74 = arith.mulf %72, %73 : vector<16x16xf32>
    %75 = arith.mulf %55, %55 : vector<16x8xf32>
    %cst_26 = arith.constant dense<0.000000e+00> : vector<16xf32>
    %76 = vector.multi_reduction <add>, %75, %cst_26 [1] : vector<16x8xf32> to vector<16xf32>
    %77 = vector.shape_cast %76 : vector<16xf32> to vector<16x1xf32>
    %78 = math.sqrt %77 : vector<16x1xf32>
    %cst_27 = arith.constant 9.99999996E-13 : f32
    %79 = vector.broadcast %cst_27 : f32 to vector<16x1xf32>
    %80 = arith.maximumf %78, %79 : vector<16x1xf32>
    %81 = vector.broadcast %80 : vector<16x1xf32> to vector<16x8xf32>
    %82 = arith.divf %55, %81 : vector<16x8xf32>
    %83 = arith.truncf %82 : vector<16x8xf32> to vector<16x8xbf16>
    %cst_28 = arith.constant dense<0.000000e+00> : vector<16x16xf32>
    %84 = tpu.matmul %83, %59, %cst_28 {dimension_numbers = #tpu.dot_dimension_numbers<[1], [0], [0], [1], [0, 0, 1, 1], [], []>} : vector<16x8xbf16>, vector<8x16xbf16>, vector<16x16xf32> -> vector<16x16xf32>
    %cst_29 = arith.constant 5.000000e-01 : f32
    %85 = vector.broadcast %cst_29 : f32 to vector<16x16xf32>
    %86 = arith.subf %84, %85 : vector<16x16xf32>
    %87 = math.exp %86 : vector<16x16xf32>
    %cst_30 = arith.constant 2.500000e-01 : f32
    %88 = vector.broadcast %cst_30 : f32 to vector<16x16xf32>
    %89 = arith.mulf %87, %88 : vector<16x16xf32>
    %90 = arith.truncf %89 : vector<16x16xf32> to vector<16x16xbf16>
    %91 = arith.truncf %56 : vector<16x8xf32> to vector<16x8xbf16>
    %cst_31 = arith.constant dense<0.000000e+00> : vector<16x8xf32>
    %92 = tpu.matmul %90, %91, %cst_31 {dimension_numbers = #tpu.dot_dimension_numbers<[0], [0], [1], [1], [0, 1, 1, 1], [], []>} : vector<16x16xbf16>, vector<16x8xbf16>, vector<16x8xf32> -> vector<16x8xf32>
    %cst_32 = arith.constant dense<0.000000e+00> : vector<16xf32>
    %93 = vector.multi_reduction <add>, %89, %cst_32 [0] : vector<16x16xf32> to vector<16xf32>
    %94 = vector.shape_cast %93 : vector<16xf32> to vector<1x16xf32>
    %95 = arith.truncf %74 : vector<16x16xf32> to vector<16x16xbf16>
    %96 = arith.truncf %92 : vector<16x8xf32> to vector<16x8xbf16>
    %cst_33 = arith.constant dense<0.000000e+00> : vector<16x8xf32>
    %97 = tpu.matmul %95, %96, %cst_33 {dimension_numbers = #tpu.dot_dimension_numbers<[1], [0], [0], [1], [0, 0, 1, 1], [], []>} : vector<16x16xbf16>, vector<16x8xbf16>, vector<16x8xf32> -> vector<16x8xf32>
    %98 = vector.broadcast %94 : vector<1x16xf32> to vector<16x16xf32>
    %99 = arith.mulf %74, %98 : vector<16x16xf32>
    %cst_34 = arith.constant dense<0.000000e+00> : vector<16xf32>
    %100 = vector.multi_reduction <add>, %99, %cst_34 [1] : vector<16x16xf32> to vector<16xf32>
    %101 = vector.shape_cast %100 : vector<16xf32> to vector<16x1xf32>
    %cst_35 = arith.constant 9.99999996E-13 : f32
    %102 = vector.broadcast %cst_35 : f32 to vector<16x1xf32>
    %103 = arith.maximumf %101, %102 : vector<16x1xf32>
    %104 = vector.broadcast %103 : vector<16x1xf32> to vector<16x8xf32>
    %105 = arith.divf %97, %104 : vector<16x8xf32>
    %106 = vector.extract_strided_slice %1 {offsets = [0, 16], sizes = [16, 8], strides = [1, 1]} : vector<16x96xf32> to vector<16x8xf32>
    %107 = vector.extract_strided_slice %1 {offsets = [0, 48], sizes = [16, 8], strides = [1, 1]} : vector<16x96xf32> to vector<16x8xf32>
    %108 = vector.extract_strided_slice %1 {offsets = [0, 80], sizes = [16, 8], strides = [1, 1]} : vector<16x96xf32> to vector<16x8xf32>
    %c2 = arith.constant 2 : index
    %c0_36 = arith.constant 0 : index
    %c0_37 = arith.constant 0 : index
    %109 = vector.load %arg2[%c2, %c0_36, %c0_37] : memref<4x8x16xf32, #tpu.memory_space<vmem>>, vector<1x8x16xf32>
    %110 = vector.shape_cast %109 : vector<1x8x16xf32> to vector<8x16xf32>
    %111 = arith.truncf %110 : vector<8x16xf32> to vector<8x16xbf16>
    %112 = arith.mulf %106, %106 : vector<16x8xf32>
    %cst_38 = arith.constant dense<0.000000e+00> : vector<16xf32>
    %113 = vector.multi_reduction <add>, %112, %cst_38 [1] : vector<16x8xf32> to vector<16xf32>
    %114 = vector.shape_cast %113 : vector<16xf32> to vector<16x1xf32>
    %115 = math.sqrt %114 : vector<16x1xf32>
    %cst_39 = arith.constant 9.99999996E-13 : f32
    %116 = vector.broadcast %cst_39 : f32 to vector<16x1xf32>
    %117 = arith.maximumf %115, %116 : vector<16x1xf32>
    %118 = vector.broadcast %117 : vector<16x1xf32> to vector<16x8xf32>
    %119 = arith.divf %106, %118 : vector<16x8xf32>
    %120 = arith.truncf %119 : vector<16x8xf32> to vector<16x8xbf16>
    %cst_40 = arith.constant dense<0.000000e+00> : vector<16x16xf32>
    %121 = tpu.matmul %120, %111, %cst_40 {dimension_numbers = #tpu.dot_dimension_numbers<[1], [0], [0], [1], [0, 0, 1, 1], [], []>} : vector<16x8xbf16>, vector<8x16xbf16>, vector<16x16xf32> -> vector<16x16xf32>
    %cst_41 = arith.constant 5.000000e-01 : f32
    %122 = vector.broadcast %cst_41 : f32 to vector<16x16xf32>
    %123 = arith.subf %121, %122 : vector<16x16xf32>
    %124 = math.exp %123 : vector<16x16xf32>
    %cst_42 = arith.constant 2.500000e-01 : f32
    %125 = vector.broadcast %cst_42 : f32 to vector<16x16xf32>
    %126 = arith.mulf %124, %125 : vector<16x16xf32>
    %127 = arith.mulf %107, %107 : vector<16x8xf32>
    %cst_43 = arith.constant dense<0.000000e+00> : vector<16xf32>
    %128 = vector.multi_reduction <add>, %127, %cst_43 [1] : vector<16x8xf32> to vector<16xf32>
    %129 = vector.shape_cast %128 : vector<16xf32> to vector<16x1xf32>
    %130 = math.sqrt %129 : vector<16x1xf32>
    %cst_44 = arith.constant 9.99999996E-13 : f32
    %131 = vector.broadcast %cst_44 : f32 to vector<16x1xf32>
    %132 = arith.maximumf %130, %131 : vector<16x1xf32>
    %133 = vector.broadcast %132 : vector<16x1xf32> to vector<16x8xf32>
    %134 = arith.divf %107, %133 : vector<16x8xf32>
    %135 = arith.truncf %134 : vector<16x8xf32> to vector<16x8xbf16>
    %cst_45 = arith.constant dense<0.000000e+00> : vector<16x16xf32>
    %136 = tpu.matmul %135, %111, %cst_45 {dimension_numbers = #tpu.dot_dimension_numbers<[1], [0], [0], [1], [0, 0, 1, 1], [], []>} : vector<16x8xbf16>, vector<8x16xbf16>, vector<16x16xf32> -> vector<16x16xf32>
    %cst_46 = arith.constant 5.000000e-01 : f32
    %137 = vector.broadcast %cst_46 : f32 to vector<16x16xf32>
    %138 = arith.subf %136, %137 : vector<16x16xf32>
    %139 = math.exp %138 : vector<16x16xf32>
    %cst_47 = arith.constant 2.500000e-01 : f32
    %140 = vector.broadcast %cst_47 : f32 to vector<16x16xf32>
    %141 = arith.mulf %139, %140 : vector<16x16xf32>
    %142 = arith.truncf %141 : vector<16x16xf32> to vector<16x16xbf16>
    %143 = arith.truncf %108 : vector<16x8xf32> to vector<16x8xbf16>
    %cst_48 = arith.constant dense<0.000000e+00> : vector<16x8xf32>
    %144 = tpu.matmul %142, %143, %cst_48 {dimension_numbers = #tpu.dot_dimension_numbers<[0], [0], [1], [1], [0, 1, 1, 1], [], []>} : vector<16x16xbf16>, vector<16x8xbf16>, vector<16x8xf32> -> vector<16x8xf32>
    %cst_49 = arith.constant dense<0.000000e+00> : vector<16xf32>
    %145 = vector.multi_reduction <add>, %141, %cst_49 [0] : vector<16x16xf32> to vector<16xf32>
    %146 = vector.shape_cast %145 : vector<16xf32> to vector<1x16xf32>
    %147 = arith.truncf %126 : vector<16x16xf32> to vector<16x16xbf16>
    %148 = arith.truncf %144 : vector<16x8xf32> to vector<16x8xbf16>
    %cst_50 = arith.constant dense<0.000000e+00> : vector<16x8xf32>
    %149 = tpu.matmul %147, %148, %cst_50 {dimension_numbers = #tpu.dot_dimension_numbers<[1], [0], [0], [1], [0, 0, 1, 1], [], []>} : vector<16x16xbf16>, vector<16x8xbf16>, vector<16x8xf32> -> vector<16x8xf32>
    %150 = vector.broadcast %146 : vector<1x16xf32> to vector<16x16xf32>
    %151 = arith.mulf %126, %150 : vector<16x16xf32>
    %cst_51 = arith.constant dense<0.000000e+00> : vector<16xf32>
    %152 = vector.multi_reduction <add>, %151, %cst_51 [1] : vector<16x16xf32> to vector<16xf32>
    %153 = vector.shape_cast %152 : vector<16xf32> to vector<16x1xf32>
    %cst_52 = arith.constant 9.99999996E-13 : f32
    %154 = vector.broadcast %cst_52 : f32 to vector<16x1xf32>
    %155 = arith.maximumf %153, %154 : vector<16x1xf32>
    %156 = vector.broadcast %155 : vector<16x1xf32> to vector<16x8xf32>
    %157 = arith.divf %149, %156 : vector<16x8xf32>
    %158 = vector.extract_strided_slice %1 {offsets = [0, 24], sizes = [16, 8], strides = [1, 1]} : vector<16x96xf32> to vector<16x8xf32>
    %159 = vector.extract_strided_slice %1 {offsets = [0, 56], sizes = [16, 8], strides = [1, 1]} : vector<16x96xf32> to vector<16x8xf32>
    %160 = vector.extract_strided_slice %1 {offsets = [0, 88], sizes = [16, 8], strides = [1, 1]} : vector<16x96xf32> to vector<16x8xf32>
    %c3 = arith.constant 3 : index
    %c0_53 = arith.constant 0 : index
    %c0_54 = arith.constant 0 : index
    %161 = vector.load %arg2[%c3, %c0_53, %c0_54] : memref<4x8x16xf32, #tpu.memory_space<vmem>>, vector<1x8x16xf32>
    %162 = vector.shape_cast %161 : vector<1x8x16xf32> to vector<8x16xf32>
    %163 = arith.truncf %162 : vector<8x16xf32> to vector<8x16xbf16>
    %164 = arith.mulf %158, %158 : vector<16x8xf32>
    %cst_55 = arith.constant dense<0.000000e+00> : vector<16xf32>
    %165 = vector.multi_reduction <add>, %164, %cst_55 [1] : vector<16x8xf32> to vector<16xf32>
    %166 = vector.shape_cast %165 : vector<16xf32> to vector<16x1xf32>
    %167 = math.sqrt %166 : vector<16x1xf32>
    %cst_56 = arith.constant 9.99999996E-13 : f32
    %168 = vector.broadcast %cst_56 : f32 to vector<16x1xf32>
    %169 = arith.maximumf %167, %168 : vector<16x1xf32>
    %170 = vector.broadcast %169 : vector<16x1xf32> to vector<16x8xf32>
    %171 = arith.divf %158, %170 : vector<16x8xf32>
    %172 = arith.truncf %171 : vector<16x8xf32> to vector<16x8xbf16>
    %cst_57 = arith.constant dense<0.000000e+00> : vector<16x16xf32>
    %173 = tpu.matmul %172, %163, %cst_57 {dimension_numbers = #tpu.dot_dimension_numbers<[1], [0], [0], [1], [0, 0, 1, 1], [], []>} : vector<16x8xbf16>, vector<8x16xbf16>, vector<16x16xf32> -> vector<16x16xf32>
    %cst_58 = arith.constant 5.000000e-01 : f32
    %174 = vector.broadcast %cst_58 : f32 to vector<16x16xf32>
    %175 = arith.subf %173, %174 : vector<16x16xf32>
    %176 = math.exp %175 : vector<16x16xf32>
    %cst_59 = arith.constant 2.500000e-01 : f32
    %177 = vector.broadcast %cst_59 : f32 to vector<16x16xf32>
    %178 = arith.mulf %176, %177 : vector<16x16xf32>
    %179 = arith.mulf %159, %159 : vector<16x8xf32>
    %cst_60 = arith.constant dense<0.000000e+00> : vector<16xf32>
    %180 = vector.multi_reduction <add>, %179, %cst_60 [1] : vector<16x8xf32> to vector<16xf32>
    %181 = vector.shape_cast %180 : vector<16xf32> to vector<16x1xf32>
    %182 = math.sqrt %181 : vector<16x1xf32>
    %cst_61 = arith.constant 9.99999996E-13 : f32
    %183 = vector.broadcast %cst_61 : f32 to vector<16x1xf32>
    %184 = arith.maximumf %182, %183 : vector<16x1xf32>
    %185 = vector.broadcast %184 : vector<16x1xf32> to vector<16x8xf32>
    %186 = arith.divf %159, %185 : vector<16x8xf32>
    %187 = arith.truncf %186 : vector<16x8xf32> to vector<16x8xbf16>
    %cst_62 = arith.constant dense<0.000000e+00> : vector<16x16xf32>
    %188 = tpu.matmul %187, %163, %cst_62 {dimension_numbers = #tpu.dot_dimension_numbers<[1], [0], [0], [1], [0, 0, 1, 1], [], []>} : vector<16x8xbf16>, vector<8x16xbf16>, vector<16x16xf32> -> vector<16x16xf32>
    %cst_63 = arith.constant 5.000000e-01 : f32
    %189 = vector.broadcast %cst_63 : f32 to vector<16x16xf32>
    %190 = arith.subf %188, %189 : vector<16x16xf32>
    %191 = math.exp %190 : vector<16x16xf32>
    %cst_64 = arith.constant 2.500000e-01 : f32
    %192 = vector.broadcast %cst_64 : f32 to vector<16x16xf32>
    %193 = arith.mulf %191, %192 : vector<16x16xf32>
    %194 = arith.truncf %193 : vector<16x16xf32> to vector<16x16xbf16>
    %195 = arith.truncf %160 : vector<16x8xf32> to vector<16x8xbf16>
    %cst_65 = arith.constant dense<0.000000e+00> : vector<16x8xf32>
    %196 = tpu.matmul %194, %195, %cst_65 {dimension_numbers = #tpu.dot_dimension_numbers<[0], [0], [1], [1], [0, 1, 1, 1], [], []>} : vector<16x16xbf16>, vector<16x8xbf16>, vector<16x8xf32> -> vector<16x8xf32>
    %cst_66 = arith.constant dense<0.000000e+00> : vector<16xf32>
    %197 = vector.multi_reduction <add>, %193, %cst_66 [0] : vector<16x16xf32> to vector<16xf32>
    %198 = vector.shape_cast %197 : vector<16xf32> to vector<1x16xf32>
    %199 = arith.truncf %178 : vector<16x16xf32> to vector<16x16xbf16>
    %200 = arith.truncf %196 : vector<16x8xf32> to vector<16x8xbf16>
    %cst_67 = arith.constant dense<0.000000e+00> : vector<16x8xf32>
    %201 = tpu.matmul %199, %200, %cst_67 {dimension_numbers = #tpu.dot_dimension_numbers<[1], [0], [0], [1], [0, 0, 1, 1], [], []>} : vector<16x16xbf16>, vector<16x8xbf16>, vector<16x8xf32> -> vector<16x8xf32>
    %202 = vector.broadcast %198 : vector<1x16xf32> to vector<16x16xf32>
    %203 = arith.mulf %178, %202 : vector<16x16xf32>
    %cst_68 = arith.constant dense<0.000000e+00> : vector<16xf32>
    %204 = vector.multi_reduction <add>, %203, %cst_68 [1] : vector<16x16xf32> to vector<16xf32>
    %205 = vector.shape_cast %204 : vector<16xf32> to vector<16x1xf32>
    %cst_69 = arith.constant 9.99999996E-13 : f32
    %206 = vector.broadcast %cst_69 : f32 to vector<16x1xf32>
    %207 = arith.maximumf %205, %206 : vector<16x1xf32>
    %208 = vector.broadcast %207 : vector<16x1xf32> to vector<16x8xf32>
    %209 = arith.divf %201, %208 : vector<16x8xf32>
    %210 = tpu.concatenate %53, %105, %157, %209 in 1 : vector<16x8xf32>, vector<16x8xf32>, vector<16x8xf32>, vector<16x8xf32> -> vector<16x32xf32>
    %c0_70 = arith.constant 0 : index
    %c0_71 = arith.constant 0 : index
    %c0_72 = arith.constant 0 : index
    %211 = vector.load %arg3[%c0_70, %c0_71, %c0_72] : memref<1x16x32xf32, #tpu.memory_space<vmem>>, vector<1x16x32xf32>
    %212 = vector.shape_cast %211 : vector<1x16x32xf32> to vector<16x32xf32>
    %213 = vector.shape_cast %210 : vector<16x32xf32> to vector<1x16x32xf32>
    tpu.vector_store %arg3[%c0_70, %c0_71, %c0_72], %213 {strides = array<i32>} : memref<1x16x32xf32, #tpu.memory_space<vmem>>, vector<1x16x32xf32>,
    return
  }
  func.func @transform_0(%arg0: i32) -> (i32, i32, i32) {
    %c0_i32 = arith.constant 0 : i32
    %c0_i32_0 = arith.constant 0 : i32
    %c0_i32_1 = arith.constant 0 : i32
    return %arg0, %c0_i32, %c0_i32_0 : i32, i32, i32
  }
  func.func @transform_1(%arg0: i32) -> (i32, i32, i32) {
    %c0_i32 = arith.constant 0 : i32
    %c0_i32_0 = arith.constant 0 : i32
    %c0_i32_1 = arith.constant 0 : i32
    %c0_i32_2 = arith.constant 0 : i32
    return %c0_i32, %c0_i32_0, %c0_i32_1 : i32, i32, i32
  }
  func.func @transform_2(%arg0: i32) -> (i32, i32, i32) {
    %c0_i32 = arith.constant 0 : i32
    %c0_i32_0 = arith.constant 0 : i32
    %c0_i32_1 = arith.constant 0 : i32
    return %arg0, %c0_i32, %c0_i32_0 : i32, i32, i32
  }
}

module attributes {stable_mosaic.version = 11 : i64} {
  func.func @_linear_kernel(%arg0: i32, %arg1: memref<32x32xf32, #tpu.memory_space<vmem>>, %arg2: memref<32x32xbf16, #tpu.memory_space<vmem>>, %arg3: memref<1x32xf32, #tpu.memory_space<vmem>>, %arg4: memref<32x32xf32, #tpu.memory_space<vmem>>, %arg5: memref<32x32xf32, #tpu.memory_space<vmem>>) attributes {dimension_semantics = [#tpu.dimension_semantics<parallel>], iteration_bounds = array<i64: 1>, scalar_prefetch = 0 : i64, scratch_operands = 0 : i64, tpu.core_type = #tpu.core_type<tc>, window_params = [{transform_indices = @transform_0, window_bounds = array<i64: 32, 32>}, {pipeline_mode = #tpu.pipeline_mode<synchronous>, transform_indices = @transform_1, window_bounds = array<i64: 32, 32>}, {pipeline_mode = #tpu.pipeline_mode<synchronous>, transform_indices = @transform_2, window_bounds = array<i64: 1, 32>}, {transform_indices = @transform_3, window_bounds = array<i64: 32, 32>}, {transform_indices = @transform_4, window_bounds = array<i64: 32, 32>}]} {
    %c0 = arith.constant 0 : index
    %c0_0 = arith.constant 0 : index
    %0 = vector.load %arg1[%c0, %c0_0] : memref<32x32xf32, #tpu.memory_space<vmem>>, vector<32x32xf32>
    %1 = arith.truncf %0 : vector<32x32xf32> to vector<32x32xbf16>
    %c0_1 = arith.constant 0 : index
    %c0_2 = arith.constant 0 : index
    %2 = vector.load %arg2[%c0_1, %c0_2] : memref<32x32xbf16, #tpu.memory_space<vmem>>, vector<32x32xbf16>
    %cst = arith.constant dense<0.000000e+00> : vector<32x32xf32>
    %3 = tpu.matmul %1, %2, %cst {dimension_numbers = #tpu.dot_dimension_numbers<[1], [0], [0], [1], [0, 0, 1, 1], [], []>} : vector<32x32xbf16>, vector<32x32xbf16>, vector<32x32xf32> -> vector<32x32xf32>
    %c0_3 = arith.constant 0 : index
    %c0_4 = arith.constant 0 : index
    %4 = vector.load %arg3[%c0_3, %c0_4] : memref<1x32xf32, #tpu.memory_space<vmem>>, vector<1x32xf32>
    %5 = vector.broadcast %4 : vector<1x32xf32> to vector<32x32xf32>
    %6 = arith.addf %3, %5 : vector<32x32xf32>
    %c0_5 = arith.constant 0 : index
    %c0_6 = arith.constant 0 : index
    %7 = vector.load %arg4[%c0_5, %c0_6] : memref<32x32xf32, #tpu.memory_space<vmem>>, vector<32x32xf32>
    %8 = arith.addf %6, %7 : vector<32x32xf32>
    %c0_7 = arith.constant 0 : index
    %c0_8 = arith.constant 0 : index
    %9 = vector.load %arg5[%c0_7, %c0_8] : memref<32x32xf32, #tpu.memory_space<vmem>>, vector<32x32xf32>
    tpu.vector_store %arg5[%c0_7, %c0_8], %8 {strides = array<i32>} : memref<32x32xf32, #tpu.memory_space<vmem>>, vector<32x32xf32>,
    return
  }
  func.func @transform_0(%arg0: i32) -> (i32, i32) {
    %c0_i32 = arith.constant 0 : i32
    %c0_i32_0 = arith.constant 0 : i32
    return %arg0, %c0_i32 : i32, i32
  }
  func.func @transform_1(%arg0: i32) -> (i32, i32) {
    %c0_i32 = arith.constant 0 : i32
    %c0_i32_0 = arith.constant 0 : i32
    %c0_i32_1 = arith.constant 0 : i32
    return %c0_i32, %c0_i32_0 : i32, i32
  }
  func.func @transform_2(%arg0: i32) -> (i32, i32) {
    %c0_i32 = arith.constant 0 : i32
    %c0_i32_0 = arith.constant 0 : i32
    %c0_i32_1 = arith.constant 0 : i32
    return %c0_i32, %c0_i32_0 : i32, i32
  }
  func.func @transform_3(%arg0: i32) -> (i32, i32) {
    %c0_i32 = arith.constant 0 : i32
    %c0_i32_0 = arith.constant 0 : i32
    return %arg0, %c0_i32 : i32, i32
  }
  func.func @transform_4(%arg0: i32) -> (i32, i32) {
    %c0_i32 = arith.constant 0 : i32
    %c0_i32_0 = arith.constant 0 : i32
    return %arg0, %c0_i32 : i32, i32
  }
}

module attributes {stable_mosaic.version = 11 : i64} {
  func.func @_linear_kernel(%arg0: i32, %arg1: memref<32x32xf32, #tpu.memory_space<vmem>>, %arg2: memref<1x32xf32, #tpu.memory_space<vmem>>, %arg3: memref<1x32xf32, #tpu.memory_space<vmem>>, %arg4: memref<32x128xbf16, #tpu.memory_space<vmem>>, %arg5: memref<1x128xf32, #tpu.memory_space<vmem>>, %arg6: memref<32x128xf32, #tpu.memory_space<vmem>>, %arg7: memref<1x128xf32, #tpu.memory_space<vmem>>, %arg8: memref<1x128xf32, #tpu.memory_space<vmem>>) attributes {dimension_semantics = [#tpu.dimension_semantics<arbitrary>], iteration_bounds = array<i64: 1>, scalar_prefetch = 0 : i64, scratch_operands = 0 : i64, tpu.core_type = #tpu.core_type<tc>, window_params = [{transform_indices = @transform_0, window_bounds = array<i64: 32, 32>}, {pipeline_mode = #tpu.pipeline_mode<synchronous>, transform_indices = @transform_1, window_bounds = array<i64: 1, 32>}, {pipeline_mode = #tpu.pipeline_mode<synchronous>, transform_indices = @transform_2, window_bounds = array<i64: 1, 32>}, {pipeline_mode = #tpu.pipeline_mode<synchronous>, transform_indices = @transform_3, window_bounds = array<i64: 32, 128>}, {pipeline_mode = #tpu.pipeline_mode<synchronous>, transform_indices = @transform_4, window_bounds = array<i64: 1, 128>}, {transform_indices = @transform_5, window_bounds = array<i64: 32, 128>}, {pipeline_mode = #tpu.pipeline_mode<synchronous>, transform_indices = @transform_6, window_bounds = array<i64: 1, 128>}, {pipeline_mode = #tpu.pipeline_mode<synchronous>, transform_indices = @transform_7, window_bounds = array<i64: 1, 128>}]} {
    %c0 = arith.constant 0 : index
    %c0_0 = arith.constant 0 : index
    %0 = vector.load %arg1[%c0, %c0_0] : memref<32x32xf32, #tpu.memory_space<vmem>>, vector<32x32xf32>
    %cst = arith.constant dense<0.000000e+00> : vector<32xf32>
    %1 = vector.multi_reduction <add>, %0, %cst [1] : vector<32x32xf32> to vector<32xf32>
    %2 = vector.shape_cast %1 : vector<32xf32> to vector<32x1xf32>
    %cst_1 = arith.constant 3.200000e+01 : f32
    %3 = vector.broadcast %cst_1 : f32 to vector<32x1xf32>
    %4 = arith.divf %2, %3 : vector<32x1xf32>
    %5 = vector.broadcast %4 : vector<32x1xf32> to vector<32x32xf32>
    %6 = arith.subf %0, %5 : vector<32x32xf32>
    %7 = arith.mulf %6, %6 : vector<32x32xf32>
    %cst_2 = arith.constant dense<0.000000e+00> : vector<32xf32>
    %8 = vector.multi_reduction <add>, %7, %cst_2 [1] : vector<32x32xf32> to vector<32xf32>
    %9 = vector.shape_cast %8 : vector<32xf32> to vector<32x1xf32>
    %cst_3 = arith.constant 3.200000e+01 : f32
    %10 = vector.broadcast %cst_3 : f32 to vector<32x1xf32>
    %11 = arith.divf %9, %10 : vector<32x1xf32>
    %cst_4 = arith.constant 9.99999974E-6 : f32
    %12 = vector.broadcast %cst_4 : f32 to vector<32x1xf32>
    %13 = arith.addf %11, %12 : vector<32x1xf32>
    %14 = math.rsqrt %13 : vector<32x1xf32>
    %15 = vector.broadcast %14 : vector<32x1xf32> to vector<32x32xf32>
    %16 = arith.mulf %6, %15 : vector<32x32xf32>
    %c0_5 = arith.constant 0 : index
    %c0_6 = arith.constant 0 : index
    %17 = vector.load %arg2[%c0_5, %c0_6] : memref<1x32xf32, #tpu.memory_space<vmem>>, vector<1x32xf32>
    %18 = vector.broadcast %17 : vector<1x32xf32> to vector<32x32xf32>
    %19 = arith.mulf %16, %18 : vector<32x32xf32>
    %c0_7 = arith.constant 0 : index
    %c0_8 = arith.constant 0 : index
    %20 = vector.load %arg3[%c0_7, %c0_8] : memref<1x32xf32, #tpu.memory_space<vmem>>, vector<1x32xf32>
    %21 = vector.broadcast %20 : vector<1x32xf32> to vector<32x32xf32>
    %22 = arith.addf %19, %21 : vector<32x32xf32>
    %23 = arith.truncf %22 : vector<32x32xf32> to vector<32x32xbf16>
    %c0_9 = arith.constant 0 : index
    %c0_10 = arith.constant 0 : index
    %24 = vector.load %arg4[%c0_9, %c0_10] : memref<32x128xbf16, #tpu.memory_space<vmem>>, vector<32x128xbf16>
    %cst_11 = arith.constant dense<0.000000e+00> : vector<32x128xf32>
    %25 = tpu.matmul %23, %24, %cst_11 {dimension_numbers = #tpu.dot_dimension_numbers<[1], [0], [0], [1], [0, 0, 1, 1], [], []>} : vector<32x32xbf16>, vector<32x128xbf16>, vector<32x128xf32> -> vector<32x128xf32>
    %c0_12 = arith.constant 0 : index
    %c0_13 = arith.constant 0 : index
    %26 = vector.load %arg5[%c0_12, %c0_13] : memref<1x128xf32, #tpu.memory_space<vmem>>, vector<1x128xf32>
    %27 = vector.broadcast %26 : vector<1x128xf32> to vector<32x128xf32>
    %28 = arith.addf %25, %27 : vector<32x128xf32>
    %c0_i32 = arith.constant 0 : i32
    %29 = arith.cmpi eq, %arg0, %c0_i32 : i32
    %30 = arith.extui %29 : i1 to i32
    %c0_i32_14 = arith.constant 0 : i32
    %31 = arith.cmpi ne, %30, %c0_i32_14 : i32
    scf.if %31 {
      %cst_27 = arith.constant 0.000000e+00 : f32
      %44 = vector.broadcast %cst_27 : f32 to vector<1x128xf32>
      %c0_28 = arith.constant 0 : index
      %c0_29 = arith.constant 0 : index
      %45 = vector.load %arg7[%c0_28, %c0_29] : memref<1x128xf32, #tpu.memory_space<vmem>>, vector<1x128xf32>
      tpu.vector_store %arg7[%c0_28, %c0_29], %44 {strides = array<i32>} : memref<1x128xf32, #tpu.memory_space<vmem>>, vector<1x128xf32>,
      %cst_30 = arith.constant 0.000000e+00 : f32
      %46 = vector.broadcast %cst_30 : f32 to vector<1x128xf32>
      %c0_31 = arith.constant 0 : index
      %c0_32 = arith.constant 0 : index
      %47 = vector.load %arg8[%c0_31, %c0_32] : memref<1x128xf32, #tpu.memory_space<vmem>>, vector<1x128xf32>
      tpu.vector_store %arg8[%c0_31, %c0_32], %46 {strides = array<i32>} : memref<1x128xf32, #tpu.memory_space<vmem>>, vector<1x128xf32>,
    } else {
    }
    %c0_15 = arith.constant 0 : index
    %c0_16 = arith.constant 0 : index
    %32 = vector.load %arg7[%c0_15, %c0_16] : memref<1x128xf32, #tpu.memory_space<vmem>>, vector<1x128xf32>
    %cst_17 = arith.constant dense<0.000000e+00> : vector<128xf32>
    %33 = vector.multi_reduction <add>, %28, %cst_17 [0] : vector<32x128xf32> to vector<128xf32>
    %34 = vector.shape_cast %33 : vector<128xf32> to vector<1x128xf32>
    %35 = arith.addf %32, %34 : vector<1x128xf32>
    %c0_18 = arith.constant 0 : index
    %c0_19 = arith.constant 0 : index
    %36 = vector.load %arg7[%c0_18, %c0_19] : memref<1x128xf32, #tpu.memory_space<vmem>>, vector<1x128xf32>
    tpu.vector_store %arg7[%c0_18, %c0_19], %35 {strides = array<i32>} : memref<1x128xf32, #tpu.memory_space<vmem>>, vector<1x128xf32>,
    %c0_20 = arith.constant 0 : index
    %c0_21 = arith.constant 0 : index
    %37 = vector.load %arg8[%c0_20, %c0_21] : memref<1x128xf32, #tpu.memory_space<vmem>>, vector<1x128xf32>
    %38 = arith.mulf %28, %28 : vector<32x128xf32>
    %cst_22 = arith.constant dense<0.000000e+00> : vector<128xf32>
    %39 = vector.multi_reduction <add>, %38, %cst_22 [0] : vector<32x128xf32> to vector<128xf32>
    %40 = vector.shape_cast %39 : vector<128xf32> to vector<1x128xf32>
    %41 = arith.addf %37, %40 : vector<1x128xf32>
    %c0_23 = arith.constant 0 : index
    %c0_24 = arith.constant 0 : index
    %42 = vector.load %arg8[%c0_23, %c0_24] : memref<1x128xf32, #tpu.memory_space<vmem>>, vector<1x128xf32>
    tpu.vector_store %arg8[%c0_23, %c0_24], %41 {strides = array<i32>} : memref<1x128xf32, #tpu.memory_space<vmem>>, vector<1x128xf32>,
    %c0_25 = arith.constant 0 : index
    %c0_26 = arith.constant 0 : index
    %43 = vector.load %arg6[%c0_25, %c0_26] : memref<32x128xf32, #tpu.memory_space<vmem>>, vector<32x128xf32>
    tpu.vector_store %arg6[%c0_25, %c0_26], %28 {strides = array<i32>} : memref<32x128xf32, #tpu.memory_space<vmem>>, vector<32x128xf32>,
    return
  }
  func.func @transform_0(%arg0: i32) -> (i32, i32) {
    %c0_i32 = arith.constant 0 : i32
    %c0_i32_0 = arith.constant 0 : i32
    return %arg0, %c0_i32 : i32, i32
  }
  func.func @transform_1(%arg0: i32) -> (i32, i32) {
    %c0_i32 = arith.constant 0 : i32
    %c0_i32_0 = arith.constant 0 : i32
    %c0_i32_1 = arith.constant 0 : i32
    return %c0_i32, %c0_i32_0 : i32, i32
  }
  func.func @transform_2(%arg0: i32) -> (i32, i32) {
    %c0_i32 = arith.constant 0 : i32
    %c0_i32_0 = arith.constant 0 : i32
    %c0_i32_1 = arith.constant 0 : i32
    return %c0_i32, %c0_i32_0 : i32, i32
  }
  func.func @transform_3(%arg0: i32) -> (i32, i32) {
    %c0_i32 = arith.constant 0 : i32
    %c0_i32_0 = arith.constant 0 : i32
    %c0_i32_1 = arith.constant 0 : i32
    return %c0_i32, %c0_i32_0 : i32, i32
  }
  func.func @transform_4(%arg0: i32) -> (i32, i32) {
    %c0_i32 = arith.constant 0 : i32
    %c0_i32_0 = arith.constant 0 : i32
    %c0_i32_1 = arith.constant 0 : i32
    return %c0_i32, %c0_i32_0 : i32, i32
  }
  func.func @transform_5(%arg0: i32) -> (i32, i32) {
    %c0_i32 = arith.constant 0 : i32
    %c0_i32_0 = arith.constant 0 : i32
    return %arg0, %c0_i32 : i32, i32
  }
  func.func @transform_6(%arg0: i32) -> (i32, i32) {
    %c0_i32 = arith.constant 0 : i32
    %c0_i32_0 = arith.constant 0 : i32
    %c0_i32_1 = arith.constant 0 : i32
    return %c0_i32, %c0_i32_0 : i32, i32
  }
  func.func @transform_7(%arg0: i32) -> (i32, i32) {
    %c0_i32 = arith.constant 0 : i32
    %c0_i32_0 = arith.constant 0 : i32
    %c0_i32_1 = arith.constant 0 : i32
    return %c0_i32, %c0_i32_0 : i32, i32
  }
}

module attributes {stable_mosaic.version = 11 : i64} {
  func.func @_bn_apply_kernel(%arg0: i32, %arg1: memref<32x128xf32, #tpu.memory_space<vmem>>, %arg2: memref<1x128xf32, #tpu.memory_space<vmem>>, %arg3: memref<1x128xf32, #tpu.memory_space<vmem>>, %arg4: memref<32x128xf32, #tpu.memory_space<vmem>>) attributes {dimension_semantics = [#tpu.dimension_semantics<parallel>], iteration_bounds = array<i64: 1>, scalar_prefetch = 0 : i64, scratch_operands = 0 : i64, tpu.core_type = #tpu.core_type<tc>, window_params = [{transform_indices = @transform_0, window_bounds = array<i64: 32, 128>}, {pipeline_mode = #tpu.pipeline_mode<synchronous>, transform_indices = @transform_1, window_bounds = array<i64: 1, 128>}, {pipeline_mode = #tpu.pipeline_mode<synchronous>, transform_indices = @transform_2, window_bounds = array<i64: 1, 128>}, {transform_indices = @transform_3, window_bounds = array<i64: 32, 128>}]} {
    %c0 = arith.constant 0 : index
    %c0_0 = arith.constant 0 : index
    %0 = vector.load %arg1[%c0, %c0_0] : memref<32x128xf32, #tpu.memory_space<vmem>>, vector<32x128xf32>
    %c0_1 = arith.constant 0 : index
    %c0_2 = arith.constant 0 : index
    %1 = vector.load %arg2[%c0_1, %c0_2] : memref<1x128xf32, #tpu.memory_space<vmem>>, vector<1x128xf32>
    %2 = vector.broadcast %1 : vector<1x128xf32> to vector<32x128xf32>
    %3 = arith.mulf %0, %2 : vector<32x128xf32>
    %c0_3 = arith.constant 0 : index
    %c0_4 = arith.constant 0 : index
    %4 = vector.load %arg3[%c0_3, %c0_4] : memref<1x128xf32, #tpu.memory_space<vmem>>, vector<1x128xf32>
    %5 = vector.broadcast %4 : vector<1x128xf32> to vector<32x128xf32>
    %6 = arith.addf %3, %5 : vector<32x128xf32>
    %cst = arith.constant 5.000000e-01 : f32
    %7 = vector.broadcast %cst : f32 to vector<32x128xf32>
    %8 = arith.mulf %7, %6 : vector<32x128xf32>
    %cst_5 = arith.constant 0.707106769 : f32
    %9 = vector.broadcast %cst_5 : f32 to vector<32x128xf32>
    %10 = arith.mulf %6, %9 : vector<32x128xf32>
    %11 = math.absf %10 : vector<32x128xf32>
    %cst_6 = arith.constant 0.327591091 : f32
    %12 = vector.broadcast %cst_6 : f32 to vector<32x128xf32>
    %13 = arith.mulf %12, %11 : vector<32x128xf32>
    %cst_7 = arith.constant 1.000000e+00 : f32
    %14 = vector.broadcast %cst_7 : f32 to vector<32x128xf32>
    %15 = arith.addf %14, %13 : vector<32x128xf32>
    %cst_8 = arith.constant 1.000000e+00 : f32
    %16 = vector.broadcast %cst_8 : f32 to vector<32x128xf32>
    %17 = arith.divf %16, %15 : vector<32x128xf32>
    %cst_9 = arith.constant 1.06140542 : f32
    %18 = vector.broadcast %cst_9 : f32 to vector<32x128xf32>
    %19 = arith.mulf %17, %18 : vector<32x128xf32>
    %cst_10 = arith.constant -1.45315206 : f32
    %20 = vector.broadcast %cst_10 : f32 to vector<32x128xf32>
    %21 = arith.addf %20, %19 : vector<32x128xf32>
    %22 = arith.mulf %17, %21 : vector<32x128xf32>
    %cst_11 = arith.constant 1.42141378 : f32
    %23 = vector.broadcast %cst_11 : f32 to vector<32x128xf32>
    %24 = arith.addf %23, %22 : vector<32x128xf32>
    %25 = arith.mulf %17, %24 : vector<32x128xf32>
    %cst_12 = arith.constant -0.284496725 : f32
    %26 = vector.broadcast %cst_12 : f32 to vector<32x128xf32>
    %27 = arith.addf %26, %25 : vector<32x128xf32>
    %28 = arith.mulf %17, %27 : vector<32x128xf32>
    %cst_13 = arith.constant 0.254829586 : f32
    %29 = vector.broadcast %cst_13 : f32 to vector<32x128xf32>
    %30 = arith.addf %29, %28 : vector<32x128xf32>
    %31 = arith.mulf %17, %30 : vector<32x128xf32>
    %cst_14 = arith.constant 0.000000e+00 : f32
    %32 = vector.broadcast %cst_14 : f32 to vector<32x128xf32>
    %33 = arith.subf %32, %11 : vector<32x128xf32>
    %34 = arith.mulf %33, %11 : vector<32x128xf32>
    %35 = math.exp %34 : vector<32x128xf32>
    %36 = arith.mulf %31, %35 : vector<32x128xf32>
    %cst_15 = arith.constant 1.000000e+00 : f32
    %37 = vector.broadcast %cst_15 : f32 to vector<32x128xf32>
    %38 = arith.subf %37, %36 : vector<32x128xf32>
    %cst_16 = arith.constant 0.000000e+00 : f32
    %39 = vector.broadcast %cst_16 : f32 to vector<32x128xf32>
    %40 = arith.cmpf olt, %10, %39 : vector<32x128xf32>
    %cst_17 = arith.constant 0.000000e+00 : f32
    %41 = vector.broadcast %cst_17 : f32 to vector<32x128xf32>
    %42 = arith.subf %41, %38 : vector<32x128xf32>
    %43 = arith.select %40, %42, %38 : vector<32x128xi1>, vector<32x128xf32>
    %cst_18 = arith.constant 1.000000e+00 : f32
    %44 = vector.broadcast %cst_18 : f32 to vector<32x128xf32>
    %45 = arith.addf %44, %43 : vector<32x128xf32>
    %46 = arith.mulf %8, %45 : vector<32x128xf32>
    %c0_19 = arith.constant 0 : index
    %c0_20 = arith.constant 0 : index
    %47 = vector.load %arg4[%c0_19, %c0_20] : memref<32x128xf32, #tpu.memory_space<vmem>>, vector<32x128xf32>
    tpu.vector_store %arg4[%c0_19, %c0_20], %46 {strides = array<i32>} : memref<32x128xf32, #tpu.memory_space<vmem>>, vector<32x128xf32>,
    return
  }
  func.func @transform_0(%arg0: i32) -> (i32, i32) {
    %c0_i32 = arith.constant 0 : i32
    %c0_i32_0 = arith.constant 0 : i32
    return %arg0, %c0_i32 : i32, i32
  }
  func.func @transform_1(%arg0: i32) -> (i32, i32) {
    %c0_i32 = arith.constant 0 : i32
    %c0_i32_0 = arith.constant 0 : i32
    %c0_i32_1 = arith.constant 0 : i32
    return %c0_i32, %c0_i32_0 : i32, i32
  }
  func.func @transform_2(%arg0: i32) -> (i32, i32) {
    %c0_i32 = arith.constant 0 : i32
    %c0_i32_0 = arith.constant 0 : i32
    %c0_i32_1 = arith.constant 0 : i32
    return %c0_i32, %c0_i32_0 : i32, i32
  }
  func.func @transform_3(%arg0: i32) -> (i32, i32) {
    %c0_i32 = arith.constant 0 : i32
    %c0_i32_0 = arith.constant 0 : i32
    return %arg0, %c0_i32 : i32, i32
  }
}

module attributes {stable_mosaic.version = 11 : i64} {
  func.func @_dwconv_kernel(%arg0: i32, %arg1: memref<1x6x6x128xf32, #tpu.memory_space<vmem>>, %arg2: memref<3x3x128xf32, #tpu.memory_space<vmem>>, %arg3: memref<1x1x128xf32, #tpu.memory_space<vmem>>, %arg4: memref<1x4x4x128xf32, #tpu.memory_space<vmem>>, %arg5: memref<1x128xf32, #tpu.memory_space<vmem>>, %arg6: memref<1x128xf32, #tpu.memory_space<vmem>>) attributes {dimension_semantics = [#tpu.dimension_semantics<arbitrary>], iteration_bounds = array<i64: 2>, scalar_prefetch = 0 : i64, scratch_operands = 0 : i64, tpu.core_type = #tpu.core_type<tc>, window_params = [{transform_indices = @transform_0, window_bounds = array<i64: 1, 6, 6, 128>}, {pipeline_mode = #tpu.pipeline_mode<synchronous>, transform_indices = @transform_1, window_bounds = array<i64: 3, 3, 128>}, {pipeline_mode = #tpu.pipeline_mode<synchronous>, transform_indices = @transform_2, window_bounds = array<i64: 1, 1, 128>}, {transform_indices = @transform_3, window_bounds = array<i64: 1, 4, 4, 128>}, {pipeline_mode = #tpu.pipeline_mode<synchronous>, transform_indices = @transform_4, window_bounds = array<i64: 1, 128>}, {pipeline_mode = #tpu.pipeline_mode<synchronous>, transform_indices = @transform_5, window_bounds = array<i64: 1, 128>}]} {
    %c0 = arith.constant 0 : index
    %c0_0 = arith.constant 0 : index
    %c0_1 = arith.constant 0 : index
    %c0_2 = arith.constant 0 : index
    %0 = vector.load %arg1[%c0, %c0_0, %c0_1, %c0_2] : memref<1x6x6x128xf32, #tpu.memory_space<vmem>>, vector<1x6x6x128xf32>
    %1 = vector.shape_cast %0 : vector<1x6x6x128xf32> to vector<6x6x128xf32>
    %c0_3 = arith.constant 0 : index
    %c0_4 = arith.constant 0 : index
    %c0_5 = arith.constant 0 : index
    %2 = vector.load %arg2[%c0_3, %c0_4, %c0_5] : memref<3x3x128xf32, #tpu.memory_space<vmem>>, vector<3x3x128xf32>
    %cst = arith.constant 0.000000e+00 : f32
    %3 = vector.broadcast %cst : f32 to vector<4x4x128xf32>
    %c0_6 = arith.constant 0 : index
    %c0_7 = arith.constant 0 : index
    %c0_8 = arith.constant 0 : index
    %4 = vector.load %arg3[%c0_6, %c0_7, %c0_8] : memref<1x1x128xf32, #tpu.memory_space<vmem>>, vector<1x1x128xf32>
    %5 = vector.broadcast %4 : vector<1x1x128xf32> to vector<4x4x128xf32>
    %6 = arith.addf %3, %5 : vector<4x4x128xf32>
    %7 = vector.extract_strided_slice %1 {offsets = [0, 0, 0], sizes = [4, 4, 128], strides = [1, 1, 1]} : vector<6x6x128xf32> to vector<4x4x128xf32>
    %8 = vector.extract_strided_slice %2 {offsets = [0, 0, 0], sizes = [1, 1, 128], strides = [1, 1, 1]} : vector<3x3x128xf32> to vector<1x1x128xf32>
    %9 = vector.broadcast %8 : vector<1x1x128xf32> to vector<4x4x128xf32>
    %10 = arith.mulf %7, %9 : vector<4x4x128xf32>
    %11 = arith.addf %6, %10 : vector<4x4x128xf32>
    %12 = vector.extract_strided_slice %1 {offsets = [0, 1, 0], sizes = [4, 4, 128], strides = [1, 1, 1]} : vector<6x6x128xf32> to vector<4x4x128xf32>
    %13 = vector.extract_strided_slice %2 {offsets = [0, 1, 0], sizes = [1, 1, 128], strides = [1, 1, 1]} : vector<3x3x128xf32> to vector<1x1x128xf32>
    %14 = vector.broadcast %13 : vector<1x1x128xf32> to vector<4x4x128xf32>
    %15 = arith.mulf %12, %14 : vector<4x4x128xf32>
    %16 = arith.addf %11, %15 : vector<4x4x128xf32>
    %17 = vector.extract_strided_slice %1 {offsets = [0, 2, 0], sizes = [4, 4, 128], strides = [1, 1, 1]} : vector<6x6x128xf32> to vector<4x4x128xf32>
    %18 = vector.extract_strided_slice %2 {offsets = [0, 2, 0], sizes = [1, 1, 128], strides = [1, 1, 1]} : vector<3x3x128xf32> to vector<1x1x128xf32>
    %19 = vector.broadcast %18 : vector<1x1x128xf32> to vector<4x4x128xf32>
    %20 = arith.mulf %17, %19 : vector<4x4x128xf32>
    %21 = arith.addf %16, %20 : vector<4x4x128xf32>
    %22 = vector.extract_strided_slice %1 {offsets = [1, 0, 0], sizes = [4, 4, 128], strides = [1, 1, 1]} : vector<6x6x128xf32> to vector<4x4x128xf32>
    %23 = vector.extract_strided_slice %2 {offsets = [1, 0, 0], sizes = [1, 1, 128], strides = [1, 1, 1]} : vector<3x3x128xf32> to vector<1x1x128xf32>
    %24 = vector.broadcast %23 : vector<1x1x128xf32> to vector<4x4x128xf32>
    %25 = arith.mulf %22, %24 : vector<4x4x128xf32>
    %26 = arith.addf %21, %25 : vector<4x4x128xf32>
    %27 = vector.extract_strided_slice %1 {offsets = [1, 1, 0], sizes = [4, 4, 128], strides = [1, 1, 1]} : vector<6x6x128xf32> to vector<4x4x128xf32>
    %28 = vector.extract_strided_slice %2 {offsets = [1, 1, 0], sizes = [1, 1, 128], strides = [1, 1, 1]} : vector<3x3x128xf32> to vector<1x1x128xf32>
    %29 = vector.broadcast %28 : vector<1x1x128xf32> to vector<4x4x128xf32>
    %30 = arith.mulf %27, %29 : vector<4x4x128xf32>
    %31 = arith.addf %26, %30 : vector<4x4x128xf32>
    %32 = vector.extract_strided_slice %1 {offsets = [1, 2, 0], sizes = [4, 4, 128], strides = [1, 1, 1]} : vector<6x6x128xf32> to vector<4x4x128xf32>
    %33 = vector.extract_strided_slice %2 {offsets = [1, 2, 0], sizes = [1, 1, 128], strides = [1, 1, 1]} : vector<3x3x128xf32> to vector<1x1x128xf32>
    %34 = vector.broadcast %33 : vector<1x1x128xf32> to vector<4x4x128xf32>
    %35 = arith.mulf %32, %34 : vector<4x4x128xf32>
    %36 = arith.addf %31, %35 : vector<4x4x128xf32>
    %37 = vector.extract_strided_slice %1 {offsets = [2, 0, 0], sizes = [4, 4, 128], strides = [1, 1, 1]} : vector<6x6x128xf32> to vector<4x4x128xf32>
    %38 = vector.extract_strided_slice %2 {offsets = [2, 0, 0], sizes = [1, 1, 128], strides = [1, 1, 1]} : vector<3x3x128xf32> to vector<1x1x128xf32>
    %39 = vector.broadcast %38 : vector<1x1x128xf32> to vector<4x4x128xf32>
    %40 = arith.mulf %37, %39 : vector<4x4x128xf32>
    %41 = arith.addf %36, %40 : vector<4x4x128xf32>
    %42 = vector.extract_strided_slice %1 {offsets = [2, 1, 0], sizes = [4, 4, 128], strides = [1, 1, 1]} : vector<6x6x128xf32> to vector<4x4x128xf32>
    %43 = vector.extract_strided_slice %2 {offsets = [2, 1, 0], sizes = [1, 1, 128], strides = [1, 1, 1]} : vector<3x3x128xf32> to vector<1x1x128xf32>
    %44 = vector.broadcast %43 : vector<1x1x128xf32> to vector<4x4x128xf32>
    %45 = arith.mulf %42, %44 : vector<4x4x128xf32>
    %46 = arith.addf %41, %45 : vector<4x4x128xf32>
    %47 = vector.extract_strided_slice %1 {offsets = [2, 2, 0], sizes = [4, 4, 128], strides = [1, 1, 1]} : vector<6x6x128xf32> to vector<4x4x128xf32>
    %48 = vector.extract_strided_slice %2 {offsets = [2, 2, 0], sizes = [1, 1, 128], strides = [1, 1, 1]} : vector<3x3x128xf32> to vector<1x1x128xf32>
    %49 = vector.broadcast %48 : vector<1x1x128xf32> to vector<4x4x128xf32>
    %50 = arith.mulf %47, %49 : vector<4x4x128xf32>
    %51 = arith.addf %46, %50 : vector<4x4x128xf32>
    %c0_9 = arith.constant 0 : index
    %c0_10 = arith.constant 0 : index
    %c0_11 = arith.constant 0 : index
    %c0_12 = arith.constant 0 : index
    %52 = vector.load %arg4[%c0_9, %c0_10, %c0_11, %c0_12] : memref<1x4x4x128xf32, #tpu.memory_space<vmem>>, vector<1x4x4x128xf32>
    %53 = vector.shape_cast %52 : vector<1x4x4x128xf32> to vector<4x4x128xf32>
    %54 = vector.shape_cast %51 : vector<4x4x128xf32> to vector<1x4x4x128xf32>
    tpu.vector_store %arg4[%c0_9, %c0_10, %c0_11, %c0_12], %54 {strides = array<i32>} : memref<1x4x4x128xf32, #tpu.memory_space<vmem>>, vector<1x4x4x128xf32>,
    %c0_i32 = arith.constant 0 : i32
    %55 = arith.cmpi eq, %arg0, %c0_i32 : i32
    %56 = arith.extui %55 : i1 to i32
    %c0_i32_13 = arith.constant 0 : i32
    %57 = arith.cmpi ne, %56, %c0_i32_13 : i32
    scf.if %57 {
      %cst_24 = arith.constant 0.000000e+00 : f32
      %69 = vector.broadcast %cst_24 : f32 to vector<1x128xf32>
      %c0_25 = arith.constant 0 : index
      %c0_26 = arith.constant 0 : index
      %70 = vector.load %arg5[%c0_25, %c0_26] : memref<1x128xf32, #tpu.memory_space<vmem>>, vector<1x128xf32>
      tpu.vector_store %arg5[%c0_25, %c0_26], %69 {strides = array<i32>} : memref<1x128xf32, #tpu.memory_space<vmem>>, vector<1x128xf32>,
      %cst_27 = arith.constant 0.000000e+00 : f32
      %71 = vector.broadcast %cst_27 : f32 to vector<1x128xf32>
      %c0_28 = arith.constant 0 : index
      %c0_29 = arith.constant 0 : index
      %72 = vector.load %arg6[%c0_28, %c0_29] : memref<1x128xf32, #tpu.memory_space<vmem>>, vector<1x128xf32>
      tpu.vector_store %arg6[%c0_28, %c0_29], %71 {strides = array<i32>} : memref<1x128xf32, #tpu.memory_space<vmem>>, vector<1x128xf32>,
    } else {
    }
    %c0_14 = arith.constant 0 : index
    %c0_15 = arith.constant 0 : index
    %58 = vector.load %arg5[%c0_14, %c0_15] : memref<1x128xf32, #tpu.memory_space<vmem>>, vector<1x128xf32>
    %cst_16 = arith.constant dense<0.000000e+00> : vector<128xf32>
    %59 = vector.multi_reduction <add>, %51, %cst_16 [0, 1] : vector<4x4x128xf32> to vector<128xf32>
    %60 = vector.shape_cast %59 : vector<128xf32> to vector<1x128xf32>
    %61 = arith.addf %58, %60 : vector<1x128xf32>
    %c0_17 = arith.constant 0 : index
    %c0_18 = arith.constant 0 : index
    %62 = vector.load %arg5[%c0_17, %c0_18] : memref<1x128xf32, #tpu.memory_space<vmem>>, vector<1x128xf32>
    tpu.vector_store %arg5[%c0_17, %c0_18], %61 {strides = array<i32>} : memref<1x128xf32, #tpu.memory_space<vmem>>, vector<1x128xf32>,
    %c0_19 = arith.constant 0 : index
    %c0_20 = arith.constant 0 : index
    %63 = vector.load %arg6[%c0_19, %c0_20] : memref<1x128xf32, #tpu.memory_space<vmem>>, vector<1x128xf32>
    %64 = arith.mulf %51, %51 : vector<4x4x128xf32>
    %cst_21 = arith.constant dense<0.000000e+00> : vector<128xf32>
    %65 = vector.multi_reduction <add>, %64, %cst_21 [0, 1] : vector<4x4x128xf32> to vector<128xf32>
    %66 = vector.shape_cast %65 : vector<128xf32> to vector<1x128xf32>
    %67 = arith.addf %63, %66 : vector<1x128xf32>
    %c0_22 = arith.constant 0 : index
    %c0_23 = arith.constant 0 : index
    %68 = vector.load %arg6[%c0_22, %c0_23] : memref<1x128xf32, #tpu.memory_space<vmem>>, vector<1x128xf32>
    tpu.vector_store %arg6[%c0_22, %c0_23], %67 {strides = array<i32>} : memref<1x128xf32, #tpu.memory_space<vmem>>, vector<1x128xf32>,
    return
  }
  func.func @transform_0(%arg0: i32) -> (i32, i32, i32, i32) {
    %c0_i32 = arith.constant 0 : i32
    %c0_i32_0 = arith.constant 0 : i32
    %c0_i32_1 = arith.constant 0 : i32
    %c0_i32_2 = arith.constant 0 : i32
    return %arg0, %c0_i32, %c0_i32_0, %c0_i32_1 : i32, i32, i32, i32
  }
  func.func @transform_1(%arg0: i32) -> (i32, i32, i32) {
    %c0_i32 = arith.constant 0 : i32
    %c0_i32_0 = arith.constant 0 : i32
    %c0_i32_1 = arith.constant 0 : i32
    %c0_i32_2 = arith.constant 0 : i32
    return %c0_i32, %c0_i32_0, %c0_i32_1 : i32, i32, i32
  }
  func.func @transform_2(%arg0: i32) -> (i32, i32, i32) {
    %c0_i32 = arith.constant 0 : i32
    %c0_i32_0 = arith.constant 0 : i32
    %c0_i32_1 = arith.constant 0 : i32
    %c0_i32_2 = arith.constant 0 : i32
    return %c0_i32, %c0_i32_0, %c0_i32_1 : i32, i32, i32
  }
  func.func @transform_3(%arg0: i32) -> (i32, i32, i32, i32) {
    %c0_i32 = arith.constant 0 : i32
    %c0_i32_0 = arith.constant 0 : i32
    %c0_i32_1 = arith.constant 0 : i32
    %c0_i32_2 = arith.constant 0 : i32
    return %arg0, %c0_i32, %c0_i32_0, %c0_i32_1 : i32, i32, i32, i32
  }
  func.func @transform_4(%arg0: i32) -> (i32, i32) {
    %c0_i32 = arith.constant 0 : i32
    %c0_i32_0 = arith.constant 0 : i32
    %c0_i32_1 = arith.constant 0 : i32
    return %c0_i32, %c0_i32_0 : i32, i32
  }
  func.func @transform_5(%arg0: i32) -> (i32, i32) {
    %c0_i32 = arith.constant 0 : i32
    %c0_i32_0 = arith.constant 0 : i32
    %c0_i32_1 = arith.constant 0 : i32
    return %c0_i32, %c0_i32_0 : i32, i32
  }
}

module attributes {stable_mosaic.version = 11 : i64} {
  func.func @_linear_kernel(%arg0: i32, %arg1: memref<32x128xf32, #tpu.memory_space<vmem>>, %arg2: memref<128x32xbf16, #tpu.memory_space<vmem>>, %arg3: memref<1x32xf32, #tpu.memory_space<vmem>>, %arg4: memref<32x32xf32, #tpu.memory_space<vmem>>, %arg5: memref<1x32xf32, #tpu.memory_space<vmem>>, %arg6: memref<1x32xf32, #tpu.memory_space<vmem>>) attributes {dimension_semantics = [#tpu.dimension_semantics<arbitrary>], iteration_bounds = array<i64: 1>, scalar_prefetch = 0 : i64, scratch_operands = 0 : i64, tpu.core_type = #tpu.core_type<tc>, window_params = [{transform_indices = @transform_0, window_bounds = array<i64: 32, 128>}, {pipeline_mode = #tpu.pipeline_mode<synchronous>, transform_indices = @transform_1, window_bounds = array<i64: 128, 32>}, {pipeline_mode = #tpu.pipeline_mode<synchronous>, transform_indices = @transform_2, window_bounds = array<i64: 1, 32>}, {transform_indices = @transform_3, window_bounds = array<i64: 32, 32>}, {pipeline_mode = #tpu.pipeline_mode<synchronous>, transform_indices = @transform_4, window_bounds = array<i64: 1, 32>}, {pipeline_mode = #tpu.pipeline_mode<synchronous>, transform_indices = @transform_5, window_bounds = array<i64: 1, 32>}]} {
    %c0 = arith.constant 0 : index
    %c0_0 = arith.constant 0 : index
    %0 = vector.load %arg1[%c0, %c0_0] : memref<32x128xf32, #tpu.memory_space<vmem>>, vector<32x128xf32>
    %1 = arith.truncf %0 : vector<32x128xf32> to vector<32x128xbf16>
    %c0_1 = arith.constant 0 : index
    %c0_2 = arith.constant 0 : index
    %2 = vector.load %arg2[%c0_1, %c0_2] : memref<128x32xbf16, #tpu.memory_space<vmem>>, vector<128x32xbf16>
    %cst = arith.constant dense<0.000000e+00> : vector<32x32xf32>
    %3 = tpu.matmul %1, %2, %cst {dimension_numbers = #tpu.dot_dimension_numbers<[1], [0], [0], [1], [0, 0, 1, 1], [], []>} : vector<32x128xbf16>, vector<128x32xbf16>, vector<32x32xf32> -> vector<32x32xf32>
    %c0_3 = arith.constant 0 : index
    %c0_4 = arith.constant 0 : index
    %4 = vector.load %arg3[%c0_3, %c0_4] : memref<1x32xf32, #tpu.memory_space<vmem>>, vector<1x32xf32>
    %5 = vector.broadcast %4 : vector<1x32xf32> to vector<32x32xf32>
    %6 = arith.addf %3, %5 : vector<32x32xf32>
    %c0_i32 = arith.constant 0 : i32
    %7 = arith.cmpi eq, %arg0, %c0_i32 : i32
    %8 = arith.extui %7 : i1 to i32
    %c0_i32_5 = arith.constant 0 : i32
    %9 = arith.cmpi ne, %8, %c0_i32_5 : i32
    scf.if %9 {
      %cst_18 = arith.constant 0.000000e+00 : f32
      %22 = vector.broadcast %cst_18 : f32 to vector<1x32xf32>
      %c0_19 = arith.constant 0 : index
      %c0_20 = arith.constant 0 : index
      %23 = vector.load %arg5[%c0_19, %c0_20] : memref<1x32xf32, #tpu.memory_space<vmem>>, vector<1x32xf32>
      tpu.vector_store %arg5[%c0_19, %c0_20], %22 {strides = array<i32>} : memref<1x32xf32, #tpu.memory_space<vmem>>, vector<1x32xf32>,
      %cst_21 = arith.constant 0.000000e+00 : f32
      %24 = vector.broadcast %cst_21 : f32 to vector<1x32xf32>
      %c0_22 = arith.constant 0 : index
      %c0_23 = arith.constant 0 : index
      %25 = vector.load %arg6[%c0_22, %c0_23] : memref<1x32xf32, #tpu.memory_space<vmem>>, vector<1x32xf32>
      tpu.vector_store %arg6[%c0_22, %c0_23], %24 {strides = array<i32>} : memref<1x32xf32, #tpu.memory_space<vmem>>, vector<1x32xf32>,
    } else {
    }
    %c0_6 = arith.constant 0 : index
    %c0_7 = arith.constant 0 : index
    %10 = vector.load %arg5[%c0_6, %c0_7] : memref<1x32xf32, #tpu.memory_space<vmem>>, vector<1x32xf32>
    %cst_8 = arith.constant dense<0.000000e+00> : vector<32xf32>
    %11 = vector.multi_reduction <add>, %6, %cst_8 [0] : vector<32x32xf32> to vector<32xf32>
    %12 = vector.shape_cast %11 : vector<32xf32> to vector<1x32xf32>
    %13 = arith.addf %10, %12 : vector<1x32xf32>
    %c0_9 = arith.constant 0 : index
    %c0_10 = arith.constant 0 : index
    %14 = vector.load %arg5[%c0_9, %c0_10] : memref<1x32xf32, #tpu.memory_space<vmem>>, vector<1x32xf32>
    tpu.vector_store %arg5[%c0_9, %c0_10], %13 {strides = array<i32>} : memref<1x32xf32, #tpu.memory_space<vmem>>, vector<1x32xf32>,
    %c0_11 = arith.constant 0 : index
    %c0_12 = arith.constant 0 : index
    %15 = vector.load %arg6[%c0_11, %c0_12] : memref<1x32xf32, #tpu.memory_space<vmem>>, vector<1x32xf32>
    %16 = arith.mulf %6, %6 : vector<32x32xf32>
    %cst_13 = arith.constant dense<0.000000e+00> : vector<32xf32>
    %17 = vector.multi_reduction <add>, %16, %cst_13 [0] : vector<32x32xf32> to vector<32xf32>
    %18 = vector.shape_cast %17 : vector<32xf32> to vector<1x32xf32>
    %19 = arith.addf %15, %18 : vector<1x32xf32>
    %c0_14 = arith.constant 0 : index
    %c0_15 = arith.constant 0 : index
    %20 = vector.load %arg6[%c0_14, %c0_15] : memref<1x32xf32, #tpu.memory_space<vmem>>, vector<1x32xf32>
    tpu.vector_store %arg6[%c0_14, %c0_15], %19 {strides = array<i32>} : memref<1x32xf32, #tpu.memory_space<vmem>>, vector<1x32xf32>,
    %c0_16 = arith.constant 0 : index
    %c0_17 = arith.constant 0 : index
    %21 = vector.load %arg4[%c0_16, %c0_17] : memref<32x32xf32, #tpu.memory_space<vmem>>, vector<32x32xf32>
    tpu.vector_store %arg4[%c0_16, %c0_17], %6 {strides = array<i32>} : memref<32x32xf32, #tpu.memory_space<vmem>>, vector<32x32xf32>,
    return
  }
  func.func @transform_0(%arg0: i32) -> (i32, i32) {
    %c0_i32 = arith.constant 0 : i32
    %c0_i32_0 = arith.constant 0 : i32
    return %arg0, %c0_i32 : i32, i32
  }
  func.func @transform_1(%arg0: i32) -> (i32, i32) {
    %c0_i32 = arith.constant 0 : i32
    %c0_i32_0 = arith.constant 0 : i32
    %c0_i32_1 = arith.constant 0 : i32
    return %c0_i32, %c0_i32_0 : i32, i32
  }
  func.func @transform_2(%arg0: i32) -> (i32, i32) {
    %c0_i32 = arith.constant 0 : i32
    %c0_i32_0 = arith.constant 0 : i32
    %c0_i32_1 = arith.constant 0 : i32
    return %c0_i32, %c0_i32_0 : i32, i32
  }
  func.func @transform_3(%arg0: i32) -> (i32, i32) {
    %c0_i32 = arith.constant 0 : i32
    %c0_i32_0 = arith.constant 0 : i32
    return %arg0, %c0_i32 : i32, i32
  }
  func.func @transform_4(%arg0: i32) -> (i32, i32) {
    %c0_i32 = arith.constant 0 : i32
    %c0_i32_0 = arith.constant 0 : i32
    %c0_i32_1 = arith.constant 0 : i32
    return %c0_i32, %c0_i32_0 : i32, i32
  }
  func.func @transform_5(%arg0: i32) -> (i32, i32) {
    %c0_i32 = arith.constant 0 : i32
    %c0_i32_0 = arith.constant 0 : i32
    %c0_i32_1 = arith.constant 0 : i32
    return %c0_i32, %c0_i32_0 : i32, i32
  }
}

module attributes {stable_mosaic.version = 11 : i64} {
  func.func @_bn_apply_kernel(%arg0: i32, %arg1: memref<8x128xf32, #tpu.memory_space<vmem>>, %arg2: memref<1x128xf32, #tpu.memory_space<vmem>>, %arg3: memref<1x128xf32, #tpu.memory_space<vmem>>, %arg4: memref<8x128xf32, #tpu.memory_space<vmem>>, %arg5: memref<8x128xf32, #tpu.memory_space<vmem>>) attributes {dimension_semantics = [#tpu.dimension_semantics<parallel>], iteration_bounds = array<i64: 1>, scalar_prefetch = 0 : i64, scratch_operands = 0 : i64, tpu.core_type = #tpu.core_type<tc>, window_params = [{transform_indices = @transform_0, window_bounds = array<i64: 8, 128>}, {pipeline_mode = #tpu.pipeline_mode<synchronous>, transform_indices = @transform_1, window_bounds = array<i64: 1, 128>}, {pipeline_mode = #tpu.pipeline_mode<synchronous>, transform_indices = @transform_2, window_bounds = array<i64: 1, 128>}, {transform_indices = @transform_3, window_bounds = array<i64: 8, 128>}, {transform_indices = @transform_4, window_bounds = array<i64: 8, 128>}]} {
    %c0 = arith.constant 0 : index
    %c0_0 = arith.constant 0 : index
    %0 = vector.load %arg1[%c0, %c0_0] : memref<8x128xf32, #tpu.memory_space<vmem>>, vector<8x128xf32>
    %c0_1 = arith.constant 0 : index
    %c0_2 = arith.constant 0 : index
    %1 = vector.load %arg2[%c0_1, %c0_2] : memref<1x128xf32, #tpu.memory_space<vmem>>, vector<1x128xf32>
    %2 = vector.broadcast %1 : vector<1x128xf32> to vector<8x128xf32>
    %3 = arith.mulf %0, %2 : vector<8x128xf32>
    %c0_3 = arith.constant 0 : index
    %c0_4 = arith.constant 0 : index
    %4 = vector.load %arg3[%c0_3, %c0_4] : memref<1x128xf32, #tpu.memory_space<vmem>>, vector<1x128xf32>
    %5 = vector.broadcast %4 : vector<1x128xf32> to vector<8x128xf32>
    %6 = arith.addf %3, %5 : vector<8x128xf32>
    %c0_5 = arith.constant 0 : index
    %c0_6 = arith.constant 0 : index
    %7 = vector.load %arg4[%c0_5, %c0_6] : memref<8x128xf32, #tpu.memory_space<vmem>>, vector<8x128xf32>
    %8 = arith.addf %6, %7 : vector<8x128xf32>
    %c0_7 = arith.constant 0 : index
    %c0_8 = arith.constant 0 : index
    %9 = vector.load %arg5[%c0_7, %c0_8] : memref<8x128xf32, #tpu.memory_space<vmem>>, vector<8x128xf32>
    tpu.vector_store %arg5[%c0_7, %c0_8], %8 {strides = array<i32>} : memref<8x128xf32, #tpu.memory_space<vmem>>, vector<8x128xf32>,
    return
  }
  func.func @transform_0(%arg0: i32) -> (i32, i32) {
    %c0_i32 = arith.constant 0 : i32
    %c0_i32_0 = arith.constant 0 : i32
    return %arg0, %c0_i32 : i32, i32
  }
  func.func @transform_1(%arg0: i32) -> (i32, i32) {
    %c0_i32 = arith.constant 0 : i32
    %c0_i32_0 = arith.constant 0 : i32
    %c0_i32_1 = arith.constant 0 : i32
    return %c0_i32, %c0_i32_0 : i32, i32
  }
  func.func @transform_2(%arg0: i32) -> (i32, i32) {
    %c0_i32 = arith.constant 0 : i32
    %c0_i32_0 = arith.constant 0 : i32
    %c0_i32_1 = arith.constant 0 : i32
    return %c0_i32, %c0_i32_0 : i32, i32
  }
  func.func @transform_3(%arg0: i32) -> (i32, i32) {
    %c0_i32 = arith.constant 0 : i32
    %c0_i32_0 = arith.constant 0 : i32
    return %arg0, %c0_i32 : i32, i32
  }
  func.func @transform_4(%arg0: i32) -> (i32, i32) {
    %c0_i32 = arith.constant 0 : i32
    %c0_i32_0 = arith.constant 0 : i32
    return %arg0, %c0_i32 : i32, i32
  }
}

</mosaic_0001>

<bundles_post_ra>
// kernel: performer_block_forward.9
= control target key start
LH: loop header
LB: loop body
LE: loop exit
PB: predicated region body
PF: predicated region fallthrough
CT: control target
= control target key end

     0   :  { %vm22_vm0 = vcmask 261120   ;;  %vm171_vm1 = vcmask 785408   ;;  %s279_s0 = inlined_call_operand.vmem [shape: f32[32,32], index: 0, kind: input, shape index: {}]   ;;  %s280_s3 = inlined_call_operand.vmem [shape: bf16[32,96], index: 3, kind: input, shape index: {}]   ;;  %s281_s1 = inlined_call_operand.vmem [shape: f32[1,32], index: 1, kind: input, shape index: {}]   ;;  %s282_s2 = inlined_call_operand.vmem [shape: f32[1,32], index: 2, kind: input, shape index: {}]   ;;  %s283_s4 = inlined_call_operand.vmem [shape: f32[32,96], index: 4, kind: output, shape index: {}]  }
   0x1   :  { %v18_v0 = vld [vmem:[%s279_s0] sm:$0xff]  ;;  %v20_v1 = vld [vmem:[%s279_s0 + $0x10] sm:$0xff]  ;;  %v19_v2 = vld [vmem:[%s279_s0 + $0x8] sm:$0xff] }
   0x2   :  { %v23_v3 = vsel %vm22_vm0, %v18_v0, 0.0  ;;  %v29_v4 = vsel %vm22_vm0, %v20_v1, 0.0  ;;  %v21_v5 = vld [vmem:[%s279_s0 + $0x18] sm:$0xff]  ;;  %v26_v6 = vsel %vm22_vm0, %v19_v2, 0.0  ;;  %v198_v28 = vld [vmem:[%s280_s3] sm:$0xff]   ;;  %v199_v29 = vld [vmem:[%s280_s3 + $0x8] sm:$0xff]  }
   0x3   :  { %24 = vadd.xlane.f32.xlu0 %v23_v3  ;;  %30 = vadd.xlane.f32.xlu1 %v29_v4  ;;  %v32_v7 = vsel %vm22_vm0, %v21_v5, 0.0  ;;  %v180_v44 = vld [vmem:[%s281_s1] ss:$0 sm:$0xff] }
   0x4   :  { %190 = vmatprep.subr.bf16.mxu0 %v198_v28  ;;  %v181_v50 = vld [vmem:[%s282_s2] ss:$0 sm:$0xff] }
   0x5   :  { %191 = vmatpush3.bf16.msra.mxu0 %v198_v28 }
   0x6   :  { %192 = vmatprep.subr.bf16.mxu0 %v199_v29 }
   0x7   :  { %27 = vadd.xlane.f32.xlu0 %v26_v6  ;;  %33 = vadd.xlane.f32.xlu1 %v32_v7 }
   0x9   :  { %193 = vmatpush3.bf16.msra.mxu0 %v199_v29 }
  0x90   :  { %v25_v8 = vpop.xlane.xlu0 %24  ;;  %v31_v9 = vpop.xlane.xlu1 %30 }
  0x91   :  { %v36_v10 = vmul.f32 0.03125, %v25_v8  ;;  %v38_v11 = vmul.f32 0.03125, %v31_v9 }
  0x93   :  { %v40_v12 = vsub.f32 %v18_v0, %v36_v10  ;;  %v42_v13 = vsub.f32 %v20_v1, %v38_v11 }
  0x94   :  { %v28_v14 = vpop.xlane.xlu0 %27  ;;  %v34_v15 = vpop.xlane.xlu1 %33 }
  0x95   :  { %v37_v16 = vmul.f32 0.03125, %v28_v14  ;;  %v39_v17 = vmul.f32 0.03125, %v34_v15  ;;  %v44_v18 = vmul.f32 %v40_v12, %v40_v12  ;;  %v46_v19 = vmul.f32 %v42_v13, %v42_v13 }
  0x97   :  { %v41_v20 = vsub.f32 %v19_v2, %v37_v16  ;;  %v43_v21 = vsub.f32 %v21_v5, %v39_v17  ;;  %v48_v22 = vsel %vm22_vm0, %v44_v18, 0.0  ;;  %v54_v23 = vsel %vm22_vm0, %v46_v19, 0.0 }
  0x98   :  { %49 = vadd.xlane.f32.xlu0 %v48_v22 }
  0x99   :  { %v45_v24 = vmul.f32 %v41_v20, %v41_v20  ;;  %v47_v25 = vmul.f32 %v43_v21, %v43_v21 }
  0x9b   :  { %v51_v26 = vsel %vm22_vm0, %v45_v24, 0.0  ;;  %v57_v27 = vsel %vm22_vm0, %v47_v25, 0.0 }
  0x9c   :  { %55 = vadd.xlane.f32.xlu0 %v54_v23  ;;  %52 = vadd.xlane.f32.xlu1 %v51_v26 }
  0xa0   :  { %58 = vadd.xlane.f32.xlu1 %v57_v27 }
 0x125   :  { %v50_v30 = vpop.xlane.xlu0 %49 }
 0x126   :  { %v60_v31 = vmul.f32 0.03125, %v50_v30 }
 0x128   :  { %v64_v32 = vadd.f32 1e-05, %v60_v31 }
 0x129   :  { %v53_v33 = vpop.xlane.xlu1 %52  ;;  %v56_v34 = vpop.xlane.xlu0 %55 }
 0x12a   :  { %200 = vrsqrt.f32 %v64_v32  ;;  %v61_v35 = vmul.f32 0.03125, %v53_v33  ;;  %v62_v36 = vmul.f32 0.03125, %v56_v34 }
 0x12c   :  { %v65_v37 = vadd.f32 1e-05, %v61_v35  ;;  %v66_v38 = vadd.f32 1e-05, %v62_v36 }
 0x12d   :  { %v59_v39 = vpop.xlane.xlu1 %58 }
 0x12e   :  { %202 = vrsqrt.f32 %v65_v37  ;;  %v63_v40 = vmul.f32 0.03125, %v59_v39 }
 0x12f   :  { %204 = vrsqrt.f32 %v66_v38 }
 0x130   :  { %v67_v41 = vadd.f32 1e-05, %v63_v40 }
 0x132   :  { %206 = vrsqrt.f32 %v67_v41 }
 0x134   :  { %v201_v42 = vpop.eup %200 }
 0x135   :  { %v72_v43 = vmul.f32 %v201_v42, %v40_v12 }
 0x137   :  { %v83_v48 = vmul.f32 %v180_v44, %v72_v43 }
 0x138   :  { %v203_v45 = vpop.eup %202 }
 0x139   :  { %v205_v46 = vpop.eup %204  ;;  %v73_v47 = vmul.f32 %v203_v45, %v41_v20  ;;  %v94_v54 = vadd.f32 %v181_v50, %v83_v48 }
 0x13a   :  { %v74_v49 = vmul.f32 %v205_v46, %v42_v13 }
 0x13b   :  { %v84_v51 = vmul.f32 %v180_v44, %v73_v47 }
 0x13c   :  { %v207_v52 = vpop.eup %206  ;;  %v85_v56 = vmul.f32 %v180_v44, %v74_v49 }
 0x13d   :  { %v75_v53 = vmul.f32 %v207_v52, %v43_v21  ;;  %v95_v55 = vadd.f32 %v181_v50, %v84_v51 }
 0x13e   :  { %v96_v59 = vadd.f32 %v181_v50, %v85_v56 }
 0x13f   :  { %v98_v57 = vpack.c.bf16 %v95_v55, %v94_v54  ;;  %v86_v58 = vmul.f32 %v180_v44, %v75_v53 }
 0x141   :  { %194 = vmatprep.mubr.msk.bf16.mxu0 %vm22_vm0, %v98_v57  ;;  %v97_v60 = vadd.f32 %v181_v50, %v86_v58 }
 0x143   :  { %v99_v61 = vpack.c.bf16 %v97_v60, %v96_v59 }
 0x145   :  { %195 = vmatmul.mubr.msk.bf16.vlgmr.msra.gmra.mrb[0].mxu0 %vm22_vm0, %v99_v61 }
 0x218   :  { %v196_v62 = vpop.f32.mrb[0].mxu0 }
 0x219   :  { %174 = vst.msk [vmem:[%s283_s4 + $0x10] sm:$0xff] %vm171_vm1, %v196_v62  ;;  %v156_v63 = vpop.f32.mrb[1].mxu0 }
 0x21a   :  { %172 = vst.msk [vmem:[%s283_s4] sm:$0xff] %vm171_vm1, %v156_v63  ;;  %v197_v0 = vpop.f32.mrb[2].mxu0 }
 0x21b   :  { %175 = vst.msk [vmem:[%s283_s4 + $0x18] sm:$0xff] %vm171_vm1, %v197_v0  ;;  %v159_v1 = vpop.f32.mrb[3].mxu0 }
 0x21c   :  { %173 = vst.msk [vmem:[%s283_s4 + $0x8] sm:$0xff] %vm171_vm1, %v159_v1 }

// kernel: performer_block_forward.11
= control target key start
LH: loop header
LB: loop body
LE: loop exit
PB: predicated region body
PF: predicated region fallthrough
CT: control target
= control target key end

     0   :  { %vm47_vm0 = vcmask 261120   ;;  %s214_s1 = inlined_call_operand.vmem [shape: bf16[32,32], index: 1, kind: input, shape index: {}]   ;;  %s215_s0 = inlined_call_operand.vmem [shape: f32[32,32], index: 0, kind: input, shape index: {}]   ;;  %s216_s2 = inlined_call_operand.vmem [shape: f32[1,32], index: 2, kind: input, shape index: {}]   ;;  %s217_s3 = inlined_call_operand.vmem [shape: f32[32,32], index: 3, kind: input, shape index: {}]   ;;  %s218_s4 = inlined_call_operand.vmem [shape: f32[32,32], index: 4, kind: output, shape index: {}]  }
   0x1   :  { %v136_v0 = vld [vmem:[%s214_s1] sm:$0xff]   ;;  %v137_v1 = vld [vmem:[%s214_s1 + $0x8] sm:$0xff]   ;;  %v20_v5 = vld [vmem:[%s215_s0 + $0x10] sm:$0xff] }
   0x2   :  { %128 = vmatprep.subr.bf16.mxu0 %v136_v0  ;;  %v18_v2 = vld [vmem:[%s215_s0] sm:$0xff]  ;;  %v19_v3 = vld [vmem:[%s215_s0 + $0x8] sm:$0xff]  ;;  %v21_v6 = vld [vmem:[%s215_s0 + $0x18] sm:$0xff] }
   0x3   :  { %129 = vmatpush3.bf16.msra.mxu0 %v136_v0  ;;  %v22_v4 = vpack.c.bf16 %v19_v3, %v18_v2  ;;  %v23_v7 = vpack.c.bf16 %v21_v6, %v20_v5  ;;  %v119_v8 = vld [vmem:[%s216_s2] ss:$0 sm:$0xff]  ;;  %v105_v10 = vld [vmem:[%s217_s3 + $0x10] sm:$0xff]  ;;  %v106_v16 = vld [vmem:[%s217_s3 + $0x18] sm:$0xff] }
   0x4   :  { %130 = vmatprep.subr.bf16.mxu0 %v137_v1  ;;  %v103_v13 = vld [vmem:[%s217_s3] sm:$0xff]  ;;  %v104_v20 = vld [vmem:[%s217_s3 + $0x8] sm:$0xff] }
   0x5   :  { %132 = vmatprep.mubr.msk.bf16.mxu0 %vm47_vm0, %v22_v4 }
   0x7   :  { %131 = vmatpush3.bf16.msra.mxu0 %v137_v1 }
   0xa   :  { %133 = vmatmul.mubr.msk.bf16.vlgmr.msra.gmra.mrb[0].mxu0 %vm47_vm0, %v23_v7 }
  0xdd   :  { %v134_v9 = vpop.f32.mrb[0].mxu0 }
  0xde   :  { %v97_v11 = vadd.f32 %v134_v9, %v119_v8  ;;  %v88_v12 = vpop.f32.mrb[1].mxu0 }
  0xdf   :  { %v89_v14 = vadd.f32 %v119_v8, %v88_v12  ;;  %v135_v15 = vpop.f32.mrb[2].mxu0 }
  0xe0   :  { %v109_v17 = vadd.f32 %v105_v10, %v97_v11  ;;  %v100_v18 = vadd.f32 %v135_v15, %v119_v8  ;;  %v91_v19 = vpop.f32.mrb[3].mxu0 }
  0xe1   :  { %v107_v21 = vadd.f32 %v103_v13, %v89_v14  ;;  %v92_v22 = vadd.f32 %v119_v8, %v91_v19 }
  0xe2   :  { %113 = vst.msk [vmem:[%s218_s4 + $0x10] sm:$0xff] %vm47_vm0, %v109_v17  ;;  %v110_v23 = vadd.f32 %v106_v16, %v100_v18 }
  0xe3   :  { %111 = vst.msk [vmem:[%s218_s4] sm:$0xff] %vm47_vm0, %v107_v21  ;;  %v108_v24 = vadd.f32 %v104_v20, %v92_v22 }
  0xe4   :  { %114 = vst.msk [vmem:[%s218_s4 + $0x18] sm:$0xff] %vm47_vm0, %v110_v23 }
  0xe5   :  { %112 = vst.msk [vmem:[%s218_s4 + $0x8] sm:$0xff] %vm47_vm0, %v108_v24 }

// kernel: performer_block_forward.12
= control target key start
LH: loop header
LB: loop body
LE: loop exit
PB: predicated region body
PF: predicated region fallthrough
CT: control target
= control target key end

     0   :  { %vm28_vm0 = vcmask 261120   ;;  %v264_v62 = vmov 0.0   ;;  %s372_s0 = inlined_call_operand.vmem [shape: f32[32,32], index: 0, kind: input, shape index: {}]   ;;  %s373_s3 = inlined_call_operand.vmem [shape: bf16[32,128], index: 3, kind: input, shape index: {}]   ;;  %s374_s1 = inlined_call_operand.vmem [shape: f32[1,32], index: 1, kind: input, shape index: {}]   ;;  %s375_s2 = inlined_call_operand.vmem [shape: f32[1,32], index: 2, kind: input, shape index: {}]   ;;  %s376_s6 = inlined_call_operand.vmem [shape: f32[1,128], index: 6, kind: output, shape index: {1}]   ;;  %s377_s7 = inlined_call_operand.vmem [shape: f32[1,128], index: 7, kind: output, shape index: {2}]   ;;  %s378_s4 = inlined_call_operand.vmem [shape: f32[1,128], index: 4, kind: input, shape index: {}]   ;;  %s379_s5 = inlined_call_operand.vmem [shape: f32[32,128], index: 5, kind: output, shape index: {0}]  }
   0x1   :  { %v24_v0 = vld [vmem:[%s372_s0] sm:$0xff]  ;;  %v26_v1 = vld [vmem:[%s372_s0 + $0x10] sm:$0xff]  ;;  %v25_v2 = vld [vmem:[%s372_s0 + $0x8] sm:$0xff]  ;;  %188 = vst [vmem:[%s376_s6] sm:$0x1] %v264_v62 }
   0x2   :  { %v29_v3 = vsel %vm28_vm0, %v24_v0, 0.0  ;;  %v35_v4 = vsel %vm28_vm0, %v26_v1, 0.0  ;;  %v27_v5 = vld [vmem:[%s372_s0 + $0x18] sm:$0xff]  ;;  %v32_v6 = vsel %vm28_vm0, %v25_v2, 0.0  ;;  %v254_v28 = vld [vmem:[%s373_s3] sm:$0xff]   ;;  %v255_v29 = vld [vmem:[%s373_s3 + $0x8] sm:$0xff]  }
   0x3   :  { %30 = vadd.xlane.f32.xlu0 %v29_v3  ;;  %36 = vadd.xlane.f32.xlu1 %v35_v4  ;;  %v38_v7 = vsel %vm28_vm0, %v27_v5, 0.0  ;;  %v234_v44 = vld [vmem:[%s374_s1] ss:$0 sm:$0xff]  ;;  %189 = vst [vmem:[%s377_s7] sm:$0x1] %v264_v62 }
   0x4   :  { %245 = vmatprep.subr.bf16.mxu0 %v254_v28  ;;  %v235_v50 = vld [vmem:[%s375_s2] ss:$0 sm:$0xff] }
   0x5   :  { %246 = vmatpush3.bf16.msra.mxu0 %v254_v28  ;;  %v236_v63 = vld [vmem:[%s378_s4] ss:$0 sm:$0xff] }
   0x6   :  { %247 = vmatprep.subr.bf16.mxu0 %v255_v29 }
   0x7   :  { %33 = vadd.xlane.f32.xlu0 %v32_v6  ;;  %39 = vadd.xlane.f32.xlu1 %v38_v7 }
   0x9   :  { %248 = vmatpush3.bf16.msra.mxu0 %v255_v29 }
  0x90   :  { %v31_v8 = vpop.xlane.xlu0 %30  ;;  %v37_v9 = vpop.xlane.xlu1 %36 }
  0x91   :  { %v42_v10 = vmul.f32 0.03125, %v31_v8  ;;  %v44_v11 = vmul.f32 0.03125, %v37_v9 }
  0x93   :  { %v46_v12 = vsub.f32 %v24_v0, %v42_v10  ;;  %v48_v13 = vsub.f32 %v26_v1, %v44_v11 }
  0x94   :  { %v34_v14 = vpop.xlane.xlu0 %33  ;;  %v40_v15 = vpop.xlane.xlu1 %39 }
  0x95   :  { %v43_v16 = vmul.f32 0.03125, %v34_v14  ;;  %v45_v17 = vmul.f32 0.03125, %v40_v15  ;;  %v50_v18 = vmul.f32 %v46_v12, %v46_v12  ;;  %v52_v19 = vmul.f32 %v48_v13, %v48_v13 }
  0x97   :  { %v47_v20 = vsub.f32 %v25_v2, %v43_v16  ;;  %v49_v21 = vsub.f32 %v27_v5, %v45_v17  ;;  %v54_v22 = vsel %vm28_vm0, %v50_v18, 0.0  ;;  %v60_v23 = vsel %vm28_vm0, %v52_v19, 0.0 }
  0x98   :  { %55 = vadd.xlane.f32.xlu0 %v54_v22 }
  0x99   :  { %v51_v24 = vmul.f32 %v47_v20, %v47_v20  ;;  %v53_v25 = vmul.f32 %v49_v21, %v49_v21 }
  0x9b   :  { %v57_v26 = vsel %vm28_vm0, %v51_v24, 0.0  ;;  %v63_v27 = vsel %vm28_vm0, %v53_v25, 0.0 }
  0x9c   :  { %61 = vadd.xlane.f32.xlu0 %v60_v23  ;;  %58 = vadd.xlane.f32.xlu1 %v57_v26 }
  0xa0   :  { %64 = vadd.xlane.f32.xlu1 %v63_v27  ;;  %v190_v27 = vld [vmem:[%s376_s6] sm:$0x1] }
 0x125   :  { %v56_v30 = vpop.xlane.xlu0 %55 }
 0x126   :  { %v66_v31 = vmul.f32 0.03125, %v56_v30  ;;  %v202_v30 = vld [vmem:[%s377_s7] sm:$0x1] }
 0x128   :  { %v70_v32 = vadd.f32 1e-05, %v66_v31 }
 0x129   :  { %v59_v33 = vpop.xlane.xlu1 %58  ;;  %v62_v34 = vpop.xlane.xlu0 %61 }
 0x12a   :  { %256 = vrsqrt.f32 %v70_v32  ;;  %v67_v35 = vmul.f32 0.03125, %v59_v33  ;;  %v68_v36 = vmul.f32 0.03125, %v62_v34 }
 0x12c   :  { %v71_v37 = vadd.f32 1e-05, %v67_v35  ;;  %v72_v38 = vadd.f32 1e-05, %v68_v36 }
 0x12d   :  { %v65_v39 = vpop.xlane.xlu1 %64 }
 0x12e   :  { %258 = vrsqrt.f32 %v71_v37  ;;  %v69_v40 = vmul.f32 0.03125, %v65_v39 }
 0x12f   :  { %260 = vrsqrt.f32 %v72_v38 }
 0x130   :  { %v73_v41 = vadd.f32 1e-05, %v69_v40 }
 0x132   :  { %262 = vrsqrt.f32 %v73_v41 }
 0x134   :  { %v257_v42 = vpop.eup %256 }
 0x135   :  { %v78_v43 = vmul.f32 %v257_v42, %v46_v12 }
 0x137   :  { %v89_v48 = vmul.f32 %v234_v44, %v78_v43 }
 0x138   :  { %v259_v45 = vpop.eup %258 }
 0x139   :  { %v261_v46 = vpop.eup %260  ;;  %v79_v47 = vmul.f32 %v259_v45, %v47_v20  ;;  %v100_v54 = vadd.f32 %v235_v50, %v89_v48 }
 0x13a   :  { %v80_v49 = vmul.f32 %v261_v46, %v48_v13 }
 0x13b   :  { %v90_v51 = vmul.f32 %v234_v44, %v79_v47 }
 0x13c   :  { %v263_v52 = vpop.eup %262  ;;  %v91_v56 = vmul.f32 %v234_v44, %v80_v49 }
 0x13d   :  { %v81_v53 = vmul.f32 %v263_v52, %v49_v21  ;;  %v101_v55 = vadd.f32 %v235_v50, %v90_v51 }
 0x13e   :  { %v102_v59 = vadd.f32 %v235_v50, %v91_v56 }
 0x13f   :  { %v104_v57 = vpack.c.bf16 %v101_v55, %v100_v54  ;;  %v92_v58 = vmul.f32 %v234_v44, %v81_v53 }
 0x141   :  { %249 = vmatprep.mubr.msk.bf16.mxu0 %vm28_vm0, %v104_v57  ;;  %v103_v60 = vadd.f32 %v235_v50, %v92_v58 }
 0x143   :  { %v105_v61 = vpack.c.bf16 %v103_v60, %v102_v59 }
 0x145   :  { %250 = vmatmul.mubr.msk.bf16.vlgmr.msra.gmra.mrb[0].mxu0 %vm28_vm0, %v105_v61 }
 0x218   :  { %v251_v0 = vpop.f32.mrb[0].mxu0 }
 0x219   :  { %v178_v1 = vadd.f32 %v251_v0, %v236_v63  ;;  %v169_v2 = vpop.f32.mrb[1].mxu0 }
 0x21a   :  { %v170_v3 = vadd.f32 %v236_v63, %v169_v2  ;;  %v252_v4 = vpop.f32.mrb[2].mxu0 }
 0x21b   :  { %220 = vst [vmem:[%s379_s5 + $0x10] sm:$0xff] %v178_v1  ;;  %v181_v5 = vadd.f32 %v252_v4, %v236_v63  ;;  %v172_v6 = vpop.f32.mrb[3].mxu0  ;;  %v205_v11 = vmul.f32 %v178_v1, %v178_v1 }
 0x21c   :  { %218 = vst [vmem:[%s379_s5] sm:$0xff] %v170_v3  ;;  %v173_v7 = vadd.f32 %v236_v63, %v172_v6  ;;  %v203_v8 = vmul.f32 %v170_v3, %v170_v3 }
 0x21d   :  { %221 = vst [vmem:[%s379_s5 + $0x18] sm:$0xff] %v181_v5  ;;  %v206_v14 = vmul.f32 %v181_v5, %v181_v5 }
 0x21e   :  { %v191_v9 = vadd.f32 %v173_v7, %v170_v3  ;;  %v204_v10 = vmul.f32 %v173_v7, %v173_v7  ;;  %219 = vst [vmem:[%s379_s5 + $0x8] sm:$0xff] %v173_v7 }
 0x220   :  { %v192_v12 = vadd.f32 %v191_v9, %v178_v1  ;;  %v207_v13 = vadd.f32 %v204_v10, %v203_v8 }
 0x222   :  { %v193_v15 = vadd.f32 %v192_v12, %v181_v5  ;;  %v208_v16 = vadd.f32 %v207_v13, %v205_v11 }
 0x224   :  { %v194_v17 = vrot.slane %v193_v15, 4  ;;  %v209_v18 = vadd.f32 %v208_v16, %v206_v14 }
 0x226   :  { %v195_v19 = vadd.f32 %v194_v17, %v193_v15  ;;  %v210_v20 = vrot.slane %v209_v18, 4 }
 0x228   :  { %v196_v21 = vrot.slane %v195_v19, 2  ;;  %v211_v22 = vadd.f32 %v210_v20, %v209_v18 }
 0x22a   :  { %v197_v23 = vadd.f32 %v196_v21, %v195_v19  ;;  %v212_v24 = vrot.slane %v211_v22, 2 }
 0x22c   :  { %v198_v25 = vrot.slane %v197_v23, 1  ;;  %v213_v26 = vadd.f32 %v212_v24, %v211_v22 }
 0x22e   :  { %v199_v28 = vadd.f32 %v198_v25, %v197_v23  ;;  %v214_v29 = vrot.slane %v213_v26, 1 }
 0x230   :  { %v200_v31 = vadd.f32 %v199_v28, %v190_v27  ;;  %v215_v32 = vadd.f32 %v214_v29, %v213_v26 }
 0x232   :  { %201 = vst [vmem:[%s376_s6] sm:$0x1] %v200_v31  ;;  %v216_v33 = vadd.f32 %v215_v32, %v202_v30 }
 0x234   :  { %217 = vst [vmem:[%s377_s7] sm:$0x1] %v216_v33 }

// kernel: performer_block_forward.10
= control target key start
LH: loop header
LB: loop body
LE: loop exit
PB: predicated region body
PF: predicated region fallthrough
CT: control target
= control target key end

     0   :  { %s1849_s9 = smov 0   ;;  %s2112_s0 = inlined_call_operand.vmem [shape: f32[2,16,96], index: 0, kind: input, shape index: {}]   ;;  %s2113_s1 = inlined_call_operand.vmem [shape: f32[4,8,16], index: 1, kind: input, shape index: {}]   ;;  %s2114_s2 = inlined_call_operand.vmem [shape: f32[2,16,32], index: 2, kind: output, shape index: {}]  }
   0x1 LB: > { %s1495_s10 = sadd.s32 4294967295, %s1816_s9   ;;  %p1499_p0 = scmp.ge.s32.totalorder %s1816_s9, 1  ;;  %s1816_s9 = sphi %s1849_s9, %s12_s9  }
   0x2   : > { %p112_p1 = scmp.lt.s32.totalorder %s1816_s9, 3 }
   0x4   : > { %p113_p2 = pnand %p1499_p0, %p112_p1 }
   0x5   : > { %p134_p3 = scmp.lt.s32.totalorder (!%p113_p2), %s1495_s10, 1  ;;  %s1818_s15 = smov (!%p113_p2), 96   ;;  %vm151_vm0 = vcmask (!%p113_p2), 64512   ;;  %v147_v9 = vld [vmem:[%s2113_s1] sm:$0xff] (!%p113_p2)  ;;  %vm182_vm1 = vcmask (!%p113_p2), 1043456   ;;  %v1819_v10 = vmov (!%p113_p2), 0.0  }
   0x6   : > { %116 = sbr.rel (%p113_p2) target bundleno = 3142 (0xc46), region = 28  ;;  %1581 = vmatprep.subr.bf16.mxu1 (!%p113_p2), %v1819_v10  ;;  %v148_v11 = vpack.c.bf16 (!%p113_p2), %v147_v9, %v147_v9  ;;  %vm1820_vm2 = vmmov (!%p113_p2), 0   ;;  %1575 = vmatprep.subr.bf16.mxu0 (!%p113_p2), %v1819_v10  ;;  %s1821_s18 = smov (!%p113_p2), 64   ;;  %vm347_vm11 = vcmask (!%p113_p2), 130048  }
   0x7   : > { %1583 = vmatprep.mubr.msk.bf16.mxu1 (!%p113_p2), %vm1820_vm2, %v1819_v10  ;;  %1577 = vmatprep.mubr.msk.bf16.mxu0 (!%p113_p2), %vm1820_vm2, %v1819_v10  ;;  %s1822_s19 = smov (!%p113_p2), 88   ;;  %s1823_s20 = smov (!%p113_p2), 120  }
   0x8   : > { %v184_v12 = vsel (!%p113_p2), %vm182_vm1, %v148_v11, 0  ;;  %s1824_s23 = smov (!%p113_p2), 56   ;;  %s1825_s24 = smov (!%p113_p2), 80  }
   0x9   : > { %1582 = vmatpush3.bf16.msra.mxu1 (!%p113_p2), %v184_v12  ;;  %1576 = vmatpush3.bf16.msra.mxu0 (!%p113_p2), %v184_v12  ;;  %s1826_s25 = smov (!%p113_p2), 112   ;;  %s1827_s28 = smov (!%p113_p2), 48  }
   0xa   : > { %1587 = vmatprep.subr.bf16.mxu0 (!%p113_p2), %v1819_v10  ;;  %1593 = vmatprep.subr.bf16.mxu1 (!%p113_p2), %v1819_v10  ;;  %s1828_s29 = smov (!%p113_p2), 72   ;;  %s1829_s30 = smov (!%p113_p2), 104  }
   0xb   : > { %s1830_s5 = smov (!%p113_p2), 40   ;;  %s1831_s6 = smov (!%p113_p2), 8  }
   0xc   : > { %s1832_s7 = smov (!%p113_p2), 16   ;;  %s1833_s8 = smov (!%p113_p2), 24  }
   0xd   : > { %s2116_s10 = smov (!%p134_p3, %s1495_s10), 1 }
   0xe   : > { %s1541_s11 = sshll.u32 %s2116_s10, 4 }
   0xf   : > { %s1865_s14 = scalar_lea.vmem %s2112_s0, %s1541_s11 }
  0x10   : > { %v1868_v0 = vld [vmem:[%s1865_s14] sm:$0xff]  ;;  %v1871_v1 = vld [vmem:[%s1865_s14 + $0x8] sm:$0xff] }
  0x11   : > { %v1875_v2 = vmul.f32 %v1868_v0, %v1868_v0  ;;  %v1881_v3 = vmul.f32 %v1871_v1, %v1871_v1  ;;  %v1908_v33 = vpack.c.bf16 %v1871_v1, %v1868_v0 }
  0x13   : > { %237 = vrot.lane.b32.xlu0 %v1875_v2, %s1818_s15  ;;  %v152_v8 = vsel %vm151_vm0, %v1875_v2, 0.0  ;;  %v155_v32 = vsel %vm151_vm0, %v1881_v3, 0.0 }
  0x17   : > { %239 = vrot.lane.b32.xlu0 %v1881_v3, %s1818_s15 }
  0x85   : > { %v238_v4 = vpop.permute.xlu0 %237 }
  0x86   : > { %v243_v5 = vsel %vm151_vm0, %v238_v4, 0.0 }
  0x87   : > { %244 = vadd.xlane.f32.xlu1 %v243_v5 }
  0x89   : > { %v240_v6 = vpop.permute.xlu0 %239 }
  0x8a   : > { %v246_v7 = vsel %vm151_vm0, %v240_v6, 0.0 }
  0x8b   : > { %247 = vadd.xlane.f32.xlu1 %v246_v7 }
  0x8f   : > { %153 = vadd.xlane.f32.xlu1 %v152_v8 }
  0xa0   : > { %344 = vrot.lane.b32.xlu1 %v1908_v33, %s1821_s18 }
 0x114   : > { %v245_v13 = vpop.xlane.xlu1 %244 }
 0x115   : > { %1696 = vrsqrt.f32 %v245_v13  ;;  %vm251_vm3 = vcmp.eq.f32.partialorder %v245_v13, inf  ;;  %v254_v17 = vand.u32 2147483648, %v245_v13  ;;  %vm253_vm4 = vcmp.eq.f32.partialorder %v245_v13, 0.0 }
 0x118   : > { %v248_v14 = vpop.xlane.xlu1 %247 }
 0x119   : > { %1698 = vrsqrt.f32 %v248_v14  ;;  %vm258_vm5 = vcmp.eq.f32.partialorder %v248_v14, inf  ;;  %v261_v23 = vand.u32 2147483648, %v248_v14  ;;  %vm260_vm6 = vcmp.eq.f32.partialorder %v248_v14, 0.0 }
 0x11c   : > { %v154_v35 = vpop.xlane.xlu1 %153 }
 0x11d   : > { %vm160_vm7 = vcmp.eq.f32.partialorder %v154_v35, inf  ;;  %v163_v39 = vand.u32 2147483648, %v154_v35  ;;  %vm162_vm8 = vcmp.eq.f32.partialorder %v154_v35, 0.0 }
 0x11f   : > { %v1697_v15 = vpop.eup %1696 }
 0x120   : > { %v250_v16 = vmul.f32 %v1697_v15, %v245_v13  ;;  %v345_v54 = vpop.permute.xlu1 %344 }
 0x122   : > { %v252_v18 = vsel %vm251_vm3, %v245_v13, %v250_v16 }
 0x123   : > { %v1699_v19 = vpop.eup %1698  ;;  %v255_v20 = vsel %vm253_vm4, %v254_v17, %v252_v18 }
 0x124   : > { %v263_v21 = vmax.f32 %v255_v20, 1e-12  ;;  %v257_v22 = vmul.f32 %v1699_v19, %v248_v14 }
 0x126   : > { %v259_v24 = vsel %vm258_vm5, %v248_v14, %v257_v22  ;;  %1700 = vrcp.f32 %v263_v21 }
 0x127   : > { %v262_v25 = vsel %vm260_vm6, %v261_v23, %v259_v24 }
 0x128   : > { %v264_v26 = vmax.f32 %v262_v25, 1e-12 }
 0x12a   : > { %1702 = vrcp.f32 %v264_v26 }
 0x12b   : > { %1704 = vrsqrt.f32 %v154_v35 }
 0x130   : > { %v1701_v27 = vpop.eup %1700 }
 0x131   : > { %v266_v29 = vmul.f32 %v1701_v27, %v1868_v0 }
 0x134   : > { %v1703_v28 = vpop.eup %1702 }
 0x135   : > { %v268_v30 = vmul.f32 %v1703_v28, %v1871_v1  ;;  %v1705_v36 = vpop.eup %1704 }
 0x136   : > { %v159_v38 = vmul.f32 %v1705_v36, %v154_v35 }
 0x137   : > { %v269_v31 = vpack.c.bf16 %v268_v30, %v266_v29 }
 0x138   : > { %v161_v40 = vsel %vm160_vm7, %v154_v35, %v159_v38 }
 0x139   : > { %271 = vrot.lane.b32.xlu0 %v269_v31, %s1818_s15  ;;  %v164_v41 = vsel %vm162_vm8, %v163_v39, %v161_v40  ;;  %v1512_v39 = vld [vmem:[%s2113_s1 + $0x8] sm:$0xff] }
 0x13a   : > { %v172_v42 = vmax.f32 %v164_v41, 1e-12  ;;  %v463_v40 = vpack.c.bf16 %v1512_v39, %v1512_v39 }
 0x13c   : > { %v504_v41 = vsel %vm182_vm1, %v463_v40, 0 }
 0x158   : > { %156 = vadd.xlane.f32.xlu0 %v155_v32 }
 0x16e   : > { %555 = vrot.lane.b32.xlu0 %v1875_v2, %s1822_s19 }
 0x1ab   : > { %v272_v34 = vpop.permute.xlu0 %271 }
 0x1ac   : > { %1584 = vmatmul.mubr.msk.bf16.vlgmr.msra.gmra.mrb[0].mxu1 %vm151_vm0, %v272_v34 }
 0x1ad   : > { %1595 = vmatprep.mubr.msk.bf16.mxu1 %vm1820_vm2, %v1819_v10 }
 0x1e5   : > { %v157_v37 = vpop.xlane.xlu0 %156 }
 0x1e6   : > { %1706 = vrsqrt.f32 %v157_v37  ;;  %vm167_vm9 = vcmp.eq.f32.partialorder %v157_v37, inf  ;;  %v170_v44 = vand.u32 2147483648, %v157_v37  ;;  %vm169_vm10 = vcmp.eq.f32.partialorder %v157_v37, 0.0 }
 0x1e7   : > { %1708 = vrcp.f32 %v172_v42 }
 0x1e9   : > { %v556_v55 = vpop.permute.xlu0 %555 }
 0x1ea   : > { %v561_v56 = vsel %vm151_vm0, %v556_v55, 0.0 }
 0x1eb   : > { %562 = vadd.xlane.f32.xlu0 %v561_v56 }
 0x1f0   : > { %v1707_v43 = vpop.eup %1706 }
 0x1f1   : > { %v166_v45 = vmul.f32 %v1707_v43, %v157_v37  ;;  %v1709_v49 = vpop.eup %1708 }
 0x1f2   : > { %v175_v50 = vmul.f32 %v1709_v49, %v1868_v0 }
 0x1f3   : > { %v168_v46 = vsel %vm167_vm9, %v157_v37, %v166_v45 }
 0x1f4   : > { %v171_v47 = vsel %vm169_vm10, %v170_v44, %v168_v46 }
 0x1f5   : > { %v173_v48 = vmax.f32 %v171_v47, 1e-12 }
 0x1f7   : > { %1710 = vrcp.f32 %v173_v48 }
 0x201   : > { %v1711_v51 = vpop.eup %1710 }
 0x202   : > { %v177_v52 = vmul.f32 %v1711_v51, %v1871_v1 }
 0x204   : > { %v178_v53 = vpack.c.bf16 %v177_v52, %v175_v50 }
 0x206   : > { %1578 = vmatmul.mubr.msk.bf16.vlgmr.msra.gmra.mrb[0].mxu0 %vm151_vm0, %v178_v53 }
 0x207   : > { %1589 = vmatprep.mubr.msk.bf16.mxu0 %vm1820_vm2, %v1819_v10  ;;  %1588 = vmatpush3.bf16.msra.mxu0 %v345_v54 }
 0x208   : > { %1599 = vmatprep.subr.bf16.mxu0 %v1819_v10 }
 0x278   : > { %v563_v42 = vpop.xlane.xlu0 %562 }
 0x279   : > { %vm569_vm12 = vcmp.eq.f32.partialorder %v563_v42, inf  ;;  %v572_v46 = vand.u32 2147483648, %v563_v42  ;;  %vm571_vm13 = vcmp.eq.f32.partialorder %v563_v42, 0.0 }
 0x27f   : > { %v310_v57 = vpop.f32.mrb[0].mxu1 }
 0x280   : > { %v1508_v58 = vadd.f32 -0.5, %v310_v57  ;;  %v1585_v59 = vpop.f32.mrb[1].mxu1 }
 0x281   : > { %v313_v60 = vpop.f32.mrb[2].mxu1 }
 0x282   : > { %v319_v61 = vmul.f32 1.442695, %v1508_v58  ;;  %v1509_v62 = vadd.f32 -0.5, %v313_v60  ;;  %v1586_v63 = vpop.f32.mrb[3].mxu1 }
 0x284   : > { %1712 = vpow2.f32 %v319_v61  ;;  %v321_v4 = vmul.f32 1.442695, %v1509_v62 }
 0x286   : > { %1714 = vpow2.f32 %v321_v4 }
 0x28e   : > { %v1713_v5 = vpop.eup %1712 }
 0x28f   : > { %v323_v6 = vmul.f32 0.25, %v1713_v5 }
 0x290   : > { %v1715_v7 = vpop.eup %1714 }
 0x291   : > { %v324_v8 = vmul.f32 0.25, %v1715_v7  ;;  %v392_v11 = vsel %vm347_vm11, %v323_v6, 0.0 }
 0x293   : > { %v325_v9 = vpack.c.bf16 %v324_v8, %v323_v6  ;;  %v393_v12 = vsel %vm347_vm11, %v324_v8, 0.0 }
 0x294   : > { %v394_v13 = vadd.f32 %v393_v12, %v392_v11 }
 0x295   : > { %327 = vxpose.xlu1.c.b16.start.end [1/1] (short) (narrow) %v325_v9, 16 }
 0x296   : > { %v395_v14 = vrot.slane %v394_v13, 4 }
 0x298   : > { %v396_v16 = vadd.f32 %v395_v14, %v394_v13 }
 0x299   : > { %557 = vrot.lane.b32.xlu1 %v1881_v3, %s1822_s19 }
 0x29a   : > { %v397_v23 = vrot.slane %v396_v16, 2 }
 0x29c   : > { %v398_v25 = vadd.f32 %v397_v23, %v396_v16 }
 0x29e   : > { %v399_v26 = vrot.slane %v398_v25, 1 }
 0x2a0   : > { %v400_v29 = vadd.f32 %v399_v26, %v398_v25 }
 0x2d9   : > { %v220_v15 = vpop.f32.mrb[0].mxu0 }
 0x2da   : > { %v1505_v17 = vadd.f32 -0.5, %v220_v15  ;;  %v1579_v18 = vpop.f32.mrb[1].mxu0 }
 0x2db   : > { %v223_v19 = vpop.f32.mrb[2].mxu0 }
 0x2dc   : > { %v229_v20 = vmul.f32 1.442695, %v1505_v17  ;;  %v1506_v21 = vadd.f32 -0.5, %v223_v19  ;;  %v1580_v22 = vpop.f32.mrb[3].mxu0 }
 0x2de   : > { %1716 = vpow2.f32 %v229_v20  ;;  %v231_v24 = vmul.f32 1.442695, %v1506_v21 }
 0x2e0   : > { %1718 = vpow2.f32 %v231_v24 }
 0x2e1   : > { %1720 = vrsqrt.f32 %v563_v42 }
 0x2e8   : > { %v1717_v27 = vpop.eup %1716 }
 0x2e9   : > { %v233_v28 = vmul.f32 0.25, %v1717_v27 }
 0x2ea   : > { %v1719_v30 = vpop.eup %1718 }
 0x2eb   : > { %v234_v31 = vmul.f32 0.25, %v1719_v30  ;;  %v1927_v32 = vmul.f32 %v400_v29, %v233_v28  ;;  %v1721_v43 = vpop.eup %1720 }
 0x2ec   : > { %v568_v45 = vmul.f32 %v1721_v43, %v563_v42 }
 0x2ed   : > { %v401_v34 = vpack.c.bf16 %v234_v31, %v233_v28  ;;  %v1929_v35 = vmul.f32 %v400_v29, %v234_v31 }
 0x2ee   : > { %v570_v48 = vsel %vm569_vm12, %v563_v42, %v568_v45 }
 0x2ef   : > { %v573_v50 = vsel %vm571_vm13, %v572_v46, %v570_v48 }
 0x2f0   : > { %v581_v52 = vmax.f32 %v573_v50, 1e-12 }
 0x2fb   : > { %v335_v36 = vpop.trf.xlu1 }
 0x2fc   : > { %1590 = vmatmul.mubr.msk.bf16.vlgmr.msra.gmra.mrb[4].mxu0 %vm347_vm11, %v335_v36 }
 0x2fd   : > { %1601 = vmatprep.mubr.msk.bf16.mxu0 %vm1820_vm2, %v1819_v10  ;;  %1600 = vmatpush3.bf16.msra.mxu0 %v504_v41 }
 0x2fe   : > { %1611 = vmatprep.subr.bf16.mxu0 %v1819_v10 }
 0x30b   : > { %v558_v37 = vpop.permute.xlu1 %557 }
 0x30c   : > { %v564_v38 = vsel %vm151_vm0, %v558_v37, 0.0 }
 0x30d   : > { %565 = vadd.xlane.f32.xlu1 %v564_v38 }
 0x31e   : > { %464 = vrot.lane.b32.xlu1 %v1875_v2, %s1823_s20 }
 0x39a   : > { %v566_v44 = vpop.xlane.xlu1 %565 }
 0x39b   : > { %1722 = vrsqrt.f32 %v566_v44  ;;  %vm576_vm14 = vcmp.eq.f32.partialorder %v566_v44, inf  ;;  %v579_v54 = vand.u32 2147483648, %v566_v44  ;;  %vm578_vm15 = vcmp.eq.f32.partialorder %v566_v44, 0.0 }
 0x39c   : > { %1724 = vrcp.f32 %v581_v52 }
 0x39e   : > { %v465_v47 = vpop.permute.xlu1 %464 }
 0x39f   : > { %v470_v49 = vsel %vm151_vm0, %v465_v47, 0.0 }
 0x3a0   : > { %471 = vadd.xlane.f32.xlu1 %v470_v49 }
 0x3a5   : > { %v1723_v51 = vpop.eup %1722 }
 0x3a6   : > { %v575_v53 = vmul.f32 %v1723_v51, %v566_v44  ;;  %v1725_v58 = vpop.eup %1724 }
 0x3a7   : > { %v584_v60 = vmul.f32 %v1725_v58, %v1868_v0 }
 0x3a8   : > { %v577_v55 = vsel %vm576_vm14, %v566_v44, %v575_v53 }
 0x3a9   : > { %v580_v56 = vsel %vm578_vm15, %v579_v54, %v577_v55 }
 0x3aa   : > { %v582_v57 = vmax.f32 %v580_v56, 1e-12 }
 0x3ac   : > { %1726 = vrcp.f32 %v582_v57 }
 0x3b1   : > { %660 = vrot.lane.b32.xlu1 %v1908_v33, %s1824_s23 }
 0x3b6   : > { %v1727_v59 = vpop.eup %1726 }
 0x3b7   : > { %v586_v61 = vmul.f32 %v1727_v59, %v1871_v1 }
 0x3b9   : > { %v587_v62 = vpack.c.bf16 %v586_v61, %v584_v60  ;;  %v1521_v61 = vld [vmem:[%s2113_s1 + $0x10] sm:$0xff] }
 0x3bb   : > { %589 = vrot.lane.b32.xlu0 %v587_v62, %s1822_s19  ;;  %v778_v62 = vpack.c.bf16 %v1521_v61, %v1521_v61 }
 0x3bf   : > { %466 = vrot.lane.b32.xlu0 %v1881_v3, %s1823_s20 }
 0x3cf   : > { %v385_v63 = vpop.f32.mrb[4].mxu0 }
 0x3d0   : > { %v1591_v4 = vpop.f32.mrb[5].mxu0 }
 0x3d1   : > { %v388_v5 = vpop.f32.mrb[6].mxu0 }
 0x3d2   : > { %v402_v6 = vpack.c.bf16 %v388_v5, %v385_v63  ;;  %v1592_v7 = vpop.f32.mrb[7].mxu0  ;;  %v1986_v63 = vsel %vm182_vm1, %v778_v62, 0 }
 0x3d4   : > { %1594 = vmatpush3.bf16.msra.mxu1 %v402_v6 }
 0x3d5   : > { %1605 = vmatprep.subr.bf16.mxu1 %v1819_v10 }
 0x3d7   : > { %1596 = vmatmul.mubr.msk.bf16.vlgmr.msra.gmra.mrb[4].mxu1 %vm347_vm11, %v401_v34 }
 0x3d8   : > { %1606 = vmatpush3.bf16.msra.mxu1 %v504_v41  ;;  %1607 = vmatprep.mubr.msk.bf16.mxu1 %vm1820_vm2, %v1819_v10 }
 0x3d9   : > { %1617 = vmatprep.subr.bf16.mxu1 %v1819_v10 }
 0x42d   : > { %v590_v8 = vpop.permute.xlu0 %589  ;;  %v472_v16 = vpop.xlane.xlu1 %471 }
 0x42e   : > { %1608 = vmatmul.mubr.msk.bf16.vlgmr.msra.gmra.mrb[8].mxu1 %vm151_vm0, %v590_v8  ;;  %1728 = vrsqrt.f32 %v472_v16  ;;  %vm478_vm3 = vcmp.eq.f32.partialorder %v472_v16, inf  ;;  %v481_v20 = vand.u32 2147483648, %v472_v16  ;;  %vm480_vm4 = vcmp.eq.f32.partialorder %v472_v16, 0.0 }
 0x42f   : > { %1619 = vmatprep.mubr.msk.bf16.mxu1 %vm1820_vm2, %v1819_v10 }
 0x431   : > { %v467_v9 = vpop.permute.xlu0 %466  ;;  %v661_v54 = vpop.permute.xlu1 %660 }
 0x432   : > { %v473_v11 = vsel %vm151_vm0, %v467_v9, 0.0 }
 0x433   : > { %474 = vadd.xlane.f32.xlu0 %v473_v11 }
 0x438   : > { %v1729_v17 = vpop.eup %1728 }
 0x439   : > { %v477_v19 = vmul.f32 %v1729_v17, %v472_v16 }
 0x43b   : > { %v479_v21 = vsel %vm478_vm3, %v472_v16, %v477_v19 }
 0x43c   : > { %v482_v22 = vsel %vm480_vm4, %v481_v20, %v479_v21 }
 0x43d   : > { %v490_v24 = vmax.f32 %v482_v22, 1e-12 }
 0x4aa   : > { %v1958_v12 = vpop.f32.mrb[4].mxu1 }
 0x4ab   : > { %v1597_v13 = vpop.f32.mrb[5].mxu1 }
 0x4ac   : > { %v1960_v14 = vpop.f32.mrb[6].mxu1 }
 0x4ad   : > { %v1598_v15 = vpop.f32.mrb[7].mxu1 }
 0x4c0   : > { %v475_v18 = vpop.xlane.xlu0 %474 }
 0x4c1   : > { %1730 = vrsqrt.f32 %v475_v18  ;;  %vm485_vm5 = vcmp.eq.f32.partialorder %v475_v18, inf  ;;  %v488_v26 = vand.u32 2147483648, %v475_v18  ;;  %vm487_vm6 = vcmp.eq.f32.partialorder %v475_v18, 0.0 }
 0x4c2   : > { %1732 = vrcp.f32 %v490_v24 }
 0x4cb   : > { %v1731_v23 = vpop.eup %1730 }
 0x4cc   : > { %v484_v25 = vmul.f32 %v1731_v23, %v475_v18  ;;  %v1733_v30 = vpop.eup %1732 }
 0x4cd   : > { %v493_v34 = vmul.f32 %v1733_v30, %v1868_v0 }
 0x4ce   : > { %v486_v27 = vsel %vm485_vm5, %v475_v18, %v484_v25 }
 0x4cf   : > { %v489_v28 = vsel %vm487_vm6, %v488_v26, %v486_v27 }
 0x4d0   : > { %v491_v29 = vmax.f32 %v489_v28, 1e-12 }
 0x4d2   : > { %1734 = vrcp.f32 %v491_v29 }
 0x4dc   : > { %v1735_v31 = vpop.eup %1734 }
 0x4dd   : > { %v495_v36 = vmul.f32 %v1735_v31, %v1871_v1 }
 0x4df   : > { %v496_v37 = vpack.c.bf16 %v495_v36, %v493_v34 }
 0x4e1   : > { %498 = vrot.lane.b32.xlu0 %v496_v37, %s1823_s20 }
 0x4e5   : > { %870 = vrot.lane.b32.xlu0 %v1875_v2, %s1825_s24 }
 0x4e9   : > { %872 = vrot.lane.b32.xlu0 %v1881_v3, %s1825_s24 }
 0x501   : > { %v628_v38 = vpop.f32.mrb[8].mxu1 }
 0x502   : > { %v1517_v39 = vadd.f32 -0.5, %v628_v38  ;;  %v1609_v40 = vpop.f32.mrb[9].mxu1 }
 0x503   : > { %v631_v41 = vpop.f32.mrb[10].mxu1 }
 0x504   : > { %v637_v42 = vmul.f32 1.442695, %v1517_v39  ;;  %v1518_v43 = vadd.f32 -0.5, %v631_v41  ;;  %v1610_v44 = vpop.f32.mrb[11].mxu1 }
 0x506   : > { %1736 = vpow2.f32 %v637_v42  ;;  %v639_v45 = vmul.f32 1.442695, %v1518_v43 }
 0x508   : > { %1738 = vpow2.f32 %v639_v45 }
 0x510   : > { %v1737_v46 = vpop.eup %1736 }
 0x511   : > { %v641_v47 = vmul.f32 0.25, %v1737_v46 }
 0x512   : > { %v1739_v48 = vpop.eup %1738 }
 0x513   : > { %v642_v49 = vmul.f32 0.25, %v1739_v48  ;;  %v707_v50 = vsel %vm347_vm11, %v641_v47, 0.0 }
 0x515   : > { %v708_v51 = vsel %vm347_vm11, %v642_v49, 0.0  ;;  %v643_v52 = vpack.c.bf16 %v642_v49, %v641_v47 }
 0x516   : > { %v709_v53 = vadd.f32 %v708_v51, %v707_v50 }
 0x517   : > { %644 = vxpose.xlu1.c.b16.start.end [1/1] (short) (narrow) %v643_v52, 16 }
 0x518   : > { %v710_v28 = vrot.slane %v709_v53, 4 }
 0x51a   : > { %v711_v30 = vadd.f32 %v710_v28, %v709_v53 }
 0x51c   : > { %v712_v40 = vrot.slane %v711_v30, 2 }
 0x51e   : > { %v713_v42 = vadd.f32 %v712_v40, %v711_v30 }
 0x520   : > { %v714_v43 = vrot.slane %v713_v42, 1 }
 0x522   : > { %v715_v46 = vadd.f32 %v714_v43, %v713_v42 }
 0x553   : > { %v499_v55 = vpop.permute.xlu0 %498 }
 0x554   : > { %1602 = vmatmul.mubr.msk.bf16.vlgmr.msra.gmra.mrb[8].mxu0 %vm151_vm0, %v499_v55 }
 0x555   : > { %1612 = vmatpush3.bf16.msra.mxu0 %v661_v54  ;;  %1613 = vmatprep.mubr.msk.bf16.mxu0 %vm1820_vm2, %v1819_v10 }
 0x556   : > { %1623 = vmatprep.subr.bf16.mxu0 %v1819_v10 }
 0x557   : > { %v871_v56 = vpop.permute.xlu0 %870 }
 0x558   : > { %v876_v57 = vsel %vm151_vm0, %v871_v56, 0.0 }
 0x559   : > { %877 = vadd.xlane.f32.xlu0 %v876_v57 }
 0x55b   : > { %v873_v58 = vpop.permute.xlu0 %872 }
 0x55c   : > { %v879_v59 = vsel %vm151_vm0, %v873_v58, 0.0 }
 0x55d   : > { %880 = vadd.xlane.f32.xlu1 %v879_v59 }
 0x56e   : > { %779 = vrot.lane.b32.xlu1 %v1875_v2, %s1826_s25 }
 0x57d   : > { %v652_v60 = vpop.trf.xlu1 }
 0x57e   : > { %1614 = vmatmul.mubr.msk.bf16.vlgmr.msra.gmra.mrb[12].mxu0 %vm347_vm11, %v652_v60 }
 0x57f   : > { %1625 = vmatprep.mubr.msk.bf16.mxu0 %vm1820_vm2, %v1819_v10  ;;  %1624 = vmatpush3.bf16.msra.mxu0 %v1986_v63 }
 0x580   : > { %1635 = vmatprep.subr.bf16.mxu0 %v1819_v10 }
 0x5e6   : > { %v878_v4 = vpop.xlane.xlu0 %877 }
 0x5e7   : > { %1740 = vrsqrt.f32 %v878_v4  ;;  %vm884_vm7 = vcmp.eq.f32.partialorder %v878_v4, inf  ;;  %v887_v11 = vand.u32 2147483648, %v878_v4  ;;  %vm886_vm8 = vcmp.eq.f32.partialorder %v878_v4, 0.0 }
 0x5ea   : > { %v881_v5 = vpop.xlane.xlu1 %880 }
 0x5eb   : > { %1742 = vrsqrt.f32 %v881_v5  ;;  %vm891_vm9 = vcmp.eq.f32.partialorder %v881_v5, inf  ;;  %v894_v19 = vand.u32 2147483648, %v881_v5  ;;  %vm893_vm10 = vcmp.eq.f32.partialorder %v881_v5, 0.0 }
 0x5ee   : > { %v780_v6 = vpop.permute.xlu1 %779 }
 0x5ef   : > { %v785_v7 = vsel %vm151_vm0, %v780_v6, 0.0 }
 0x5f0   : > { %786 = vadd.xlane.f32.xlu1 %v785_v7 }
 0x5f1   : > { %v1741_v8 = vpop.eup %1740 }
 0x5f2   : > { %v883_v9 = vmul.f32 %v1741_v8, %v878_v4 }
 0x5f4   : > { %v885_v13 = vsel %vm884_vm7, %v878_v4, %v883_v9 }
 0x5f5   : > { %v1743_v15 = vpop.eup %1742  ;;  %v888_v16 = vsel %vm886_vm8, %v887_v11, %v885_v13 }
 0x5f6   : > { %v896_v17 = vmax.f32 %v888_v16, 1e-12  ;;  %v890_v18 = vmul.f32 %v1743_v15, %v881_v5 }
 0x5f8   : > { %v892_v20 = vsel %vm891_vm9, %v881_v5, %v890_v18  ;;  %1744 = vrcp.f32 %v896_v17 }
 0x5f9   : > { %v895_v21 = vsel %vm893_vm10, %v894_v19, %v892_v20  ;;  %vm1437_vm10 = vcmask 261120  }
 0x5fa   : > { %v897_v22 = vmax.f32 %v895_v21, 1e-12 }
 0x5fc   : > { %1746 = vrcp.f32 %v897_v22 }
 0x601   : > { %975 = vrot.lane.b32.xlu1 %v1908_v33, %s1827_s28 }
 0x602   : > { %v1745_v23 = vpop.eup %1744 }
 0x603   : > { %v899_v25 = vmul.f32 %v1745_v23, %v1868_v0 }
 0x606   : > { %v1747_v24 = vpop.eup %1746 }
 0x607   : > { %v901_v26 = vmul.f32 %v1747_v24, %v1871_v1 }
 0x609   : > { %v902_v27 = vpack.c.bf16 %v901_v26, %v899_v25 }
 0x60b   : > { %904 = vrot.lane.b32.xlu0 %v902_v27, %s1825_s24 }
 0x60f   : > { %781 = vrot.lane.b32.xlu0 %v1881_v3, %s1826_s25 }
 0x627   : > { %v540_v29 = vpop.f32.mrb[8].mxu0 }
 0x628   : > { %v1514_v31 = vadd.f32 -0.5, %v540_v29  ;;  %v1603_v34 = vpop.f32.mrb[9].mxu0 }
 0x629   : > { %v543_v36 = vpop.f32.mrb[10].mxu0 }
 0x62a   : > { %v549_v37 = vmul.f32 1.442695, %v1514_v31  ;;  %v1515_v38 = vadd.f32 -0.5, %v543_v36  ;;  %v1604_v39 = vpop.f32.mrb[11].mxu0 }
 0x62c   : > { %1748 = vpow2.f32 %v549_v37  ;;  %v551_v41 = vmul.f32 1.442695, %v1515_v38 }
 0x62e   : > { %1750 = vpow2.f32 %v551_v41 }
 0x636   : > { %v1749_v44 = vpop.eup %1748 }
 0x637   : > { %v553_v45 = vmul.f32 0.25, %v1749_v44 }
 0x638   : > { %v1751_v47 = vpop.eup %1750 }
 0x639   : > { %v554_v48 = vmul.f32 0.25, %v1751_v47  ;;  %v1996_v49 = vmul.f32 %v715_v46, %v553_v45 }
 0x63b   : > { %v716_v50 = vpack.c.bf16 %v554_v48, %v553_v45  ;;  %v1998_v51 = vmul.f32 %v715_v46, %v554_v48 }
 0x651   : > { %v700_v52 = vpop.f32.mrb[12].mxu0 }
 0x652   : > { %v1615_v53 = vpop.f32.mrb[13].mxu0 }
 0x653   : > { %v703_v54 = vpop.f32.mrb[14].mxu0 }
 0x654   : > { %v717_v55 = vpack.c.bf16 %v703_v54, %v700_v52  ;;  %v1616_v56 = vpop.f32.mrb[15].mxu0  ;;  %v1530_v54 = vld [vmem:[%s2113_s1 + $0x18] sm:$0xff] }
 0x656   : > { %1618 = vmatpush3.bf16.msra.mxu1 %v717_v55  ;;  %v1093_v55 = vpack.c.bf16 %v1530_v54, %v1530_v54 }
 0x657   : > { %1629 = vmatprep.subr.bf16.mxu1 %v1819_v10 }
 0x658   : > { %v2039_v56 = vsel %vm182_vm1, %v1093_v55, 0 }
 0x659   : > { %1620 = vmatmul.mubr.msk.bf16.vlgmr.msra.gmra.mrb[12].mxu1 %vm347_vm11, %v716_v50 }
 0x65a   : > { %1630 = vmatpush3.bf16.msra.mxu1 %v1986_v63  ;;  %1631 = vmatprep.mubr.msk.bf16.mxu1 %vm1820_vm2, %v1819_v10 }
 0x65b   : > { %1641 = vmatprep.subr.bf16.mxu1 %v1819_v10 }
 0x67d   : > { %v905_v57 = vpop.permute.xlu0 %904  ;;  %v787_v60 = vpop.xlane.xlu1 %786 }
 0x67e   : > { %1632 = vmatmul.mubr.msk.bf16.vlgmr.msra.gmra.mrb[16].mxu1 %vm151_vm0, %v905_v57  ;;  %1752 = vrsqrt.f32 %v787_v60  ;;  %vm793_vm12 = vcmp.eq.f32.partialorder %v787_v60, inf  ;;  %v796_v4 = vand.u32 2147483648, %v787_v60  ;;  %vm795_vm13 = vcmp.eq.f32.partialorder %v787_v60, 0.0 }
 0x67f   : > { %1643 = vmatprep.mubr.msk.bf16.mxu1 %vm1820_vm2, %v1819_v10 }
 0x681   : > { %v782_v58 = vpop.permute.xlu0 %781  ;;  %v976_v45 = vpop.permute.xlu1 %975 }
 0x682   : > { %v788_v59 = vsel %vm151_vm0, %v782_v58, 0.0 }
 0x683   : > { %789 = vadd.xlane.f32.xlu0 %v788_v59 }
 0x688   : > { %v1753_v61 = vpop.eup %1752 }
 0x689   : > { %v792_v63 = vmul.f32 %v1753_v61, %v787_v60 }
 0x68b   : > { %v794_v5 = vsel %vm793_vm12, %v787_v60, %v792_v63 }
 0x68c   : > { %v797_v6 = vsel %vm795_vm13, %v796_v4, %v794_v5 }
 0x68d   : > { %v805_v8 = vmax.f32 %v797_v6, 1e-12 }
 0x710   : > { %v790_v62 = vpop.xlane.xlu0 %789 }
 0x711   : > { %1754 = vrsqrt.f32 %v790_v62  ;;  %vm800_vm14 = vcmp.eq.f32.partialorder %v790_v62, inf  ;;  %v803_v11 = vand.u32 2147483648, %v790_v62  ;;  %vm802_vm15 = vcmp.eq.f32.partialorder %v790_v62, 0.0 }
 0x712   : > { %1756 = vrcp.f32 %v805_v8 }
 0x71b   : > { %v1755_v7 = vpop.eup %1754 }
 0x71c   : > { %v799_v9 = vmul.f32 %v1755_v7, %v790_v62  ;;  %v1757_v17 = vpop.eup %1756 }
 0x71d   : > { %v808_v21 = vmul.f32 %v1757_v17, %v1868_v0 }
 0x71e   : > { %v801_v13 = vsel %vm800_vm14, %v790_v62, %v799_v9 }
 0x71f   : > { %v804_v15 = vsel %vm802_vm15, %v803_v11, %v801_v13 }
 0x720   : > { %v806_v16 = vmax.f32 %v804_v15, 1e-12 }
 0x722   : > { %1758 = vrcp.f32 %v806_v16 }
 0x72c   : > { %v1759_v18 = vpop.eup %1758  ;;  %v2011_v19 = vpop.f32.mrb[12].mxu1 }
 0x72d   : > { %v1621_v20 = vpop.f32.mrb[13].mxu1  ;;  %v810_v22 = vmul.f32 %v1759_v18, %v1871_v1 }
 0x72e   : > { %v2015_v23 = vpop.f32.mrb[14].mxu1 }
 0x72f   : > { %v1622_v24 = vpop.f32.mrb[15].mxu1  ;;  %v811_v25 = vpack.c.bf16 %v810_v22, %v808_v21 }
 0x731   : > { %813 = vrot.lane.b32.xlu0 %v811_v25, %s1826_s25 }
 0x735   : > { %1185 = vrot.lane.b32.xlu0 %v1875_v2, %s1828_s29 }
 0x739   : > { %1187 = vrot.lane.b32.xlu0 %v1881_v3, %s1828_s29 }
 0x751   : > { %v943_v26 = vpop.f32.mrb[16].mxu1 }
 0x752   : > { %v1526_v27 = vadd.f32 -0.5, %v943_v26  ;;  %v1633_v28 = vpop.f32.mrb[17].mxu1 }
 0x753   : > { %v946_v29 = vpop.f32.mrb[18].mxu1 }
 0x754   : > { %v952_v30 = vmul.f32 1.442695, %v1526_v27  ;;  %v1527_v31 = vadd.f32 -0.5, %v946_v29  ;;  %v1634_v34 = vpop.f32.mrb[19].mxu1 }
 0x756   : > { %1760 = vpow2.f32 %v952_v30  ;;  %v954_v36 = vmul.f32 1.442695, %v1527_v31 }
 0x758   : > { %1762 = vpow2.f32 %v954_v36 }
 0x760   : > { %v1761_v37 = vpop.eup %1760 }
 0x761   : > { %v956_v38 = vmul.f32 0.25, %v1761_v37 }
 0x762   : > { %v1763_v39 = vpop.eup %1762 }
 0x763   : > { %v957_v40 = vmul.f32 0.25, %v1763_v39  ;;  %v1022_v41 = vsel %vm347_vm11, %v956_v38, 0.0 }
 0x765   : > { %v1023_v42 = vsel %vm347_vm11, %v957_v40, 0.0  ;;  %v958_v43 = vpack.c.bf16 %v957_v40, %v956_v38 }
 0x766   : > { %v1024_v44 = vadd.f32 %v1023_v42, %v1022_v41 }
 0x767   : > { %959 = vxpose.xlu1.c.b16.start.end [1/1] (short) (narrow) %v958_v43, 16 }
 0x768   : > { %v1025_v21 = vrot.slane %v1024_v44, 4 }
 0x76a   : > { %v1026_v24 = vadd.f32 %v1025_v21, %v1024_v44 }
 0x76c   : > { %v1027_v31 = vrot.slane %v1026_v24, 2 }
 0x7a3   : > { %v814_v46 = vpop.permute.xlu0 %813 }
 0x7a4   : > { %1626 = vmatmul.mubr.msk.bf16.vlgmr.msra.gmra.mrb[16].mxu0 %vm151_vm0, %v814_v46 }
 0x7a5   : > { %1636 = vmatpush3.bf16.msra.mxu0 %v976_v45  ;;  %1637 = vmatprep.mubr.msk.bf16.mxu0 %vm1820_vm2, %v1819_v10 }
 0x7a6   : > { %1647 = vmatprep.subr.bf16.mxu0 %v1819_v10 }
 0x7a7   : > { %v1186_v47 = vpop.permute.xlu0 %1185 }
 0x7a8   : > { %v1191_v48 = vsel %vm151_vm0, %v1186_v47, 0.0 }
 0x7a9   : > { %1192 = vadd.xlane.f32.xlu0 %v1191_v48 }
 0x7ab   : > { %v1188_v50 = vpop.permute.xlu0 %1187 }
 0x7ac   : > { %v1194_v52 = vsel %vm151_vm0, %v1188_v50, 0.0 }
 0x7ad   : > { %1195 = vadd.xlane.f32.xlu1 %v1194_v52 }
 0x7be   : > { %1094 = vrot.lane.b32.xlu1 %v1875_v2, %s1829_s30 }
 0x7cd   : > { %v967_v53 = vpop.trf.xlu1 }
 0x7ce   : > { %1638 = vmatmul.mubr.msk.bf16.vlgmr.msra.gmra.mrb[20].mxu0 %vm347_vm11, %v967_v53 }
 0x7cf   : > { %1649 = vmatprep.mubr.msk.bf16.mxu0 %vm1820_vm2, %v1819_v10  ;;  %1648 = vmatpush3.bf16.msra.mxu0 %v2039_v56 }
 0x7d0   : > { %1659 = vmatprep.subr.bf16.mxu0 %v1819_v10 }
 0x836   : > { %v1193_v57 = vpop.xlane.xlu0 %1192 }
 0x837   : > { %1764 = vrsqrt.f32 %v1193_v57  ;;  %vm1199_vm3 = vcmp.eq.f32.partialorder %v1193_v57, inf  ;;  %v1202_v2 = vand.u32 2147483648, %v1193_v57  ;;  %vm1201_vm4 = vcmp.eq.f32.partialorder %v1193_v57, 0.0 }
 0x83a   : > { %v1196_v58 = vpop.xlane.xlu1 %1195 }
 0x83b   : > { %1766 = vrsqrt.f32 %v1196_v58  ;;  %vm1206_vm1 = vcmp.eq.f32.partialorder %v1196_v58, inf  ;;  %v1209_v6 = vand.u32 2147483648, %v1196_v58  ;;  %vm1208_vm5 = vcmp.eq.f32.partialorder %v1196_v58, 0.0 }
 0x83e   : > { %v1095_v11 = vpop.permute.xlu1 %1094 }
 0x83f   : > { %v1100_v13 = vsel %vm151_vm0, %v1095_v11, 0.0 }
 0x840   : > { %1101 = vadd.xlane.f32.xlu1 %v1100_v13  ;;  %v1809_v13 = vld [vmem:[%s1865_s14 + $0x8] sm:$0xff] }
 0x841   : > { %v1765_v59 = vpop.eup %1764 }
 0x842   : > { %v1198_v60 = vmul.f32 %v1765_v59, %v1193_v57 }
 0x844   : > { %v1200_v61 = vsel %vm1199_vm3, %v1193_v57, %v1198_v60 }
 0x845   : > { %v1767_v62 = vpop.eup %1766  ;;  %v1203_v63 = vsel %vm1201_vm4, %v1202_v2, %v1200_v61 }
 0x846   : > { %v1211_v4 = vmax.f32 %v1203_v63, 1e-12  ;;  %v1205_v5 = vmul.f32 %v1767_v62, %v1196_v58 }
 0x848   : > { %v1207_v7 = vsel %vm1206_vm1, %v1196_v58, %v1205_v5  ;;  %1768 = vrcp.f32 %v1211_v4 }
 0x849   : > { %v1210_v8 = vsel %vm1208_vm5, %v1209_v6, %v1207_v7  ;;  %v1808_v6 = vld [vmem:[%s1865_s14] sm:$0xff]  ;;  %s143_s14 = scalar_lea.vmem %s2114_s2, %s1541_s11 }
 0x84a   : > { %v1212_v9 = vmax.f32 %v1210_v8, 1e-12 }
 0x84c   : > { %1770 = vrcp.f32 %v1212_v9 }
 0x851   : > { %1290 = vrot.lane.b32.xlu1 %v1908_v33, %s1830_s5 }
 0x852   : > { %v1769_v15 = vpop.eup %1768 }
 0x853   : > { %v1214_v17 = vmul.f32 %v1769_v15, %v1868_v0 }
 0x856   : > { %v1771_v16 = vpop.eup %1770 }
 0x857   : > { %v1216_v18 = vmul.f32 %v1771_v16, %v1871_v1  ;;  %v1028_v1 = vadd.f32 %v1027_v31, %v1026_v24 }
 0x859   : > { %v1217_v20 = vpack.c.bf16 %v1216_v18, %v1214_v17  ;;  %v1029_v34 = vrot.slane %v1028_v1, 1 }
 0x85b   : > { %1219 = vrot.lane.b32.xlu0 %v1217_v20, %s1828_s29  ;;  %v1030_v38 = vadd.f32 %v1029_v34, %v1028_v1  ;;  %v764_v20 = vsel %vm347_vm11, %v1996_v49, 0.0 }
 0x85f   : > { %1096 = vrot.lane.b32.xlu0 %v1881_v3, %s1829_s30 }
 0x877   : > { %v855_v22 = vpop.f32.mrb[16].mxu0 }
 0x878   : > { %v1523_v25 = vadd.f32 -0.5, %v855_v22  ;;  %v1627_v26 = vpop.f32.mrb[17].mxu0 }
 0x879   : > { %v858_v27 = vpop.f32.mrb[18].mxu0  ;;  %v767_v26 = vsel %vm347_vm11, %v1998_v51, 0.0 }
 0x87a   : > { %v864_v28 = vmul.f32 1.442695, %v1523_v25  ;;  %v1524_v29 = vadd.f32 -0.5, %v858_v27  ;;  %v1628_v30 = vpop.f32.mrb[19].mxu0 }
 0x87c   : > { %1772 = vpow2.f32 %v864_v28  ;;  %v866_v0 = vmul.f32 1.442695, %v1524_v29 }
 0x87e   : > { %1774 = vpow2.f32 %v866_v0 }
 0x886   : > { %v1773_v36 = vpop.eup %1772 }
 0x887   : > { %v868_v37 = vmul.f32 0.25, %v1773_v36 }
 0x888   : > { %v1775_v39 = vpop.eup %1774 }
 0x889   : > { %v869_v3 = vmul.f32 0.25, %v1775_v39  ;;  %v2049_v40 = vmul.f32 %v1030_v38, %v868_v37 }
 0x88b   : > { %v1031_v41 = vpack.c.bf16 %v869_v3, %v868_v37  ;;  %v2051_v42 = vmul.f32 %v1030_v38, %v869_v3  ;;  %v1079_v39 = vsel %vm347_vm11, %v2049_v40, 0.0  ;;  %v452_v3 = vsel %vm347_vm11, %v1929_v35, 0.0 }
 0x88d   : > { %v1082_v31 = vsel %vm347_vm11, %v2051_v42, 0.0 }
 0x8a1   : > { %v1015_v43 = vpop.f32.mrb[20].mxu0 }
 0x8a2   : > { %v1639_v44 = vpop.f32.mrb[21].mxu0 }
 0x8a3   : > { %v1018_v45 = vpop.f32.mrb[22].mxu0 }
 0x8a4   : > { %v1032_v46 = vpack.c.bf16 %v1018_v45, %v1015_v43  ;;  %v1640_v47 = vpop.f32.mrb[23].mxu0 }
 0x8a6   : > { %1642 = vmatpush3.bf16.msra.mxu1 %v1032_v46 }
 0x8a7   : > { %1653 = vmatprep.subr.bf16.mxu1 %v1819_v10 }
 0x8a9   : > { %1644 = vmatmul.mubr.msk.bf16.vlgmr.msra.gmra.mrb[20].mxu1 %vm347_vm11, %v1031_v41 }
 0x8aa   : > { %1654 = vmatpush3.bf16.msra.mxu1 %v2039_v56  ;;  %1655 = vmatprep.mubr.msk.bf16.mxu1 %vm1820_vm2, %v1819_v10 }
 0x8ab   : > { %1665 = vmatprep.subr.bf16.mxu1 %v1819_v10 }
 0x8cd   : > { %v1220_v48 = vpop.permute.xlu0 %1219  ;;  %v1102_v53 = vpop.xlane.xlu1 %1101 }
 0x8ce   : > { %1656 = vmatmul.mubr.msk.bf16.vlgmr.msra.gmra.mrb[24].mxu1 %vm151_vm0, %v1220_v48  ;;  %1776 = vrsqrt.f32 %v1102_v53  ;;  %vm1108_vm6 = vcmp.eq.f32.partialorder %v1102_v53, inf  ;;  %v1111_v57 = vand.u32 2147483648, %v1102_v53  ;;  %vm1110_vm7 = vcmp.eq.f32.partialorder %v1102_v53, 0.0 }
 0x8cf   : > { %1667 = vmatprep.mubr.msk.bf16.mxu1 %vm1820_vm2, %v1819_v10 }
 0x8d1   : > { %v1097_v50 = vpop.permute.xlu0 %1096  ;;  %v1291_v41 = vpop.permute.xlu1 %1290 }
 0x8d2   : > { %v1103_v52 = vsel %vm151_vm0, %v1097_v50, 0.0 }
 0x8d3   : > { %1104 = vadd.xlane.f32.xlu0 %v1103_v52 }
 0x8d8   : > { %v1777_v54 = vpop.eup %1776 }
 0x8d9   : > { %v1107_v56 = vmul.f32 %v1777_v54, %v1102_v53 }
 0x8db   : > { %v1109_v58 = vsel %vm1108_vm6, %v1102_v53, %v1107_v56 }
 0x8dc   : > { %v1112_v59 = vsel %vm1110_vm7, %v1111_v57, %v1109_v58 }
 0x8dd   : > { %v1120_v60 = vmax.f32 %v1112_v59, 1e-12 }
 0x960   : > { %v1105_v55 = vpop.xlane.xlu0 %1104 }
 0x961   : > { %1778 = vrsqrt.f32 %v1105_v55  ;;  %vm1115_vm8 = vcmp.eq.f32.partialorder %v1105_v55, inf  ;;  %v1118_v61 = vand.u32 2147483648, %v1105_v55  ;;  %vm1117_vm9 = vcmp.eq.f32.partialorder %v1105_v55, 0.0 }
 0x962   : > { %1780 = vrcp.f32 %v1120_v60 }
 0x96b   : > { %v1779_v2 = vpop.eup %1778 }
 0x96c   : > { %v1114_v62 = vmul.f32 %v1779_v2, %v1105_v55  ;;  %v1781_v5 = vpop.eup %1780 }
 0x96d   : > { %v1123_v7 = vmul.f32 %v1808_v6, %v1781_v5 }
 0x96e   : > { %v1116_v33 = vsel %vm1115_vm8, %v1105_v55, %v1114_v62 }
 0x96f   : > { %v1119_v63 = vsel %vm1117_vm9, %v1118_v61, %v1116_v33 }
 0x970   : > { %v1121_v4 = vmax.f32 %v1119_v63, 1e-12 }
 0x972   : > { %1782 = vrcp.f32 %v1121_v4 }
 0x97c   : > { %v1783_v8 = vpop.eup %1782  ;;  %v2065_v9 = vpop.f32.mrb[20].mxu1 }
 0x97d   : > { %v1645_v11 = vpop.f32.mrb[21].mxu1  ;;  %v1125_v15 = vmul.f32 %v1809_v13, %v1783_v8 }
 0x97e   : > { %v2068_v16 = vpop.f32.mrb[22].mxu1 }
 0x97f   : > { %v1646_v17 = vpop.f32.mrb[23].mxu1  ;;  %v1126_v18 = vpack.c.bf16 %v1125_v15, %v1123_v7 }
 0x981   : > { %1128 = vrot.lane.b32.xlu0 %v1126_v18, %s1829_s30 }
 0x9a0   : > { %765 = vadd.xlane.f32.xlu0 %v764_v20 }
 0x9a1   : > { %v1258_v21 = vpop.f32.mrb[24].mxu1 }
 0x9a2   : > { %v1535_v22 = vadd.f32 -0.5, %v1258_v21  ;;  %v1657_v24 = vpop.f32.mrb[25].mxu1 }
 0x9a3   : > { %v1261_v25 = vpop.f32.mrb[26].mxu1 }
 0x9a4   : > { %v1267_v27 = vmul.f32 1.442695, %v1535_v22  ;;  %v1536_v28 = vadd.f32 -0.5, %v1261_v25  ;;  %v1658_v29 = vpop.f32.mrb[27].mxu1  ;;  %768 = vadd.xlane.f32.xlu0 %v767_v26  ;;  %v449_v22 = vsel %vm347_vm11, %v1927_v32, 0.0 }
 0x9a6   : > { %1784 = vpow2.f32 %v1267_v27  ;;  %v1269_v30 = vmul.f32 1.442695, %v1536_v28 }
 0x9a8   : > { %1786 = vpow2.f32 %v1269_v30  ;;  %1083 = vadd.xlane.f32.xlu0 %v1082_v31 }
 0x9b0   : > { %v1785_v49 = vpop.eup %1784 }
 0x9b1   : > { %v1271_v0 = vmul.f32 0.25, %v1785_v49 }
 0x9b2   : > { %v1787_v1 = vpop.eup %1786 }
 0x9b3   : > { %v1272_v34 = vmul.f32 0.25, %v1787_v1  ;;  %v1337_v36 = vsel %vm347_vm11, %v1271_v0, 0.0 }
 0x9b5   : > { %v1338_v37 = vsel %vm347_vm11, %v1272_v34, 0.0  ;;  %v1273_v51 = vpack.c.bf16 %v1272_v34, %v1271_v0 }
 0x9b6   : > { %v1339_v38 = vadd.f32 %v1338_v37, %v1337_v36 }
 0x9b7   : > { %1274 = vxpose.xlu1.c.b16.start.end [1/1] (short) (narrow) %v1273_v51, 16 }
 0x9b8   : > { %v1340_v58 = vrot.slane %v1339_v38, 4 }
 0x9ba   : > { %v1341_v59 = vadd.f32 %v1340_v58, %v1339_v38 }
 0x9bc   : > { %v1342_v4 = vrot.slane %v1341_v59, 2 }
 0x9be   : > { %v1343_v6 = vadd.f32 %v1342_v4, %v1341_v59 }
 0x9c0   : > { %v1344_v7 = vrot.slane %v1343_v6, 1 }
 0x9c2   : > { %v1345_v11 = vadd.f32 %v1344_v7, %v1343_v6 }
 0x9c4   : > { %1080 = vadd.xlane.f32.xlu1 %v1079_v39 }
 0x9c8   : > { %453 = vadd.xlane.f32.xlu1 %v452_v3 }
 0x9f3   : > { %v1129_v42 = vpop.permute.xlu0 %1128 }
 0x9f4   : > { %1650 = vmatmul.mubr.msk.bf16.vlgmr.msra.gmra.mrb[24].mxu0 %vm151_vm0, %v1129_v42 }
 0x9f5   : > { %1660 = vmatpush3.bf16.msra.mxu0 %v1291_v41  ;;  %1661 = vmatprep.mubr.msk.bf16.mxu0 %vm1820_vm2, %v1819_v10  ;;  %vm1434_vm2 = vcmask 195584  }
 0xa1d   : > { %v1282_v43 = vpop.trf.xlu1 }
 0xa1e   : > { %1662 = vmatmul.mubr.msk.bf16.vlgmr.msra.gmra.mrb[28].mxu0 %vm347_vm11, %v1282_v43 }
 0xa2d   : > { %v766_v44 = vpop.xlane.xlu0 %765 }
 0xa2e   : > { %v770_v45 = vmax.f32 %v766_v44, 1e-12 }
 0xa30   : > { %1788 = vrcp.f32 %v770_v45 }
 0xa31   : > { %v769_v40 = vpop.xlane.xlu0 %768 }
 0xa32   : > { %v771_v46 = vmax.f32 %v769_v40, 1e-12 }
 0xa34   : > { %1790 = vrcp.f32 %v771_v46 }
 0xa35   : > { %v1084_v52 = vpop.xlane.xlu0 %1083 }
 0xa36   : > { %v1086_v53 = vmax.f32 %v1084_v52, 1e-12 }
 0xa3a   : > { %v1789_v47 = vpop.eup %1788 }
 0xa3b   : > { %v773_v35 = vmul.f32 %v1789_v47, %v2011_v19 }
 0xa3e   : > { %v1791_v48 = vpop.eup %1790 }
 0xa3f   : > { %v775_v50 = vmul.f32 %v1791_v48, %v2015_v23 }
 0xa41   : > { %1410 = vrot.lane.b32.xlu1 %v775_v50, %s1831_s6 }
 0xa51   : > { %v1081_v10 = vpop.xlane.xlu1 %1080 }
 0xa52   : > { %v1085_v54 = vmax.f32 %v1081_v10, 1e-12 }
 0xa54   : > { %1792 = vrcp.f32 %v1085_v54 }
 0xa55   : > { %1794 = vrcp.f32 %v1086_v53  ;;  %v454_v41 = vpop.xlane.xlu1 %453 }
 0xa56   : > { %v456_v42 = vmax.f32 %v454_v41, 1e-12 }
 0xa5e   : > { %v1793_v55 = vpop.eup %1792 }
 0xa5f   : > { %v1088_v56 = vmul.f32 %v1793_v55, %v2065_v9  ;;  %v1795_v57 = vpop.eup %1794 }
 0xa60   : > { %v1090_v19 = vmul.f32 %v1795_v57, %v2068_v16 }
 0xa61   : > { %1416 = vrot.lane.b32.xlu1 %v1088_v56, %s1832_s7 }
 0xa65   : > { %1418 = vrot.lane.b32.xlu1 %v1090_v19, %s1832_s7 }
 0xab3   : > { %v1411_v43 = vpop.permute.xlu1 %1410 }
 0xac7   : > { %v1170_v23 = vpop.f32.mrb[24].mxu0 }
 0xac8   : > { %v1532_v60 = vadd.f32 -0.5, %v1170_v23  ;;  %v1651_v2 = vpop.f32.mrb[25].mxu0 }
 0xac9   : > { %v1173_v61 = vpop.f32.mrb[26].mxu0 }
 0xaca   : > { %v1179_v62 = vmul.f32 1.442695, %v1532_v60  ;;  %v1533_v33 = vadd.f32 -0.5, %v1173_v61  ;;  %v1652_v63 = vpop.f32.mrb[27].mxu0 }
 0xacc   : > { %1796 = vpow2.f32 %v1179_v62  ;;  %v1181_v5 = vmul.f32 1.442695, %v1533_v33 }
 0xace   : > { %1798 = vpow2.f32 %v1181_v5 }
 0xad3   : > { %v1417_v45 = vpop.permute.xlu1 %1416 }
 0xad6   : > { %v1797_v8 = vpop.eup %1796 }
 0xad7   : > { %v1183_v9 = vmul.f32 0.25, %v1797_v8  ;;  %v1419_v48 = vpop.permute.xlu1 %1418 }
 0xad8   : > { %v1799_v13 = vpop.eup %1798 }
 0xad9   : > { %v1184_v15 = vmul.f32 0.25, %v1799_v13  ;;  %v1392_v16 = vmul.f32 %v1345_v11, %v1183_v9 }
 0xadb   : > { %v1346_v17 = vpack.c.bf16 %v1184_v15, %v1183_v9  ;;  %v1394_v18 = vsel %vm347_vm11, %v1392_v16, 0.0  ;;  %v1393_v20 = vmul.f32 %v1345_v11, %v1184_v15 }
 0xadc   : > { %1395 = vadd.xlane.f32.xlu0 %v1394_v18 }
 0xadd   : > { %v1397_v21 = vsel %vm347_vm11, %v1393_v20, 0.0 }
 0xae0   : > { %1398 = vadd.xlane.f32.xlu0 %v1397_v21 }
 0xae4   : > { %450 = vadd.xlane.f32.xlu0 %v449_v22 }
 0xaf1   : > { %v1330_v24 = vpop.f32.mrb[28].mxu0 }
 0xaf2   : > { %v1663_v25 = vpop.f32.mrb[29].mxu0 }
 0xaf3   : > { %v1333_v26 = vpop.f32.mrb[30].mxu0 }
 0xaf4   : > { %v1347_v27 = vpack.c.bf16 %v1333_v26, %v1330_v24  ;;  %v1664_v28 = vpop.f32.mrb[31].mxu0 }
 0xaf6   : > { %1666 = vmatpush3.bf16.msra.mxu1 %v1347_v27 }
 0xaf9   : > { %1668 = vmatmul.mubr.msk.bf16.vlgmr.msra.gmra.mrb[28].mxu1 %vm347_vm11, %v1346_v17 }
 0xafa   : > { %1408 = vrot.lane.b32.xlu0 %v773_v35, %s1831_s6 }
 0xb69   : > { %v1396_v29 = vpop.xlane.xlu0 %1395 }
 0xb6a   : > { %v1400_v31 = vmax.f32 %v1396_v29, 1e-12 }
 0xb6c   : > { %1800 = vrcp.f32 %v1400_v31 }
 0xb6d   : > { %v1399_v30 = vpop.xlane.xlu0 %1398 }
 0xb6e   : > { %v1401_v49 = vmax.f32 %v1399_v30, 1e-12 }
 0xb70   : > { %1802 = vrcp.f32 %v1401_v49 }
 0xb71   : > { %v451_v39 = vpop.xlane.xlu0 %450 }
 0xb72   : > { %v455_v3 = vmax.f32 %v451_v39, 1e-12 }
 0xb74   : > { %1804 = vrcp.f32 %v455_v3 }
 0xb75   : > { %1806 = vrcp.f32 %v456_v42  ;;  %v1409_v47 = vpop.permute.xlu0 %1408 }
 0xb76   : > { %v1801_v0 = vpop.eup %1800 }
 0xb7a   : > { %v1803_v36 = vpop.eup %1802 }
 0xb7e   : > { %v1805_v44 = vpop.eup %1804 }
 0xb7f   : > { %v458_v40 = vmul.f32 %v1805_v44, %v1958_v12  ;;  %v1807_v46 = vpop.eup %1806 }
 0xb80   : > { %v460_v50 = vmul.f32 %v1807_v46, %v1960_v14 }
 0xb81   : > { %v1430_v35 = vsel %vm151_vm0, %v458_v40, %v1409_v47 }
 0xb82   : > { %v1432_v10 = vsel %vm347_vm11, %v1430_v35, %v1417_v45  ;;  %v1431_v53 = vsel %vm151_vm0, %v460_v50, %v1411_v43 }
 0xb83   : > { %v1433_v54 = vsel %vm347_vm11, %v1431_v53, %v1419_v48 }
 0xbcc   : > { %v1385_v1 = vpop.f32.mrb[28].mxu1 }
 0xbcd   : > { %v1403_v32 = vmul.f32 %v1801_v0, %v1385_v1  ;;  %v1669_v34 = vpop.f32.mrb[29].mxu1 }
 0xbce   : > { %v1388_v37 = vpop.f32.mrb[30].mxu1 }
 0xbcf   : > { %v1405_v51 = vmul.f32 %v1803_v36, %v1388_v37  ;;  %1424 = vrot.lane.b32.xlu0 %v1403_v32, %s1833_s8  ;;  %v1670_v38 = vpop.f32.mrb[31].mxu1 }
 0xbd1   : > { %1426 = vrot.lane.b32.xlu1 %v1405_v51, %s1833_s8 }
 0xc41   : > { %v1425_v52 = vpop.permute.xlu0 %1424 }
 0xc42   : > { %v1435_v12 = vsel %vm1434_vm2, %v1432_v10, %v1425_v52 }
 0xc43   : > { %1438 = vst.msk [vmem:[%s143_s14] sm:$0xff] %vm1437_vm10, %v1435_v12  ;;  %v1427_v55 = vpop.permute.xlu1 %1426 }
 0xc44   : > { %v1436_v56 = vsel %vm1434_vm2, %v1433_v54, %v1427_v55 }
 0xc45   : > { %1439 = vst.msk [vmem:[%s143_s14 + $0x8] sm:$0xff] %vm1437_vm10, %v1436_v56 }
 0xc46 PF: > { %s12_s9 = sadd.s32 1, %s1816_s9  }
 0xc47   : > { %p9_p4 = scmp.ge.s32.totalorder %s12_s9, 4  }
 0xc49   :  { %11 = sbr.rel (!%p9_p4) target bundleno = 1 (0x1), region = 61 }

// kernel: performer_block_forward.13
= control target key start
LH: loop header
LB: loop body
LE: loop exit
PB: predicated region body
PF: predicated region fallthrough
CT: control target
= control target key end

     0   :  { %s256_s0 = inlined_call_operand.vmem [shape: f32[32,128], index: 0, kind: input, shape index: {}]   ;;  %s257_s1 = inlined_call_operand.vmem [shape: f32[1,128], index: 1, kind: input, shape index: {}]   ;;  %s258_s2 = inlined_call_operand.vmem [shape: f32[1,128], index: 2, kind: input, shape index: {}]   ;;  %s259_s3 = inlined_call_operand.vmem [shape: f32[32,128], index: 3, kind: output, shape index: {}]  }
   0x1   :  { %v14_v0 = vld [vmem:[%s256_s0] sm:$0xff]  ;;  %v15_v4 = vld [vmem:[%s256_s0 + $0x8] sm:$0xff]  ;;  %v16_v5 = vld [vmem:[%s256_s0 + $0x10] sm:$0xff] }
   0x2   :  { %v156_v1 = vld [vmem:[%s257_s1] ss:$0 sm:$0xff]  ;;  %v17_v6 = vld [vmem:[%s256_s0 + $0x18] sm:$0xff] }
   0x3   :  { %v157_v2 = vld [vmem:[%s258_s2] ss:$0 sm:$0xff]  ;;  %v25_v3 = vmul.f32 %v156_v1, %v14_v0  ;;  %v26_v7 = vmul.f32 %v156_v1, %v15_v4  ;;  %v27_v8 = vmul.f32 %v156_v1, %v16_v5  ;;  %v28_v9 = vmul.f32 %v156_v1, %v17_v6 }
   0x5   :  { %v212_v10 = vadd.f32 %v157_v2, %v25_v3  ;;  %v214_v11 = vadd.f32 %v157_v2, %v26_v7  ;;  %v216_v12 = vadd.f32 %v157_v2, %v27_v8  ;;  %v218_v13 = vadd.f32 %v157_v2, %v28_v9 }
   0x7   :  { %v221_v14 = vmul.f32 0.70710677, %v212_v10  ;;  %v224_v15 = vmul.f32 0.70710677, %v214_v11  ;;  %v227_v16 = vmul.f32 0.70710677, %v216_v12 }
   0x8   :  { %v231_v18 = vmul.f32 0.70710677, %v218_v13 }
   0x9   :  { %v48_v17 = vand.u32 2147483647, %v221_v14  ;;  %v49_v19 = vand.u32 2147483647, %v224_v15  ;;  %v50_v20 = vand.u32 2147483647, %v227_v16 }
   0xa   :  { %v51_v22 = vand.u32 2147483647, %v231_v18  ;;  %vm128_vm0 = vcmp.lt.f32.partialorder %v221_v14, 0.0  ;;  %vm129_vm1 = vcmp.lt.f32.partialorder %v224_v15, 0.0  ;;  %vm130_vm2 = vcmp.lt.f32.partialorder %v227_v16, 0.0 }
   0xb   :  { %v52_v21 = vmul.f32 0.3275911, %v48_v17  ;;  %v53_v23 = vmul.f32 0.3275911, %v49_v19  ;;  %v54_v24 = vmul.f32 0.3275911, %v50_v20 }
   0xc   :  { %v55_v26 = vmul.f32 0.3275911, %v51_v22  ;;  %v104_v30 = vsub.f32 0.0, %v48_v17  ;;  %v105_v31 = vsub.f32 0.0, %v49_v19  ;;  %v106_v33 = vsub.f32 0.0, %v50_v20 }
   0xd   :  { %v56_v25 = vadd.f32 1.0, %v52_v21  ;;  %v57_v27 = vadd.f32 1.0, %v53_v23  ;;  %v58_v28 = vadd.f32 1.0, %v54_v24  ;;  %v107_v36 = vsub.f32 0.0, %v51_v22 }
   0xe   :  { %v59_v29 = vadd.f32 1.0, %v55_v26  ;;  %v108_v32 = vmul.f32 %v104_v30, %v48_v17  ;;  %v109_v34 = vmul.f32 %v105_v31, %v49_v19  ;;  %v110_v41 = vmul.f32 %v106_v33, %v50_v20 }
   0xf   :  { %158 = vrcp.f32 %v56_v25  ;;  %v111_v46 = vmul.f32 %v107_v36, %v51_v22  ;;  %v40_v36 = vmul.f32 0.5, %v212_v10  ;;  %v42_v15 = vmul.f32 0.5, %v216_v12 }
  0x10   :  { %160 = vrcp.f32 %v57_v27  ;;  %v112_v39 = vmul.f32 1.442695, %v108_v32  ;;  %v114_v43 = vmul.f32 1.442695, %v109_v34  ;;  %v116_v51 = vmul.f32 1.442695, %v110_v41 }
  0x11   :  { %162 = vrcp.f32 %v58_v28  ;;  %v118_v56 = vmul.f32 1.442695, %v111_v46  ;;  %vm131_vm3 = vcmp.lt.f32.partialorder %v231_v18, 0.0 }
  0x12   :  { %164 = vrcp.f32 %v59_v29 }
  0x13   :  { %166 = vpow2.f32 %v112_v39  ;;  %v41_v39 = vmul.f32 0.5, %v214_v11 }
  0x14   :  { %168 = vpow2.f32 %v114_v43 }
  0x15   :  { %170 = vpow2.f32 %v116_v51 }
  0x16   :  { %172 = vpow2.f32 %v118_v56 }
  0x19   :  { %v159_v35 = vpop.eup %158 }
  0x1a   :  { %v161_v37 = vpop.eup %160  ;;  %v68_v38 = vmul.f32 1.0614054, %v159_v35 }
  0x1b   :  { %v69_v40 = vmul.f32 1.0614054, %v161_v37  ;;  %v163_v44 = vpop.eup %162 }
  0x1c   :  { %v72_v42 = vadd.f32 -1.4531521, %v68_v38  ;;  %v70_v48 = vmul.f32 1.0614054, %v163_v44  ;;  %v165_v49 = vpop.eup %164 }
  0x1d   :  { %v73_v45 = vadd.f32 -1.4531521, %v69_v40  ;;  %v71_v54 = vmul.f32 1.0614054, %v165_v49  ;;  %v167_v8 = vpop.eup %166 }
  0x1e   :  { %v76_v47 = vmul.f32 %v159_v35, %v72_v42  ;;  %v74_v53 = vadd.f32 -1.4531521, %v70_v48  ;;  %v169_v17 = vpop.eup %168 }
  0x1f   :  { %v77_v50 = vmul.f32 %v161_v37, %v73_v45  ;;  %v75_v59 = vadd.f32 -1.4531521, %v71_v54  ;;  %v171_v26 = vpop.eup %170 }
  0x20   :  { %v80_v52 = vadd.f32 1.4214138, %v76_v47  ;;  %v78_v58 = vmul.f32 %v163_v44, %v74_v53  ;;  %v173_v31 = vpop.eup %172 }
  0x21   :  { %v81_v55 = vadd.f32 1.4214138, %v77_v50  ;;  %v79_v63 = vmul.f32 %v165_v49, %v75_v59 }
  0x22   :  { %v84_v57 = vmul.f32 %v159_v35, %v80_v52  ;;  %v82_v62 = vadd.f32 1.4214138, %v78_v58 }
  0x23   :  { %v85_v60 = vmul.f32 %v161_v37, %v81_v55  ;;  %v83_v3 = vadd.f32 1.4214138, %v79_v63 }
  0x24   :  { %v88_v61 = vadd.f32 -0.28449672, %v84_v57  ;;  %v86_v2 = vmul.f32 %v163_v44, %v82_v62 }
  0x25   :  { %v89_v0 = vadd.f32 -0.28449672, %v85_v60  ;;  %v87_v7 = vmul.f32 %v165_v49, %v83_v3 }
  0x26   :  { %v92_v1 = vmul.f32 %v159_v35, %v88_v61  ;;  %v90_v6 = vadd.f32 -0.28449672, %v86_v2 }
  0x27   :  { %v93_v4 = vmul.f32 %v161_v37, %v89_v0  ;;  %v91_v21 = vadd.f32 -0.28449672, %v87_v7 }
  0x28   :  { %v96_v5 = vadd.f32 0.2548296, %v92_v1  ;;  %v94_v20 = vmul.f32 %v163_v44, %v90_v6 }
  0x29   :  { %v97_v9 = vadd.f32 0.2548296, %v93_v4  ;;  %v95_v25 = vmul.f32 %v165_v49, %v91_v21 }
  0x2a   :  { %v100_v19 = vmul.f32 %v159_v35, %v96_v5  ;;  %v98_v24 = vadd.f32 0.2548296, %v94_v20 }
  0x2b   :  { %v101_v22 = vmul.f32 %v161_v37, %v97_v9  ;;  %v99_v30 = vadd.f32 0.2548296, %v95_v25 }
  0x2c   :  { %v120_v23 = vmul.f32 %v167_v8, %v100_v19  ;;  %v102_v29 = vmul.f32 %v163_v44, %v98_v24 }
  0x2d   :  { %v121_v27 = vmul.f32 %v169_v17, %v101_v22  ;;  %v103_v35 = vmul.f32 %v165_v49, %v99_v30  ;;  %v43_v49 = vmul.f32 0.5, %v218_v13 }
  0x2e   :  { %v124_v28 = vsub.f32 1.0, %v120_v23  ;;  %v122_v34 = vmul.f32 %v171_v26, %v102_v29 }
  0x2f   :  { %v125_v32 = vsub.f32 1.0, %v121_v27  ;;  %v123_v41 = vmul.f32 %v173_v31, %v103_v35 }
  0x30   :  { %v132_v33 = vsub.f32 0.0, %v124_v28  ;;  %v126_v40 = vsub.f32 1.0, %v122_v34 }
  0x31   :  { %v133_v37 = vsub.f32 0.0, %v125_v32  ;;  %v127_v45 = vsub.f32 1.0, %v123_v41 }
  0x32   :  { %v136_v38 = vsel %vm128_vm0, %v132_v33, %v124_v28  ;;  %v134_v14 = vsub.f32 0.0, %v126_v40 }
  0x33   :  { %v140_v42 = vadd.f32 1.0, %v136_v38  ;;  %v137_v43 = vsel %vm129_vm1, %v133_v37, %v125_v32  ;;  %v135_v48 = vsub.f32 0.0, %v127_v45 }
  0x34   :  { %v141_v44 = vadd.f32 1.0, %v137_v43  ;;  %v138_v10 = vsel %vm130_vm2, %v134_v14, %v126_v40 }
  0x35   :  { %v144_v46 = vmul.f32 %v140_v42, %v40_v36  ;;  %v142_v11 = vadd.f32 1.0, %v138_v10  ;;  %v139_v16 = vsel %vm131_vm3, %v135_v48, %v127_v45 }
  0x36   :  { %v145_v47 = vmul.f32 %v141_v44, %v41_v39  ;;  %v143_v51 = vadd.f32 1.0, %v139_v16 }
  0x37   :  { %148 = vst [vmem:[%s259_s3] sm:$0xff] %v144_v46  ;;  %v146_v50 = vmul.f32 %v142_v11, %v42_v15 }
  0x38   :  { %149 = vst [vmem:[%s259_s3 + $0x8] sm:$0xff] %v145_v47  ;;  %v147_v12 = vmul.f32 %v143_v51, %v43_v49 }
  0x39   :  { %150 = vst [vmem:[%s259_s3 + $0x10] sm:$0xff] %v146_v50 }
  0x3a   :  { %151 = vst [vmem:[%s259_s3 + $0x18] sm:$0xff] %v147_v12 }

// kernel: tile.21
= control target key start
LH: loop header
LB: loop body
LE: loop exit
PB: predicated region body
PF: predicated region fallthrough
CT: control target
= control target key end

     0   :  { %s22_s0 = inlined_call_operand.vmem [shape: f32[32], index: 0, kind: input, shape index: {}]   ;;  %s23_s1 = inlined_call_operand.vmem [shape: f32[4,32], index: 1, kind: output, shape index: {}]  }
   0x1   :  { %v4_v0 = vld [vmem:[%s22_s0] ss:$0 sm:$0xff] }
   0x2   :  { %5 = vst [vmem:[%s23_s1] sm:$0xf] %v4_v0 }

// kernel: tile.22
= control target key start
LH: loop header
LB: loop body
LE: loop exit
PB: predicated region body
PF: predicated region fallthrough
CT: control target
= control target key end

     0   :  { %vm7_vm0 = vcmask 261120   ;;  %s37_s8 = smov 32   ;;  %s38_s9 = smov 64   ;;  %vm13_vm1 = vcmask 1048320   ;;  %vm19_vm2 = vcmask 785920   ;;  %vm25_vm3 = vcmask 523520   ;;  %s55_s0 = inlined_call_operand.vmem [shape: f32[4,32], index: 0, kind: input, shape index: {}]   ;;  %s56_s1 = inlined_call_operand.vmem [shape: f32[1,128], index: 1, kind: output, shape index: {}]  }
   0x1   :  { %v4_v0 = vld [vmem:[%s55_s0] sm:$0xf]  ;;  %s36_s0 = smov 96  }
   0x2   :  { %5 = vst [vmem:[#allocation1] sm:$0xf] %v4_v0 }
   0x9   :  { %v10_v1 = vld [vmem:[#allocation1 + $0x3] sm:$0x1]   ;;  %v22_v2 = vld [vmem:[#allocation1 + $0x1] sm:$0x1]   ;;  %v6_v3 = vld [vmem:[#allocation1] sm:$0x1]  }
   0xa   :  { %11 = vrot.lane.b32.xlu0 %v10_v1, %s36_s0  ;;  %23 = vrot.lane.b32.xlu1 %v22_v2, %s37_s8  ;;  %v16_v4 = vld [vmem:[#allocation1 + $0x2] sm:$0x1]   ;;  %8 = vst.msk [vmem:[#allocation0] sm:$0x1] %vm7_vm0, %v6_v3  }
   0xe   :  { %17 = vrot.lane.b32.xlu0 %v16_v4, %s38_s9 }
  0x7c   :  { %v12_v5 = vpop.permute.xlu0 %11   ;;  %v24_v6 = vpop.permute.xlu1 %23  }
  0x7d   :  { %14 = vst.msk [vmem:[#allocation0] sm:$0x1] %vm13_vm1, %v12_v5  }
  0x80   :  { %v18_v7 = vpop.permute.xlu0 %17  }
  0x81   :  { %20 = vst.msk [vmem:[#allocation0] sm:$0x1] %vm19_vm2, %v18_v7  }
  0x82   :  { %26 = vst.msk [vmem:[#allocation0] sm:$0x1] %vm25_vm3, %v24_v6  }
  0x89   :  { %v30_v8 = vld [vmem:[#allocation0] sm:$0x1] }
  0x8a   :  { %32 = vst [vmem:[%s56_s1] sm:$0x1] %v30_v8 }

// kernel: performer_block_forward.14
= control target key start
LH: loop header
LB: loop body
LE: loop exit
PB: predicated region body
PF: predicated region fallthrough
CT: control target
= control target key end

     0   :  { %s593_s18 = smov 0   ;;  %s723_s0 = inlined_call_operand.vmem [shape: f32[2,6,6,128], index: 0, kind: input, shape index: {}]   ;;  %s724_s1 = inlined_call_operand.vmem [shape: f32[3,3,128], index: 1, kind: input, shape index: {}]   ;;  %s725_s2 = inlined_call_operand.vmem [shape: f32[1,1,128], index: 2, kind: input, shape index: {}]   ;;  %s726_s3 = inlined_call_operand.vmem [shape: f32[2,4,4,128], index: 3, kind: output, shape index: {0}]   ;;  %s727_s4 = inlined_call_operand.vmem [shape: f32[1,128], index: 4, kind: output, shape index: {1}]   ;;  %s728_s5 = inlined_call_operand.vmem [shape: f32[1,128], index: 5, kind: output, shape index: {2}]  }
   0x1 LB: > { %s599_s19 = sadd.s32 4294967295, %s560_s18   ;;  %p535_p0 = scmp.ge.s32.totalorder %s560_s18, 1  ;;  %s560_s18 = sphi %s593_s18, %s16_s18  }
   0x2   : > { %p182_p1 = scmp.lt.s32.totalorder %s560_s18, 3 }
   0x4   : > { %p183_p2 = pnand %p535_p0, %p182_p1 }
   0x5   : > { %p210_p3 = scmp.lt.s32.totalorder (!%p183_p2), %s599_s19, 1  ;;  %v237_v0 = vlaneseq (!%p183_p2)  ;;  %v226_v2 = vld [vmem:[%s724_s1] sm:$0x7] (!%p183_p2)  ;;  %v227_v3 = vld [vmem:[%s724_s1 + $0x4] sm:$0x7] (!%p183_p2)  ;;  %p540_p4 = scmp.ne.s32.totalorder (!%p183_p2), %s599_s19, 0 }
   0x6   : > { %186 = sbr.rel (%p183_p2) target bundleno = 77 (0x4d), region = 32  ;;  %v228_v4 = vld [vmem:[%s724_s1 + $0x8] sm:$0x7] (!%p183_p2)  ;;  %v632_v12 = vld [vmem:[%s725_s2] ss:$0 sm:$0xff] (!%p183_p2) }
   0x7   : > { %v238_v1 = vshrl.u32 (!%p183_p2), %v237_v0, 7 }
   0x9   : > { %v239_v5 = vsub.s32 (!%p183_p2), 0, %v238_v1  ;;  %v251_v6 = vsub.s32 (!%p183_p2), 1, %v238_v1  ;;  %v275_v7 = vsub.s32 (!%p183_p2), 2, %v238_v1 }
   0xb   : > { %v622_v8 = vrot.slane (!%p183_p2), %v226_v2, %v239_v5  ;;  %v624_v9 = vrot.slane (!%p183_p2), %v226_v2, %v251_v6  ;;  %v626_v10 = vrot.slane (!%p183_p2), %v226_v2, %v275_v7  ;;  %v634_v13 = vrot.slane (!%p183_p2), %v227_v3, %v239_v5 }
   0xc   : > { %v636_v14 = vrot.slane (!%p183_p2), %v227_v3, %v251_v6  ;;  %v638_v15 = vrot.slane (!%p183_p2), %v227_v3, %v275_v7  ;;  %v640_v16 = vrot.slane (!%p183_p2), %v228_v4, %v251_v6  ;;  %v647_v22 = vrot.slane (!%p183_p2), %v228_v4, %v239_v5 }
   0xd   : > { %s605_s20 = scalar_select %p210_p3, %s599_s19, 1  ;;  %v651_v27 = vrot.slane %v228_v4, %v275_v7 }
   0xf   : > { %s544_s25 = smul.u32 48, %s605_s20  ;;  %s543_s8 = sshll.u32 %s605_s20, 4 }
  0x10   : > { %s686_s11 = scalar_lea.vmem %s726_s3, %s543_s8 }
  0x11   : > { %s620_s30 = scalar_lea.vmem %s723_s0, %s544_s25 }
  0x12   : > { %v220_v11 = vld [vmem:[%s620_s30] sm:$0x3f]  ;;  %v221_v17 = vld [vmem:[%s620_s30 + $0x8] sm:$0x3f]  ;;  %v222_v23 = vld [vmem:[%s620_s30 + $0x10] sm:$0x3f] }
  0x13   : > { %v241_v18 = vmul.f32 %v622_v8, %v220_v11  ;;  %v253_v19 = vmul.f32 %v624_v9, %v220_v11  ;;  %v277_v20 = vmul.f32 %v626_v10, %v220_v11  ;;  %v313_v21 = vmul.f32 %v636_v14, %v221_v17  ;;  %v223_v47 = vld [vmem:[%s620_s30 + $0x18] sm:$0x3f]  ;;  %v224_v6 = vld [vmem:[%s620_s30 + $0x20] sm:$0x3f] }
  0x14   : > { %v301_v28 = vmul.f32 %v634_v13, %v221_v17  ;;  %v337_v29 = vmul.f32 %v638_v15, %v221_v17  ;;  %v373_v30 = vmul.f32 %v640_v16, %v222_v23  ;;  %v242_v31 = vmul.f32 %v622_v8, %v221_v17 }
  0x15   : > { %v245_v24 = vadd.f32 %v632_v12, %v241_v18  ;;  %v261_v25 = vrot.slane %v253_v19, 1  ;;  %v285_v26 = vrot.slane %v277_v20, 2  ;;  %v397_v33 = vmul.f32 %v651_v27, %v222_v23 }
  0x16   : > { %v254_v34 = vmul.f32 %v624_v9, %v221_v17  ;;  %v278_v35 = vmul.f32 %v626_v10, %v221_v17  ;;  %v321_v36 = vrot.slane %v313_v21, 1  ;;  %v361_v37 = vmul.f32 %v647_v22, %v222_v23 }
  0x17   : > { %v269_v32 = vadd.f32 %v261_v25, %v245_v24  ;;  %v246_v38 = vadd.f32 %v632_v12, %v242_v31  ;;  %v314_v42 = vmul.f32 %v636_v14, %v222_v23  ;;  %v345_v43 = vrot.slane %v337_v29, 2 }
  0x18   : > { %v262_v40 = vrot.slane %v254_v34, 1  ;;  %v286_v41 = vrot.slane %v278_v35, 2  ;;  %v381_v44 = vrot.slane %v373_v30, 1  ;;  %v302_v45 = vmul.f32 %v634_v13, %v222_v23 }
  0x19   : > { %v293_v39 = vadd.f32 %v285_v26, %v269_v32  ;;  %v338_v46 = vmul.f32 %v638_v15, %v222_v23  ;;  %v405_v49 = vrot.slane %v397_v33, 2  ;;  %v243_v51 = vmul.f32 %v622_v8, %v222_v23 }
  0x1a   : > { %v270_v50 = vadd.f32 %v262_v40, %v246_v38  ;;  %v374_v52 = vmul.f32 %v640_v16, %v223_v47  ;;  %v398_v53 = vmul.f32 %v651_v27, %v223_v47  ;;  %v255_v54 = vmul.f32 %v624_v9, %v222_v23  ;;  %v225_v40 = vld [vmem:[%s620_s30 + $0x28] sm:$0x3f] }
  0x1b   : > { %v305_v48 = vadd.f32 %v301_v28, %v293_v39  ;;  %v279_v55 = vmul.f32 %v626_v10, %v222_v23  ;;  %v322_v58 = vrot.slane %v314_v42, 1  ;;  %v247_v59 = vadd.f32 %v632_v12, %v243_v51 }
  0x1c   : > { %v294_v57 = vadd.f32 %v286_v41, %v270_v50  ;;  %v346_v60 = vrot.slane %v338_v46, 2  ;;  %v263_v61 = vrot.slane %v255_v54, 1  ;;  %v315_v63 = vmul.f32 %v636_v14, %v223_v47 }
  0x1d   : > { %v329_v56 = vadd.f32 %v321_v36, %v305_v48  ;;  %v287_v62 = vrot.slane %v279_v55, 2  ;;  %v362_v2 = vmul.f32 %v647_v22, %v223_v47  ;;  %v339_v3 = vmul.f32 %v638_v15, %v223_v47 }
  0x1e   : > { %v306_v1 = vadd.f32 %v302_v45, %v294_v57  ;;  %v382_v4 = vrot.slane %v374_v52, 1  ;;  %v406_v5 = vrot.slane %v398_v53, 2  ;;  %v271_v7 = vadd.f32 %v263_v61, %v247_v59 }
  0x1f   : > { %v353_v0 = vadd.f32 %v345_v43, %v329_v56  ;;  %v303_v11 = vmul.f32 %v634_v13, %v223_v47  ;;  %v375_v19 = vmul.f32 %v640_v16, %v224_v6  ;;  %v244_v20 = vmul.f32 %v622_v8, %v223_v47 }
  0x20   : > { %v330_v18 = vadd.f32 %v322_v58, %v306_v1  ;;  %v295_v21 = vadd.f32 %v287_v62, %v271_v7  ;;  %v323_v23 = vrot.slane %v315_v63, 1  ;;  %v256_v24 = vmul.f32 %v624_v9, %v223_v47 }
  0x21   : > { %v365_v17 = vadd.f32 %v361_v37, %v353_v0  ;;  %v280_v25 = vmul.f32 %v626_v10, %v223_v47  ;;  %v347_v29 = vrot.slane %v339_v3, 2  ;;  %v248_v30 = vadd.f32 %v632_v12, %v244_v20 }
  0x22   : > { %v354_v28 = vadd.f32 %v346_v60, %v330_v18  ;;  %v307_v31 = vadd.f32 %v303_v11, %v295_v21  ;;  %v264_v8 = vrot.slane %v256_v24, 1  ;;  %v316_v33 = vmul.f32 %v636_v14, %v224_v6 }
  0x23   : > { %v389_v26 = vadd.f32 %v381_v44, %v365_v17  ;;  %v288_v32 = vrot.slane %v280_v25, 2  ;;  %v363_v10 = vmul.f32 %v647_v22, %v224_v6  ;;  %v399_v35 = vmul.f32 %v651_v27, %v224_v6 }
  0x24   : > { %v366_v34 = vadd.f32 %v362_v2, %v354_v28  ;;  %v331_v36 = vadd.f32 %v323_v23, %v307_v31  ;;  %v272_v12 = vadd.f32 %v264_v8, %v248_v30  ;;  %v304_v37 = vmul.f32 %v634_v13, %v224_v6 }
  0x25   : > { %v413_v9 = vadd.f32 %v405_v49, %v389_v26  ;;  %v340_v38 = vmul.f32 %v638_v15, %v224_v6  ;;  %v383_v42 = vrot.slane %v375_v19, 1  ;;  %v324_v14 = vrot.slane %v316_v33, 1 }
  0x26   : > { %v390_v39 = vadd.f32 %v382_v4, %v366_v34  ;;  %v355_v41 = vadd.f32 %v347_v29, %v331_v36  ;;  %v296_v43 = vadd.f32 %v288_v32, %v272_v12  ;;  %v407_v45 = vrot.slane %v399_v35, 2 }
  0x27   : > { %417 = vst [vmem:[%s686_s11] sm:$0xf] %v413_v9  ;;  %v348_v48 = vrot.slane %v340_v38, 2  ;;  %v376_v49 = vmul.f32 %v640_v16, %v225_v40  ;;  %v364_v15 = vmul.f32 %v647_v22, %v225_v40  ;;  %v400_v51 = vmul.f32 %v651_v27, %v225_v40 }
  0x28   : > { %v414_v44 = vadd.f32 %v406_v5, %v390_v39  ;;  %v367_v46 = vadd.f32 %v363_v10, %v355_v41  ;;  %v308_v47 = vadd.f32 %v304_v37, %v296_v43  ;;  %v562_v16 = vmov (!%p540_p4), 0.0  }
  0x29   : > { %v384_v54 = vrot.slane %v376_v49, 1  ;;  %v408_v56 = vrot.slane %v400_v51, 2  ;;  %425 = vst [vmem:[%s727_s4] sm:$0x1] (!%p540_p4), %v562_v16  ;;  %426 = vst [vmem:[%s728_s5] sm:$0x1] (!%p540_p4), %v562_v16 }
  0x2a   : > { %418 = vst [vmem:[%s686_s11 + $0x4] sm:$0xf] %v414_v44  ;;  %v391_v13 = vadd.f32 %v383_v42, %v367_v46  ;;  %v332_v50 = vadd.f32 %v324_v14, %v308_v47 }
  0x2c   : > { %v415_v52 = vadd.f32 %v407_v45, %v391_v13  ;;  %v356_v53 = vadd.f32 %v348_v48, %v332_v50 }
  0x2e   : > { %419 = vst [vmem:[%s686_s11 + $0x8] sm:$0xf] %v415_v52  ;;  %v368_v55 = vadd.f32 %v364_v15, %v356_v53  ;;  %424 = sbr.rel (%p540_p4) target bundleno = 53 (0x35), region = 36 }
  0x30   : > { %v392_v57 = vadd.f32 %v384_v54, %v368_v55 }
  0x32   : > { %v416_v58 = vadd.f32 %v408_v56, %v392_v57 }
  0x34   : > { %420 = vst [vmem:[%s686_s11 + $0xc] sm:$0xf] %v416_v58 }
  0x35 PF: > { %vm428_vm0 = vcmask 1043456   ;;  %v445_v22 = vmul.f32 %v413_v9, %v413_v9  ;;  %v446_v27 = vmul.f32 %v414_v44, %v414_v44  ;;  %v447_v59 = vmul.f32 %v415_v52, %v415_v52  ;;  %v427_v30 = vld [vmem:[%s727_s4] sm:$0x1] }
  0x36   : > { %v429_v60 = vsel %vm428_vm0, %v413_v9, 0.0  ;;  %v430_v61 = vsel %vm428_vm0, %v414_v44, 0.0  ;;  %v432_v62 = vsel %vm428_vm0, %v415_v52, 0.0  ;;  %v448_v0 = vmul.f32 %v416_v58, %v416_v58  ;;  %v444_v32 = vld [vmem:[%s728_s5] sm:$0x1] }
  0x37   : > { %v431_v63 = vadd.f32 %v430_v61, %v429_v60  ;;  %v449_v1 = vsel %vm428_vm0, %v445_v22, 0.0  ;;  %v450_v2 = vsel %vm428_vm0, %v446_v27, 0.0  ;;  %v434_v3 = vsel %vm428_vm0, %v416_v58, 0.0 }
  0x38   : > { %v451_v4 = vadd.f32 %v450_v2, %v449_v1  ;;  %v452_v5 = vsel %vm428_vm0, %v447_v59, 0.0  ;;  %v454_v7 = vsel %vm428_vm0, %v448_v0, 0.0 }
  0x39   : > { %v433_v6 = vadd.f32 %v432_v62, %v431_v63 }
  0x3a   : > { %v453_v11 = vadd.f32 %v452_v5, %v451_v4 }
  0x3b   : > { %v435_v17 = vadd.f32 %v434_v3, %v433_v6 }
  0x3c   : > { %v455_v18 = vadd.f32 %v454_v7, %v453_v11 }
  0x3d   : > { %v436_v19 = vrot.slane %v435_v17, 4 }
  0x3e   : > { %v456_v20 = vrot.slane %v455_v18, 4 }
  0x3f   : > { %v437_v21 = vadd.f32 %v436_v19, %v435_v17 }
  0x40   : > { %v457_v23 = vadd.f32 %v456_v20, %v455_v18 }
  0x41   : > { %v438_v24 = vrot.slane %v437_v21, 2 }
  0x42   : > { %v458_v25 = vrot.slane %v457_v23, 2 }
  0x43   : > { %v439_v26 = vadd.f32 %v438_v24, %v437_v21 }
  0x44   : > { %v459_v28 = vadd.f32 %v458_v25, %v457_v23 }
  0x45   : > { %v440_v29 = vrot.slane %v439_v26, 1 }
  0x46   : > { %v460_v31 = vrot.slane %v459_v28, 1 }
  0x47   : > { %v441_v8 = vadd.f32 %v440_v29, %v439_v26 }
  0x48   : > { %v461_v33 = vadd.f32 %v460_v31, %v459_v28 }
  0x49   : > { %v442_v9 = vadd.f32 %v441_v8, %v427_v30 }
  0x4a   : > { %v462_v34 = vadd.f32 %v461_v33, %v444_v32 }
  0x4b   : > { %443 = vst [vmem:[%s727_s4] sm:$0x1] %v442_v9 }
  0x4c   : > { %463 = vst [vmem:[%s728_s5] sm:$0x1] %v462_v34 }
  0x4d PF: > { %s16_s18 = sadd.s32 1, %s560_s18  }
  0x4e   : > { %p13_p5 = scmp.ge.s32.totalorder %s16_s18, 4  }
  0x50   :  { %15 = sbr.rel (!%p13_p5) target bundleno = 1 (0x1), region = 82 }

// kernel: performer_block_forward.16
= control target key start
LH: loop header
LB: loop body
LE: loop exit
PB: predicated region body
PF: predicated region fallthrough
CT: control target
= control target key end

     0   :  { %vm148_vm0 = vcmask 253952   ;;  %v253_v14 = vmov 0.0   ;;  %vm152_vm1 = vcmask 261120   ;;  %s369_s1 = inlined_call_operand.vmem [shape: bf16[128,32], index: 1, kind: input, shape index: {}]   ;;  %s370_s0 = inlined_call_operand.vmem [shape: f32[32,128], index: 0, kind: input, shape index: {}]   ;;  %s371_s4 = inlined_call_operand.vmem [shape: f32[1,32], index: 4, kind: output, shape index: {1}]   ;;  %s372_s5 = inlined_call_operand.vmem [shape: f32[1,32], index: 5, kind: output, shape index: {2}]   ;;  %s373_s2 = inlined_call_operand.vmem [shape: f32[1,32], index: 2, kind: input, shape index: {}]   ;;  %s374_s3 = inlined_call_operand.vmem [shape: f32[32,32], index: 3, kind: output, shape index: {0}]  }
   0x1   :  { %v245_v0 = vld [vmem:[%s369_s1] sm:$0xff]   ;;  %v246_v1 = vld [vmem:[%s369_s1 + $0x8] sm:$0xff]   ;;  %v247_v2 = vld [vmem:[%s369_s1 + $0x10] sm:$0xff]   ;;  %149 = vst.msk [vmem:[%s371_s4] sm:$0x1] %vm148_vm0, %v253_v14 }
   0x2   :  { %224 = vmatprep.subr.bf16.mxu0 %v245_v0  ;;  %v248_v3 = vld [vmem:[%s369_s1 + $0x18] sm:$0xff]   ;;  %v18_v4 = vld [vmem:[%s370_s0] sm:$0xff]  ;;  %v19_v5 = vld [vmem:[%s370_s0 + $0x8] sm:$0xff]  ;;  %150 = vst.msk [vmem:[%s372_s5] sm:$0x1] %vm148_vm0, %v253_v14 }
   0x3   :  { %225 = vmatpush3.bf16.msra.mxu0 %v245_v0  ;;  %v22_v6 = vpack.c.bf16 %v19_v5, %v18_v4  ;;  %v249_v7 = vld [vmem:[%s369_s1 + $0x20] sm:$0xff]   ;;  %v250_v8 = vld [vmem:[%s369_s1 + $0x28] sm:$0xff]   ;;  %v251_v9 = vld [vmem:[%s369_s1 + $0x30] sm:$0xff]  }
   0x4   :  { %226 = vmatprep.subr.bf16.mxu0 %v246_v1  ;;  %v252_v10 = vld [vmem:[%s369_s1 + $0x38] sm:$0xff]   ;;  %v20_v11 = vld [vmem:[%s370_s0 + $0x10] sm:$0xff]  ;;  %v205_v15 = vld [vmem:[%s373_s2] ss:$0 sm:$0xff] }
   0x5   :  { %240 = vmatprep.mubr.bf16.mxu0 %v22_v6  ;;  %v21_v12 = vld [vmem:[%s370_s0 + $0x18] sm:$0xff] }
   0x6   :  { %v23_v13 = vpack.c.bf16 %v21_v12, %v20_v11 }
   0x7   :  { %227 = vmatpush3.bf16.msra.mxu0 %v246_v1 }
   0x8   :  { %228 = vmatprep.subr.bf16.mxu0 %v247_v2  ;;  %v151_v51 = vld [vmem:[%s371_s4] sm:$0x1] }
   0x9   :  { %v169_v54 = vld [vmem:[%s372_s5] sm:$0x1] }
   0xb   :  { %229 = vmatpush3.bf16.msra.mxu0 %v247_v2 }
   0xc   :  { %230 = vmatprep.subr.bf16.mxu0 %v248_v3 }
   0xf   :  { %231 = vmatpush3.bf16.msra.mxu0 %v248_v3 }
  0x10   :  { %232 = vmatprep.subr.bf16.mxu0 %v249_v7 }
  0x13   :  { %233 = vmatpush3.bf16.msra.mxu0 %v249_v7 }
  0x14   :  { %234 = vmatprep.subr.bf16.mxu0 %v250_v8 }
  0x17   :  { %235 = vmatpush3.bf16.msra.mxu0 %v250_v8 }
  0x18   :  { %236 = vmatprep.subr.bf16.mxu0 %v251_v9 }
  0x1b   :  { %237 = vmatpush3.bf16.msra.mxu0 %v251_v9 }
  0x1c   :  { %238 = vmatprep.subr.bf16.mxu0 %v252_v10 }
  0x1f   :  { %239 = vmatpush3.bf16.msra.mxu0 %v252_v10 }
  0x22   :  { %241 = vmatmul.mubr.bf16.vlgmr.msra.gmra.mrb[0].mxu0 %v23_v13 }
  0xf5   :  { %v242_v16 = vpop.f32.mrb[0].mxu0 }
  0xf6   :  { %v138_v17 = vadd.f32 %v242_v16, %v205_v15  ;;  %v129_v18 = vpop.f32.mrb[1].mxu0 }
  0xf7   :  { %v130_v19 = vadd.f32 %v205_v15, %v129_v18  ;;  %v243_v20 = vpop.f32.mrb[2].mxu0 }
  0xf8   :  { %191 = vst.msk [vmem:[%s374_s3 + $0x10] sm:$0xff] %vm152_vm1, %v138_v17  ;;  %v141_v21 = vadd.f32 %v243_v20, %v205_v15  ;;  %v132_v22 = vpop.f32.mrb[3].mxu0  ;;  %v172_v25 = vmul.f32 %v138_v17, %v138_v17  ;;  %v156_v30 = vsel %vm152_vm1, %v138_v17, 0.0 }
  0xf9   :  { %v170_v23 = vmul.f32 %v130_v19, %v130_v19  ;;  %189 = vst.msk [vmem:[%s374_s3] sm:$0xff] %vm152_vm1, %v130_v19  ;;  %v133_v24 = vadd.f32 %v205_v15, %v132_v22  ;;  %v153_v26 = vsel %vm152_vm1, %v130_v19, 0.0 }
  0xfa   :  { %192 = vst.msk [vmem:[%s374_s3 + $0x18] sm:$0xff] %vm152_vm1, %v141_v21  ;;  %v173_v32 = vmul.f32 %v141_v21, %v141_v21  ;;  %v177_v36 = vsel %vm152_vm1, %v172_v25, 0.0  ;;  %v158_v37 = vsel %vm152_vm1, %v141_v21, 0.0 }
  0xfb   :  { %v154_v27 = vsel %vm152_vm1, %v133_v24, 0.0  ;;  %v171_v28 = vmul.f32 %v133_v24, %v133_v24  ;;  %190 = vst.msk [vmem:[%s374_s3 + $0x8] sm:$0xff] %vm152_vm1, %v133_v24  ;;  %v174_v31 = vsel %vm152_vm1, %v170_v23, 0.0 }
  0xfc   :  { %v155_v29 = vadd.f32 %v154_v27, %v153_v26  ;;  %v179_v40 = vsel %vm152_vm1, %v173_v32, 0.0 }
  0xfd   :  { %v175_v33 = vsel %vm152_vm1, %v171_v28, 0.0 }
  0xfe   :  { %v157_v34 = vadd.f32 %v156_v30, %v155_v29  ;;  %v176_v35 = vadd.f32 %v175_v33, %v174_v31 }
 0x100   :  { %v159_v38 = vadd.f32 %v158_v37, %v157_v34  ;;  %v178_v39 = vadd.f32 %v177_v36, %v176_v35 }
 0x102   :  { %v160_v41 = vrot.slane %v159_v38, 4  ;;  %v180_v42 = vadd.f32 %v179_v40, %v178_v39 }
 0x104   :  { %v161_v43 = vadd.f32 %v160_v41, %v159_v38  ;;  %v181_v44 = vrot.slane %v180_v42, 4 }
 0x106   :  { %v162_v45 = vrot.slane %v161_v43, 2  ;;  %v182_v46 = vadd.f32 %v181_v44, %v180_v42 }
 0x108   :  { %v163_v47 = vadd.f32 %v162_v45, %v161_v43  ;;  %v183_v48 = vrot.slane %v182_v46, 2 }
 0x10a   :  { %v164_v49 = vrot.slane %v163_v47, 1  ;;  %v184_v50 = vadd.f32 %v183_v48, %v182_v46 }
 0x10c   :  { %v165_v52 = vadd.f32 %v164_v49, %v163_v47  ;;  %v185_v53 = vrot.slane %v184_v50, 1 }
 0x10e   :  { %v166_v55 = vadd.f32 %v165_v52, %v151_v51  ;;  %v186_v56 = vadd.f32 %v185_v53, %v184_v50 }
 0x110   :  { %168 = vst.msk [vmem:[%s371_s4] sm:$0x1] %vm148_vm0, %v166_v55  ;;  %v187_v57 = vadd.f32 %v186_v56, %v169_v54 }
 0x112   :  { %188 = vst.msk [vmem:[%s372_s5] sm:$0x1] %vm148_vm0, %v187_v57 }

// kernel: performer_block_forward.17
= control target key start
LH: loop header
LB: loop body
LE: loop exit
PB: predicated region body
PF: predicated region fallthrough
CT: control target
= control target key end

     0   :  { %s83_s0 = inlined_call_operand.vmem [shape: f32[8,128], index: 0, kind: input, shape index: {}]   ;;  %s84_s1 = inlined_call_operand.vmem [shape: f32[1,128], index: 1, kind: input, shape index: {}]   ;;  %s85_s2 = inlined_call_operand.vmem [shape: f32[1,128], index: 2, kind: input, shape index: {}]   ;;  %s86_s3 = inlined_call_operand.vmem [shape: f32[8,128], index: 3, kind: input, shape index: {}]   ;;  %s87_s4 = inlined_call_operand.vmem [shape: f32[8,128], index: 4, kind: output, shape index: {}]  }
   0x1   :  { %v17_v0 = vld [vmem:[%s83_s0] sm:$0xff] }
   0x2   :  { %v41_v1 = vld [vmem:[%s84_s1] ss:$0 sm:$0xff] }
   0x3   :  { %v42_v2 = vld [vmem:[%s85_s2] ss:$0 sm:$0xff]  ;;  %v25_v3 = vmul.f32 %v41_v1, %v17_v0 }
   0x4   :  { %v34_v4 = vld [vmem:[%s86_s3] sm:$0xff] }
   0x5   :  { %v33_v5 = vadd.f32 %v42_v2, %v25_v3 }
   0x7   :  { %v35_v6 = vadd.f32 %v34_v4, %v33_v5 }
   0x9   :  { %36 = vst [vmem:[%s87_s4] sm:$0xff] %v35_v6 }

</bundles_post_ra>
